<compile_context>
chip_gen: v5e
topology: v5e:2x2
jax: 0.10.0
libtpu: 0.0.40
codegen_flags: <defaults>
</compile_context>

<pallas_src>
import numpy as np
import jax
import jax.numpy as jnp
from jax.experimental import pallas as pl
from jax.experimental.pallas import tpu as pltpu

N_NODES = 36
K_CHEB = 4
KIN = 40           # 36 spin cols + 1 bias-ones col + 3 zero-pad cols (sublane aligned)
OUT_LANES = 128    # lane-dense tail output; real logits live in cols 0..1


def _cdiv(a, b):
    return -(-a // b)


def _round_up(x, m):
    return _cdiv(x, m) * m


def _choose_tiling(B, block_b):
    """Balanced, sublane-aligned batch tiles.

    >= 2 (and even) tiles whenever B >= 256 so both v7x TensorCores get
    'parallel' grid steps; tile sizes are balanced to avoid padding a whole
    extra tile of zero rows (MXU waste)."""
    n_tiles = max(1, _cdiv(B, block_b))
    if B >= 256:
        n_tiles = max(2, n_tiles)
        if n_tiles % 2:
            n_tiles += 1
    BT = _round_up(_cdiv(B, n_tiles), 8)
    Bp = BT * n_tiles
    return BT, Bp, n_tiles


# ----------------------------- Pallas kernel --------------------------------
def _graph_model_kernel(x_ref, g1_ref, g2_ref, b2_ref, wt_ref, bt_ref, o_ref):
    x = x_ref[...]                                               # (BT, KIN=40)

    # ChebConv #1 (1 -> F): basis + weights + bias folded into G1_aug
    # (bias rides the constant-1 column of x) -> single MXU matmul + relu.
    h1 = jnp.dot(x, g1_ref[...], preferred_element_type=jnp.float32)
    h1 = jnp.maximum(h1, 0.0)                                    # (BT, 36F)

    # ChebConv #2 (F -> F): G2 = sum_k T_k(L)^T (x) W2_k, the dominant matmul.
    h2 = jnp.dot(h1, g2_ref[...], preferred_element_type=jnp.float32)
    h2 = jnp.maximum(h2 + b2_ref[...], 0.0)                      # (BT, 36F)

    # Tail Linear(36F -> 2), zero-padded to 128 lanes (unmasked vector stores).
    y = jnp.dot(h2, wt_ref[...], preferred_element_type=jnp.float32)
    o_ref[...] = y + bt_ref[...]                                 # (BT, 128)


def graph_model_pallas(spins, G1a, G2, b2row, wtP, btP, *, block_b=512):
    """spins: (B, 36) float32 in {-1,+1}. Returns (B, 2) float32."""
    B = spins.shape[0]
    NF = G2.shape[0]                                             # 36 * F

    BT, Bp, n_tiles = _choose_tiling(B, block_b)

    # Augment X with a constant-1 column (folds b1 into G1) + zero pad to KIN.
    x = spins.astype(jnp.float32)
    x = jnp.concatenate(
        [x, jnp.ones((B, 1), jnp.float32),
         jnp.zeros((B, KIN - N_NODES - 1), jnp.float32)], axis=1)  # (B, KIN)
    if Bp != B:
        x = jnp.pad(x, ((0, Bp - B), (0, 0)))    # padded rows discarded on return

    flops = 2 * Bp * (KIN * NF + NF * NF + NF * OUT_LANES)
    bytes_accessed = 4 * (Bp * KIN + KIN * NF + NF * NF + NF
                          + NF * OUT_LANES + OUT_LANES + Bp * OUT_LANES)

    out = pl.pallas_call(
        _graph_model_kernel,
        out_shape=jax.ShapeDtypeStruct((Bp, OUT_LANES), jnp.float32),
        grid_spec=pltpu.PrefetchScalarGridSpec(
            num_scalar_prefetch=0,
            grid=(n_tiles,),
            in_specs=[
                pl.BlockSpec((BT, KIN), lambda i: (i, 0)),        # spins tile
                pl.BlockSpec((KIN, NF), lambda i: (0, 0)),        # G1_aug (resident)
                pl.BlockSpec((NF, NF), lambda i: (0, 0)),         # G2 (resident)
                pl.BlockSpec((1, NF), lambda i: (0, 0)),          # b2 row
                pl.BlockSpec((NF, OUT_LANES), lambda i: (0, 0)),  # tail W padded
                pl.BlockSpec((1, OUT_LANES), lambda i: (0, 0)),   # tail b padded
            ],
            out_specs=pl.BlockSpec((BT, OUT_LANES), lambda i: (i, 0)),
        ),
        compiler_params=pltpu.CompilerParams(
            dimension_semantics=("parallel",),
            vmem_limit_bytes=48 * 1024 * 1024),
        cost_estimate=pl.CostEstimate(flops=flops, transcendentals=0,
                                      bytes_accessed=bytes_accessed),
    )(x, G1a, G2, b2row, wtP, btP)
    return out[:B, :2]


# ----------------------------- glue / setup ---------------------------------
def lattice_edge_index(lx=6, ly=6):
    """6x6 periodic square-lattice edge_index (2, E), node ids in [0, 36)."""
    edges = []
    for y in range(ly):
        for x in range(lx):
            i = y * lx + x
            for dx, dy in ((1, 0), (0, 1)):
                j = ((y + dy) % ly) * lx + ((x + dx) % lx)
                edges.append((i, j))
                edges.append((j, i))
    return jnp.asarray(np.array(edges, dtype=np.int32).T)        # (2, E)


def scaled_laplacian(edge_index, n=N_NODES):
    """ChebConv normalization (sym, lambda_max=2): L_hat = -D^-1/2 A D^-1/2."""
    A = jnp.zeros((n, n), jnp.float32).at[edge_index[0], edge_index[1]].set(1.0)
    A = jnp.maximum(A, A.T)
    deg = A.sum(axis=1)
    dinv = jnp.where(deg > 0, 1.0 / jnp.sqrt(deg), 0.0)
    return -(dinv[:, None] * A * dinv[None, :])


def cheb_basis(L, K=K_CHEB):
    """T_0..T_{K-1} of the scaled Laplacian, stacked (K, 36, 36)."""
    n = L.shape[0]
    T = [jnp.eye(n, dtype=jnp.float32), L]
    while len(T) < K:
        T.append(2.0 * (L @ T[-1]) - T[-2])
    return jnp.stack(T[:K])


def init_params(key, F):
    """Deterministic synthetic parameters with ChebConv / Linear shapes."""
    ks = jax.random.split(key, 6)
    w1 = 0.5 * jax.random.normal(ks[0], (K_CHEB, 1, F), jnp.float32)   # gc1: K x (1 -> F)
    b1 = 0.1 * jax.random.normal(ks[1], (F,), jnp.float32)
    w2 = jax.random.normal(ks[2], (K_CHEB, F, F), jnp.float32) / np.sqrt(F)
    b2 = 0.1 * jax.random.normal(ks[3], (F,), jnp.float32)
    wt = jax.random.normal(ks[4], (2, N_NODES, F), jnp.float32) / np.sqrt(N_NODES * F)
    bt = 0.1 * jax.random.normal(ks[5], (2,), jnp.float32)
    return w1, b1, w2, b2, wt, bt


def fold_params(L, w1, b1, w2, b2, wt, bt, F):
    """Fold Chebyshev basis + ChebConv weights into dense operators (host-side)."""
    T = cheb_basis(L)                                            # (K, 36, 36), T[k, n, m]
    NF = N_NODES * F
    # G1[m, n*F+f] = sum_k T[k,n,m] * W1[k,f]
    G1 = jnp.einsum('knm,kf->mnf', T, w1[:, 0, :]).reshape(N_NODES, NF)
    b1row = jnp.tile(b1.reshape(1, F), (1, N_NODES))             # (1, 36F), col = n*F+f
    # Fold b1 into G1 via the constant-1 input column; zero-pad rows to KIN.
    G1a = jnp.concatenate(
        [G1, b1row, jnp.zeros((KIN - N_NODES - 1, NF), jnp.float32)], axis=0)  # (KIN, NF)
    # G2[m*F+i, n*F+o] = sum_k T[k,n,m] * W2[k,i,o]
    G2 = jnp.einsum('knm,kio->mino', T, w2).reshape(NF, NF)
    b2row = jnp.tile(b2.reshape(1, F), (1, N_NODES))             # (1, 36F)
    # Lane-dense tail: pad (36F, 2) -> (36F, 128), bias (1, 2) -> (1, 128).
    wtF2 = wt.reshape(2, NF).T                                   # (36F, 2), node-major
    wtP = jnp.pad(wtF2, ((0, 0), (0, OUT_LANES - 2)))            # (36F, 128)
    btP = jnp.pad(bt.reshape(1, 2), ((0, 0), (0, OUT_LANES - 2)))  # (1, 128)
    return G1a, G2, b2row, wtP, btP


def nqs_unpack_np(packed, n=N_NODES):
    """nqs.unpack equivalent: packed uint64 bitstrings -> (B, n) spins in {-1,+1}.
    Done host-side in numpy (TPU kernels have no native 64-bit int bit ops)."""
    bits = (packed[:, None] >> np.arange(n, dtype=np.uint64)) & np.uint64(1)
    return 2.0 * bits.astype(np.float32) - 1.0


def reference_forward(spins, L, w1, b1, w2, b2, wt, bt):
    """Pure-JAX reference mirroring the PyTorch forward (serial Cheb recurrence)."""
    x = spins.astype(jnp.float32)[:, :, None]                    # (B, 36, 1)

    def cheb(h, W, b):
        t0 = h
        t1 = jnp.einsum('nm,bmi->bni', L, t0)
        t2 = 2.0 * jnp.einsum('nm,bmi->bni', L, t1) - t0
        t3 = 2.0 * jnp.einsum('nm,bmi->bni', L, t2) - t1
        ts = jnp.stack([t0, t1, t2, t3])                         # (K, B, 36, Cin)
        return jnp.einsum('kbni,kio->bno', ts, W) + b

    h1 = jax.nn.relu(cheb(x, w1, b1))
    h2 = jax.nn.relu(cheb(h1, w2, b2))
    flat = h2.reshape(h2.shape[0], -1)                           # (B, 36F) node-major
    return flat @ wt.reshape(2, -1).T + bt.reshape(1, 2)


# --------------------------------- main --------------------------------------
if __name__ == "__main__":
    F = 32
    key = jax.random.PRNGKey(0)
    kbits, kparams = jax.random.split(key)

    # graph (self.adj): 6x6 periodic lattice edge_index; assert like the module
    edge_index = lattice_edge_index()
    assert bool(jnp.all(edge_index >= 0)) and bool(jnp.all(edge_index < N_NODES))
    L = scaled_laplacian(edge_index)

    raw_params = init_params(kparams, F)
    folded = fold_params(L, *raw_params, F=F)

    # Three cases: small single-tile batch, a batch exercising balanced
    # multi-tile padding (260 -> 2 x 136), and one hitting the >=2-even-tiles
    # path at an exact tile multiple (512 -> 2 x 256).
    for B in (16, 260, 512):
        # Packed input x (B,) uint64 -- the format GraphModel.forward expects
        # (x.dim()==1 packed bitstrings) -- then unpack it (nqs.unpack) host-side.
        kb = jax.random.fold_in(kbits, B)
        bits = np.asarray(jax.random.bernoulli(kb, 0.5, (B, N_NODES)))
        x_packed = np.zeros((B,), dtype=np.uint64)
        for i in range(N_NODES):
            x_packed |= bits[:, i].astype(np.uint64) << np.uint64(i)
        spins = jnp.asarray(nqs_unpack_np(x_packed))             # (B, 36) ±1 float32

        out = jax.block_until_ready(graph_model_pallas(spins, *folded, block_b=512))
        assert out.shape == (B, 2)

        ref = reference_forward(spins, L, *raw_params)
        np.testing.assert_allclose(np.asarray(out), np.asarray(ref),
                                   rtol=1e-3, atol=1e-3)

    print("KERNEL_OK")
</pallas_src>

<mosaic_0001>
module attributes {stable_mosaic.version = 11 : i64} {
  func.func @_graph_model_kernel(%arg0: i32, %arg1: memref<16x40xf32, #tpu.memory_space<vmem>>, %arg2: memref<40x1152xf32, #tpu.memory_space<vmem>>, %arg3: memref<1152x1152xf32, #tpu.memory_space<vmem>>, %arg4: memref<1x1152xf32, #tpu.memory_space<vmem>>, %arg5: memref<1152x128xf32, #tpu.memory_space<vmem>>, %arg6: memref<1x128xf32, #tpu.memory_space<vmem>>, %arg7: memref<16x128xf32, #tpu.memory_space<vmem>>) attributes {dimension_semantics = [#tpu.dimension_semantics<parallel>], iteration_bounds = array<i64: 1>, scalar_prefetch = 0 : i64, scratch_operands = 0 : i64, tpu.core_type = #tpu.core_type<tc>, window_params = [{transform_indices = @transform_0, window_bounds = array<i64: 16, 40>}, {pipeline_mode = #tpu.pipeline_mode<synchronous>, transform_indices = @transform_1, window_bounds = array<i64: 40, 1152>}, {pipeline_mode = #tpu.pipeline_mode<synchronous>, transform_indices = @transform_2, window_bounds = array<i64: 1152, 1152>}, {pipeline_mode = #tpu.pipeline_mode<synchronous>, transform_indices = @transform_3, window_bounds = array<i64: 1, 1152>}, {pipeline_mode = #tpu.pipeline_mode<synchronous>, transform_indices = @transform_4, window_bounds = array<i64: 1152, 128>}, {pipeline_mode = #tpu.pipeline_mode<synchronous>, transform_indices = @transform_5, window_bounds = array<i64: 1, 128>}, {transform_indices = @transform_6, window_bounds = array<i64: 16, 128>}]} {
    %c0 = arith.constant 0 : index
    %c0_0 = arith.constant 0 : index
    %0 = vector.load %arg1[%c0, %c0_0] : memref<16x40xf32, #tpu.memory_space<vmem>>, vector<16x40xf32>
    %c0_1 = arith.constant 0 : index
    %c0_2 = arith.constant 0 : index
    %1 = vector.load %arg2[%c0_1, %c0_2] : memref<40x1152xf32, #tpu.memory_space<vmem>>, vector<40x1152xf32>
    %cst = arith.constant dense<0.000000e+00> : vector<16x1152xf32>
    %2 = tpu.matmul %0, %1, %cst {dimension_numbers = #tpu.dot_dimension_numbers<[1], [0], [0], [1], [0, 0, 1, 1], [], []>} : vector<16x40xf32>, vector<40x1152xf32>, vector<16x1152xf32> -> vector<16x1152xf32>
    %cst_3 = arith.constant 0.000000e+00 : f32
    %3 = vector.broadcast %cst_3 : f32 to vector<16x1152xf32>
    %4 = arith.maximumf %2, %3 : vector<16x1152xf32>
    %c0_4 = arith.constant 0 : index
    %c0_5 = arith.constant 0 : index
    %5 = vector.load %arg3[%c0_4, %c0_5] : memref<1152x1152xf32, #tpu.memory_space<vmem>>, vector<1152x1152xf32>
    %cst_6 = arith.constant dense<0.000000e+00> : vector<16x1152xf32>
    %6 = tpu.matmul %4, %5, %cst_6 {dimension_numbers = #tpu.dot_dimension_numbers<[1], [0], [0], [1], [0, 0, 1, 1], [], []>} : vector<16x1152xf32>, vector<1152x1152xf32>, vector<16x1152xf32> -> vector<16x1152xf32>
    %c0_7 = arith.constant 0 : index
    %c0_8 = arith.constant 0 : index
    %7 = vector.load %arg4[%c0_7, %c0_8] : memref<1x1152xf32, #tpu.memory_space<vmem>>, vector<1x1152xf32>
    %8 = vector.broadcast %7 : vector<1x1152xf32> to vector<16x1152xf32>
    %9 = arith.addf %6, %8 : vector<16x1152xf32>
    %cst_9 = arith.constant 0.000000e+00 : f32
    %10 = vector.broadcast %cst_9 : f32 to vector<16x1152xf32>
    %11 = arith.maximumf %9, %10 : vector<16x1152xf32>
    %c0_10 = arith.constant 0 : index
    %c0_11 = arith.constant 0 : index
    %12 = vector.load %arg5[%c0_10, %c0_11] : memref<1152x128xf32, #tpu.memory_space<vmem>>, vector<1152x128xf32>
    %cst_12 = arith.constant dense<0.000000e+00> : vector<16x128xf32>
    %13 = tpu.matmul %11, %12, %cst_12 {dimension_numbers = #tpu.dot_dimension_numbers<[1], [0], [0], [1], [0, 0, 1, 1], [], []>} : vector<16x1152xf32>, vector<1152x128xf32>, vector<16x128xf32> -> vector<16x128xf32>
    %c0_13 = arith.constant 0 : index
    %c0_14 = arith.constant 0 : index
    %14 = vector.load %arg6[%c0_13, %c0_14] : memref<1x128xf32, #tpu.memory_space<vmem>>, vector<1x128xf32>
    %15 = vector.broadcast %14 : vector<1x128xf32> to vector<16x128xf32>
    %16 = arith.addf %13, %15 : vector<16x128xf32>
    %c0_15 = arith.constant 0 : index
    %c0_16 = arith.constant 0 : index
    %17 = vector.load %arg7[%c0_15, %c0_16] : memref<16x128xf32, #tpu.memory_space<vmem>>, vector<16x128xf32>
    tpu.vector_store %arg7[%c0_15, %c0_16], %16 {strides = array<i32>} : memref<16x128xf32, #tpu.memory_space<vmem>>, vector<16x128xf32>,
    return
  }
  func.func @transform_0(%arg0: i32) -> (i32, i32) {
    %c0_i32 = arith.constant 0 : i32
    %c0_i32_0 = arith.constant 0 : i32
    return %arg0, %c0_i32 : i32, i32
  }
  func.func @transform_1(%arg0: i32) -> (i32, i32) {
    %c0_i32 = arith.constant 0 : i32
    %c0_i32_0 = arith.constant 0 : i32
    %c0_i32_1 = arith.constant 0 : i32
    return %c0_i32, %c0_i32_0 : i32, i32
  }
  func.func @transform_2(%arg0: i32) -> (i32, i32) {
    %c0_i32 = arith.constant 0 : i32
    %c0_i32_0 = arith.constant 0 : i32
    %c0_i32_1 = arith.constant 0 : i32
    return %c0_i32, %c0_i32_0 : i32, i32
  }
  func.func @transform_3(%arg0: i32) -> (i32, i32) {
    %c0_i32 = arith.constant 0 : i32
    %c0_i32_0 = arith.constant 0 : i32
    %c0_i32_1 = arith.constant 0 : i32
    return %c0_i32, %c0_i32_0 : i32, i32
  }
  func.func @transform_4(%arg0: i32) -> (i32, i32) {
    %c0_i32 = arith.constant 0 : i32
    %c0_i32_0 = arith.constant 0 : i32
    %c0_i32_1 = arith.constant 0 : i32
    return %c0_i32, %c0_i32_0 : i32, i32
  }
  func.func @transform_5(%arg0: i32) -> (i32, i32) {
    %c0_i32 = arith.constant 0 : i32
    %c0_i32_0 = arith.constant 0 : i32
    %c0_i32_1 = arith.constant 0 : i32
    return %c0_i32, %c0_i32_0 : i32, i32
  }
  func.func @transform_6(%arg0: i32) -> (i32, i32) {
    %c0_i32 = arith.constant 0 : i32
    %c0_i32_0 = arith.constant 0 : i32
    return %arg0, %c0_i32 : i32, i32
  }
}

</mosaic_0001>

<bundles_post_ra>
// kernel: tpu_custom_call.1
= control target key start
LH: loop header
LB: loop body
LE: loop exit
PB: predicated region body
PF: predicated region fallthrough
CT: control target
= control target key end

     0   :  { %11 = vsyncpa [#allocation3], 0  ;;  %s4872_s0 = inlined_call_operand.hbm [shape: f32[16,40], index: 0, kind: input, shape index: {}]   ;;  %s4873_s1 = inlined_call_operand.hbm [shape: f32[40,1152], index: 1, kind: input, shape index: {}]   ;;  %s4874_s2 = inlined_call_operand.hbm [shape: f32[1152,1152], index: 2, kind: input, shape index: {}]   ;;  %s4875_s3 = inlined_call_operand.hbm [shape: f32[1,1152], index: 3, kind: input, shape index: {}]   ;;  %s4876_s4 = inlined_call_operand.hbm [shape: f32[1152,128], index: 4, kind: input, shape index: {}]   ;;  %s4877_s5 = inlined_call_operand.hbm [shape: f32[1,128], index: 5, kind: input, shape index: {}]   ;;  %s4878_s6 = inlined_call_operand.hbm [shape: f32[16,128], index: 6, kind: output, shape index: {}]  }
   0x1   :  { %12 = vsyncpa [#allocation6], 0 }
   0x2   :  { %13 = vsyncpa [#allocation9], 0 }
   0x3   :  { %14 = vsyncpa [#allocation12], 0  ;;  %s33_s23 = sshll.u32 %s4873_s1, 4  ;;  %s34_s23 = int_to_ptr.hbm [resolvable:$true] %s33_s23 }
   0x4   :  { %15 = vsyncpa [#allocation4], 0  ;;  %s4181_s24 = smov [#allocation5]   ;;  %s60_s28 = sshll.u32 %s4875_s3, 4  ;;  %s61_s28 = int_to_ptr.hbm [resolvable:$true] %s60_s28 }
   0x5   :  { %s35_s25 = sshll.u32 %s4181_s24, 4  ;;  %s4182_s29 = smov 1152   ;;  %s36_s25 = int_to_ptr.vmem [resolvable:$true] %s35_s25 }
   0x6   :  { %s4183_s30 = smov 72   ;;  %s4184_s7 = smov [#allocation8]  }
   0x7   :  { %41 = dma.hbm_to_vmem [thread:$0]  %s34_s23, 5760, %s36_s25, [#allocation6], %s4182_s29, %s4182_s29, %s4183_s30  }
   0x8   :  { %s62_s8 = sshll.u32 %s4184_s7, 4  ;;  %s20_s11 = sshll.u32 %s4872_s0, 4  ;;  %s63_s8 = int_to_ptr.vmem [resolvable:$true] %s62_s8  ;;  %s21_s11 = int_to_ptr.hbm [resolvable:$true] %s20_s11 }
   0x9   :  { %65 = dma.hbm_to_vmem [thread:$0]  %s61_s28, 144, %s63_s8, [#allocation9]  }
   0xa   :  { %s4185_s1 = smov [#allocation2]   ;;  %s46_s3 = sshll.u32 %s4874_s2, 4  ;;  %s47_s3 = int_to_ptr.hbm [resolvable:$true] %s46_s3 }
   0xb   :  { %s22_s12 = sshll.u32 %s4185_s1, 4  ;;  %s4186_s15 = smov 128   ;;  %s23_s12 = int_to_ptr.vmem [resolvable:$true] %s22_s12 }
   0xc   :  { %s4187_s16 = smov 8   ;;  %s4188_s17 = smov [#allocation7]  }
   0xd   :  { %28 = dma.hbm_to_vmem [thread:$0]  %s21_s11, 256, %s23_s12, [#allocation3], %s4186_s15, %s4186_s15, %s4187_s16  }
   0xe   :  { %s48_s18 = sshll.u32 %s4188_s17, 4  ;;  %s70_s20 = sshll.u32 %s4876_s4, 4  ;;  %s49_s18 = int_to_ptr.vmem [resolvable:$true] %s48_s18  ;;  %s71_s20 = int_to_ptr.hbm [resolvable:$true] %s70_s20 }
   0xf   :  { %54 = dma.hbm_to_vmem [thread:$0]  %s47_s3, 165888, %s49_s18, [#allocation6], %s4182_s29, %s4182_s29, %s4183_s30  }
  0x10   :  { %s84_s2 = sshll.u32 %s4877_s5, 4  ;;  %s4189_s23 = smov [#allocation10]   ;;  %s85_s2 = int_to_ptr.hbm [resolvable:$true] %s84_s2 }
  0x11   :  { %s72_s24 = sshll.u32 %s4189_s23, 4  ;;  %s4190_s25 = smov [#allocation11]   ;;  %s73_s24 = int_to_ptr.vmem [resolvable:$true] %s72_s24 }
  0x12   :  { %78 = dma.hbm_to_vmem [thread:$0]  %s71_s20, 18432, %s73_s24, [#allocation9], %s4186_s15, %s4186_s15, %s4187_s16  }
  0x13   :  { %s86_s26 = sshll.u32 %s4190_s25, 4  ;;  %s87_s26 = int_to_ptr.vmem [resolvable:$true] %s86_s26 }
  0x14   :  { %89 = dma.hbm_to_vmem [thread:$0]  %s85_s2, 16, %s87_s26, [#allocation12]  }
  0x15   :  { %4171 = dma.done.wait [#allocation3], 256  }
  0x16   :  { %4172 = vsyncadd [#allocation3], 4294967040 }
  0x17   :  { %4173 = dma.done.wait [#allocation6], 171648  }
  0x18   :  { %4174 = vsyncadd [#allocation6], 4294795648 }
  0x19   :  { %4175 = dma.done.wait [#allocation9], 18576  }
  0x1a   :  { %4176 = vsyncadd [#allocation9], 4294948720 }
  0x1b   :  { %4177 = dma.done.wait [#allocation12], 16  }
  0x1c   :  { %4178 = vsyncadd [#allocation12], 4294967280  ;;  %v152_v0 = vld [vmem:[#allocation5 + $0x120] sm:$0xff]  ;;  %v153_v1 = vld [vmem:[#allocation5 + $0x128] sm:$0xff]  ;;  %vm161_vm0 = vcmask 326656   ;;  %s4191_s4 = smov [#allocation13]  }
  0x1d   :  { %v154_v2 = vld [vmem:[#allocation5 + $0x130] sm:$0xff]  ;;  %179 = vmatpush.msra.mxu0 %v152_v0  ;;  %202 = vmatpush.msra.mxu3 %v153_v1  ;;  %v143_v3 = vld [vmem:[#allocation5 + $0xd8] sm:$0xff]  ;;  %v144_v4 = vld [vmem:[#allocation5 + $0xe0] sm:$0xff]  ;;  %s3953_s5 = sshll.u32 %s4191_s4, 4  ;;  %s3955_s29 = sshll.u32 %s4878_s6, 4  ;;  %s3954_s5 = int_to_ptr.vmem [resolvable:$true] %s3953_s5  ;;  %s3956_s29 = int_to_ptr.hbm [resolvable:$true] %s3955_s29 }
  0x1e   :  { %v145_v5 = vld [vmem:[#allocation5 + $0xe8] sm:$0xff]  ;;  %225 = vmatpush.msra.mxu2 %v154_v2  ;;  %v134_v6 = vld [vmem:[#allocation5 + $0x90] sm:$0xff]  ;;  %v135_v7 = vld [vmem:[#allocation5 + $0x98] sm:$0xff] }
  0x1f   :  { %180 = vmatpush.msra.mxu0 %v143_v3  ;;  %203 = vmatpush.msra.mxu3 %v144_v4  ;;  %v136_v8 = vld [vmem:[#allocation5 + $0xa0] sm:$0xff]  ;;  %v125_v9 = vld [vmem:[#allocation5 + $0x48] sm:$0xff]  ;;  %v126_v10 = vld [vmem:[#allocation5 + $0x50] sm:$0xff] }
  0x20   :  { %226 = vmatpush.msra.mxu2 %v145_v5  ;;  %v127_v11 = vld [vmem:[#allocation5 + $0x58] sm:$0xff]  ;;  %v116_v12 = vld [vmem:[#allocation5] sm:$0xff]  ;;  %v117_v13 = vld [vmem:[#allocation5 + $0x8] sm:$0xff] }
  0x21   :  { %181 = vmatpush.msra.mxu0 %v134_v6  ;;  %204 = vmatpush.msra.mxu3 %v135_v7  ;;  %v118_v14 = vld [vmem:[#allocation5 + $0x10] sm:$0xff]  ;;  %v155_v16 = vld [vmem:[#allocation5 + $0x138] sm:$0xff]  ;;  %v157_v18 = vld [vmem:[#allocation5 + $0x148] sm:$0xff] }
  0x22   :  { %227 = vmatpush.msra.mxu2 %v136_v8  ;;  %v4251_v15 = vld [vmem:[#allocation2] sm:$0xff]  ;;  %v156_v19 = vld [vmem:[#allocation5 + $0x140] sm:$0xff]  ;;  %v149_v21 = vld [vmem:[#allocation5 + $0x108] sm:$0xff]  ;;  %294 = vmatpush.msra.mxu1 %v157_v18 }
  0x23   :  { %182 = vmatpush.msra.mxu0 %v125_v9  ;;  %205 = vmatpush.msra.mxu3 %v126_v10  ;;  %v158_v17 = vld [vmem:[#allocation5 + $0x150] sm:$0xff]  ;;  %v148_v22 = vld [vmem:[#allocation5 + $0x100] sm:$0xff]  ;;  %v147_v23 = vld [vmem:[#allocation5 + $0xf8] sm:$0xff] }
  0x24   :  { %228 = vmatpush.msra.mxu2 %v127_v11  ;;  %v146_v20 = vld [vmem:[#allocation5 + $0xf0] sm:$0xff]  ;;  %v137_v24 = vld [vmem:[#allocation5 + $0xa8] sm:$0xff]  ;;  %v140_v25 = vld [vmem:[#allocation5 + $0xc0] sm:$0xff]  ;;  %295 = vmatpush.msra.mxu1 %v148_v22 }
  0x25   :  { %183 = vmatpush.msra.mxu0 %v116_v12  ;;  %206 = vmatpush.msra.mxu3 %v117_v13  ;;  %v139_v26 = vld [vmem:[#allocation5 + $0xb8] sm:$0xff]  ;;  %v138_v27 = vld [vmem:[#allocation5 + $0xb0] sm:$0xff]  ;;  %v128_v28 = vld [vmem:[#allocation5 + $0x60] sm:$0xff] }
  0x26   :  { %229 = vmatpush.msra.mxu2 %v118_v14  ;;  %3971 = vmatmul.msk.f32.vlgmr.msra.gmra.mxu0 %vm161_vm0, %v4251_v15  ;;  %v131_v29 = vld [vmem:[#allocation5 + $0x78] sm:$0xff]  ;;  %v122_v32 = vld [vmem:[#allocation5 + $0x30] sm:$0xff]  ;;  %v129_v34 = vld [vmem:[#allocation5 + $0x68] sm:$0xff] }
  0x27   :  { %3973 = vmatmul.msk.f32.vlgmr.msra.gmra.mxu3 %vm161_vm0, %v4251_v15  ;;  %3975 = vmatmul.msk.f32.vlgmr.msra.gmra.mxu2 %vm161_vm0, %v4251_v15  ;;  %v4259_v30 = vld [vmem:[#allocation2 + $0x8] sm:$0xff]  ;;  %v130_v33 = vld [vmem:[#allocation5 + $0x70] sm:$0xff]  ;;  %v121_v36 = vld [vmem:[#allocation5 + $0x28] sm:$0xff] }
  0x28   :  { %248 = vmatpush.msrb.mxu3 %v155_v16  ;;  %317 = vmatpush.msrb.mxu2 %v158_v17  ;;  %v119_v31 = vld [vmem:[#allocation5 + $0x18] sm:$0xff]  ;;  %v120_v37 = vld [vmem:[#allocation5 + $0x20] sm:$0xff]  ;;  %v150_v38 = vld [vmem:[#allocation5 + $0x110] sm:$0xff] }
  0x29   :  { %271 = vmatpush.msrb.mxu0 %v156_v19  ;;  %296 = vmatpush.msra.mxu1 %v139_v26  ;;  %v159_v35 = vld [vmem:[#allocation5 + $0x158] sm:$0xff]  ;;  %v160_v39 = vld [vmem:[#allocation5 + $0x160] sm:$0xff]  ;;  %v141_v43 = vld [vmem:[#allocation5 + $0xc8] sm:$0xff] }
  0x2a   :  { %249 = vmatpush.msrb.mxu3 %v146_v20  ;;  %318 = vmatpush.msrb.mxu2 %v149_v21  ;;  %v672_v40 = vld [vmem:[#allocation7 + $0x8b8] sm:$0xff]  ;;  %v663_v42 = vld [vmem:[#allocation7 + $0x870] sm:$0xff]  ;;  %v142_v47 = vld [vmem:[#allocation5 + $0xd0] sm:$0xff] }
  0x2b   :  { %272 = vmatpush.msrb.mxu0 %v147_v23  ;;  %297 = vmatpush.msra.mxu1 %v130_v33  ;;  %v528_v41 = vld [vmem:[#allocation7 + $0x438] sm:$0xff]  ;;  %v151_v44 = vld [vmem:[#allocation5 + $0x118] sm:$0xff]  ;;  %v510_v48 = vld [vmem:[#allocation7 + $0x3a8] sm:$0xff] }
  0x2c   :  { %250 = vmatpush.msrb.mxu3 %v137_v24  ;;  %319 = vmatpush.msrb.mxu2 %v140_v25  ;;  %v519_v45 = vld [vmem:[#allocation7 + $0x3f0] sm:$0xff]  ;;  %v132_v46 = vld [vmem:[#allocation5 + $0x80] sm:$0xff]  ;;  %v654_v49 = vld [vmem:[#allocation7 + $0x828] sm:$0xff] }
  0x2d   :  { %273 = vmatpush.msrb.mxu0 %v138_v27  ;;  %298 = vmatpush.msra.mxu1 %v121_v36  ;;  %v123_v50 = vld [vmem:[#allocation5 + $0x38] sm:$0xff]  ;;  %v133_v51 = vld [vmem:[#allocation5 + $0x88] sm:$0xff]  ;;  %v816_v53 = vld [vmem:[#allocation7 + $0xd38] sm:$0xff] }
  0x2e   :  { %251 = vmatpush.msrb.mxu3 %v128_v28  ;;  %320 = vmatpush.msrb.mxu2 %v131_v29  ;;  %v501_v52 = vld [vmem:[#allocation7 + $0x360] sm:$0xff]  ;;  %v124_v55 = vld [vmem:[#allocation5 + $0x40] sm:$0xff]  ;;  %v807_v57 = vld [vmem:[#allocation7 + $0xcf0] sm:$0xff] }
  0x2f   :  { %3974 = vmatmul.msk.f32.gmra.mxu3 %vm161_vm0, %v4259_v30  ;;  %3976 = vmatmul.msk.f32.gmra.mxu2 %vm161_vm0, %v4259_v30  ;;  %v645_v54 = vld [vmem:[#allocation7 + $0x7e0] sm:$0xff]  ;;  %v492_v56 = vld [vmem:[#allocation7 + $0x318] sm:$0xff]  ;;  %v483_v58 = vld [vmem:[#allocation7 + $0x2d0] sm:$0xff] }
  0x30   :  { %252 = vmatpush.msrb.mxu3 %v119_v31  ;;  %321 = vmatpush.msrb.mxu2 %v122_v32  ;;  %v636_v59 = vld [vmem:[#allocation7 + $0x798] sm:$0xff]  ;;  %v798_v60 = vld [vmem:[#allocation7 + $0xca8] sm:$0xff]  ;;  %v627_v63 = vld [vmem:[#allocation7 + $0x750] sm:$0xff] }
  0x31   :  { %3972 = vmatmul.msk.f32.gmra.mxu0 %vm161_vm0, %v4259_v30  ;;  %3981 = vmatmul.msk.f32.vlgmr.msra.gmra.mxu1 %vm161_vm0, %v4251_v15  ;;  %v960_v61 = vld [vmem:[#allocation7 + $0x11b8] sm:$0xff]  ;;  %v474_v62 = vld [vmem:[#allocation7 + $0x288] sm:$0xff]  ;;  %v789_v0 = vld [vmem:[#allocation7 + $0xc60] sm:$0xff] }
  0x32   :  { %274 = vmatpush.msrb.mxu0 %v129_v34  ;;  %340 = vmatpush.msra.mxu3 %v159_v35  ;;  %v951_v1 = vld [vmem:[#allocation7 + $0x1170] sm:$0xff]  ;;  %v465_v2 = vld [vmem:[#allocation7 + $0x240] sm:$0xff]  ;;  %v618_v3 = vld [vmem:[#allocation7 + $0x708] sm:$0xff] }
  0x33   :  { %1734 = vmatpush.msra.mxu2 %v672_v40  ;;  %1711 = vmatpush.msrb.mxu1 %v528_v41  ;;  %v942_v4 = vld [vmem:[#allocation7 + $0x1128] sm:$0xff]  ;;  %v780_v5 = vld [vmem:[#allocation7 + $0xc18] sm:$0xff]  ;;  %v609_v7 = vld [vmem:[#allocation7 + $0x6c0] sm:$0xff] }
  0x34   :  { %275 = vmatpush.msrb.mxu0 %v120_v37  ;;  %341 = vmatpush.msra.mxu3 %v150_v38  ;;  %v456_v6 = vld [vmem:[#allocation7 + $0x1f8] sm:$0xff]  ;;  %v771_v8 = vld [vmem:[#allocation7 + $0xbd0] sm:$0xff]  ;;  %v933_v11 = vld [vmem:[#allocation7 + $0x10e0] sm:$0xff] }
  0x35   :  { %1735 = vmatpush.msra.mxu2 %v663_v42  ;;  %1712 = vmatpush.msrb.mxu1 %v519_v45  ;;  %v447_v9 = vld [vmem:[#allocation7 + $0x1b0] sm:$0xff]  ;;  %v600_v10 = vld [vmem:[#allocation7 + $0x678] sm:$0xff]  ;;  %v762_v12 = vld [vmem:[#allocation7 + $0xb88] sm:$0xff] }
  0x36   :  { %363 = vmatpush.msra.mxu0 %v160_v39  ;;  %342 = vmatpush.msra.mxu3 %v141_v43  ;;  %v438_v13 = vld [vmem:[#allocation7 + $0x168] sm:$0xff]  ;;  %v591_v14 = vld [vmem:[#allocation7 + $0x630] sm:$0xff]  ;;  %v924_v16 = vld [vmem:[#allocation7 + $0x1098] sm:$0xff] }
  0x37   :  { %3977 = vmatmul.msk.f32.vlgmr.msrb.gmra.mxu3 %vm161_vm0, %v4251_v15  ;;  %3983 = vmatmul.msk.f32.vlgmr.msrb.gmra.mxu2 %vm161_vm0, %v4251_v15  ;;  %v753_v17 = vld [vmem:[#allocation7 + $0xb40] sm:$0xff]  ;;  %v582_v19 = vld [vmem:[#allocation7 + $0x5e8] sm:$0xff]  ;;  %v744_v20 = vld [vmem:[#allocation7 + $0xaf8] sm:$0xff] }
  0x38   :  { %364 = vmatpush.msra.mxu0 %v151_v44  ;;  %343 = vmatpush.msra.mxu3 %v132_v46  ;;  %v429_v18 = vld [vmem:[#allocation7 + $0x120] sm:$0xff]  ;;  %v420_v21 = vld [vmem:[#allocation7 + $0xd8] sm:$0xff]  ;;  %v735_v22 = vld [vmem:[#allocation7 + $0xab0] sm:$0xff] }
  0x39   :  { %3979 = vmatmul.msk.f32.vlgmr.msrb.gmra.mxu0 %vm161_vm0, %v4251_v15  ;;  %1713 = vmatpush.msrb.mxu1 %v510_v48  ;;  %v411_v23 = vld [vmem:[#allocation7 + $0x90] sm:$0xff]  ;;  %v564_v24 = vld [vmem:[#allocation7 + $0x558] sm:$0xff]  ;;  %v726_v26 = vld [vmem:[#allocation7 + $0xa68] sm:$0xff] }
  0x3a   :  { %365 = vmatpush.msra.mxu0 %v142_v47  ;;  %1736 = vmatpush.msra.mxu2 %v654_v49  ;;  %v915_v25 = vld [vmem:[#allocation7 + $0x1050] sm:$0xff]  ;;  %v402_v27 = vld [vmem:[#allocation7 + $0x48] sm:$0xff]  ;;  %v717_v31 = vld [vmem:[#allocation7 + $0xa20] sm:$0xff] }
  0x3b   :  { %3982 = vmatmul.msk.f32.gmra.mxu1 %vm161_vm0, %v4259_v30  ;;  %344 = vmatpush.msra.mxu3 %v123_v50  ;;  %v555_v28 = vld [vmem:[#allocation7 + $0x510] sm:$0xff]  ;;  %v906_v29 = vld [vmem:[#allocation7 + $0x1008] sm:$0xff]  ;;  %v393_v32 = vld [vmem:[#allocation7] sm:$0xff] }
  0x3c   :  { %366 = vmatpush.msra.mxu0 %v133_v51  ;;  %1714 = vmatpush.msrb.mxu1 %v501_v52  ;;  %v1104_v33 = vld [vmem:[#allocation7 + $0x1638] sm:$0xff]  ;;  %v546_v34 = vld [vmem:[#allocation7 + $0x4c8] sm:$0xff]  ;;  %v897_v36 = vld [vmem:[#allocation7 + $0xfc0] sm:$0xff] }
  0x3d   :  { %1757 = vmatpush.msrb.mxu3 %v816_v53  ;;  %1737 = vmatpush.msra.mxu2 %v645_v54  ;;  %v708_v35 = vld [vmem:[#allocation7 + $0x9d8] sm:$0xff]  ;;  %v537_v37 = vld [vmem:[#allocation7 + $0x480] sm:$0xff]  ;;  %v699_v38 = vld [vmem:[#allocation7 + $0x990] sm:$0xff] }
  0x3e   :  { %367 = vmatpush.msra.mxu0 %v124_v55  ;;  %1715 = vmatpush.msrb.mxu1 %v492_v56  ;;  %v1248_v39 = vld [vmem:[#allocation7 + $0x1ab8] sm:$0xff]  ;;  %v1086_v40 = vld [vmem:[#allocation7 + $0x15a8] sm:$0xff]  ;;  %v1239_v43 = vld [vmem:[#allocation7 + $0x1a70] sm:$0xff] }
  0x3f   :  { %3978 = vmatmul.msk.f32.gmra.mxu3 %vm161_vm0, %v4259_v30  ;;  %3984 = vmatmul.msk.f32.gmra.mxu2 %vm161_vm0, %v4259_v30  ;;  %v888_v41 = vld [vmem:[#allocation7 + $0xf78] sm:$0xff]  ;;  %v690_v42 = vld [vmem:[#allocation7 + $0x948] sm:$0xff]  ;;  %v1077_v44 = vld [vmem:[#allocation7 + $0x1560] sm:$0xff] }
  0x40   :  { %1758 = vmatpush.msrb.mxu3 %v807_v57  ;;  %1716 = vmatpush.msrb.mxu1 %v483_v58  ;;  %v879_v45 = vld [vmem:[#allocation7 + $0xf30] sm:$0xff]  ;;  %v681_v46 = vld [vmem:[#allocation7 + $0x900] sm:$0xff]  ;;  %v1230_v47 = vld [vmem:[#allocation7 + $0x1a28] sm:$0xff] }
  0x41   :  { %3980 = vmatmul.msk.f32.gmra.mxu0 %vm161_vm0, %v4259_v30  ;;  %1738 = vmatpush.msra.mxu2 %v636_v59  ;;  %v1392_v48 = vld [vmem:[#allocation7 + $0x1f38] sm:$0xff]  ;;  %v870_v50 = vld [vmem:[#allocation7 + $0xee8] sm:$0xff]  ;;  %v1221_v51 = vld [vmem:[#allocation7 + $0x19e0] sm:$0xff] }
  0x42   :  { %1759 = vmatpush.msrb.mxu3 %v798_v60  ;;  %1780 = vmatpush.msrb.mxu0 %v960_v61  ;;  %v1068_v49 = vld [vmem:[#allocation7 + $0x1518] sm:$0xff]  ;;  %v1383_v52 = vld [vmem:[#allocation7 + $0x1ef0] sm:$0xff]  ;;  %v861_v54 = vld [vmem:[#allocation7 + $0xea0] sm:$0xff] }
  0x43   :  { %1717 = vmatpush.msrb.mxu1 %v474_v62  ;;  %1739 = vmatpush.msra.mxu2 %v627_v63  ;;  %v1059_v53 = vld [vmem:[#allocation7 + $0x14d0] sm:$0xff]  ;;  %v1212_v55 = vld [vmem:[#allocation7 + $0x1998] sm:$0xff]  ;;  %v1374_v56 = vld [vmem:[#allocation7 + $0x1ea8] sm:$0xff] }
  0x44   :  { %1760 = vmatpush.msrb.mxu3 %v789_v0  ;;  %1781 = vmatpush.msrb.mxu0 %v951_v1  ;;  %v1050_v57 = vld [vmem:[#allocation7 + $0x1488] sm:$0xff]  ;;  %v852_v58 = vld [vmem:[#allocation7 + $0xe58] sm:$0xff]  ;;  %v1203_v59 = vld [vmem:[#allocation7 + $0x1950] sm:$0xff] }
  0x45   :  { %1718 = vmatpush.msrb.mxu1 %v465_v2  ;;  %1740 = vmatpush.msra.mxu2 %v618_v3  ;;  %v1365_v60 = vld [vmem:[#allocation7 + $0x1e60] sm:$0xff]  ;;  %v843_v62 = vld [vmem:[#allocation7 + $0xe10] sm:$0xff]  ;;  %v1194_v63 = vld [vmem:[#allocation7 + $0x1908] sm:$0xff] }
  0x46   :  { %1782 = vmatpush.msrb.mxu0 %v942_v4  ;;  %1761 = vmatpush.msrb.mxu3 %v780_v5  ;;  %v1041_v61 = vld [vmem:[#allocation7 + $0x1440] sm:$0xff]  ;;  %v1356_v0 = vld [vmem:[#allocation7 + $0x1e18] sm:$0xff]  ;;  %v834_v2 = vld [vmem:[#allocation7 + $0xdc8] sm:$0xff] }
  0x47   :  { %3985 = vmatmul.msk.f32.vlgmr.msra.gmra.mxu3 %vm161_vm0, %v4251_v15  ;;  %1719 = vmatpush.msrb.mxu1 %v456_v6  ;;  %v1032_v1 = vld [vmem:[#allocation7 + $0x13f8] sm:$0xff]  ;;  %v1185_v3 = vld [vmem:[#allocation7 + $0x18c0] sm:$0xff]  ;;  %v1347_v4 = vld [vmem:[#allocation7 + $0x1dd0] sm:$0xff] }
  0x48   :  { %1741 = vmatpush.msra.mxu2 %v609_v7  ;;  %1762 = vmatpush.msrb.mxu3 %v771_v8  ;;  %v1023_v5 = vld [vmem:[#allocation7 + $0x13b0] sm:$0xff]  ;;  %v825_v6 = vld [vmem:[#allocation7 + $0xd80] sm:$0xff]  ;;  %v1176_v7 = vld [vmem:[#allocation7 + $0x1878] sm:$0xff] }
  0x49   :  { %3987 = vmatmul.msk.f32.vlgmr.msra.gmra.mxu0 %vm161_vm0, %v4251_v15  ;;  %1720 = vmatpush.msrb.mxu1 %v447_v9  ;;  %v573_v15 = vld [vmem:[#allocation7 + $0x5a0] sm:$0xff]  ;;  %v1338_v8 = vld [vmem:[#allocation7 + $0x1d88] sm:$0xff] }
  0x4a   :  { %1742 = vmatpush.msra.mxu2 %v600_v10  ;;  %1783 = vmatpush.msrb.mxu0 %v933_v11  ;;  %v1014_v9 = vld [vmem:[#allocation7 + $0x1368] sm:$0xff]  ;;  %v1536_v10 = vld [vmem:[#allocation7 + $0x23b8] sm:$0xff]  ;;  %v1167_v11 = vld [vmem:[#allocation7 + $0x1830] sm:$0xff] }
  0x4b   :  { %1763 = vmatpush.msrb.mxu3 %v762_v12  ;;  %1721 = vmatpush.msrb.mxu1 %v438_v13  ;;  %v1329_v12 = vld [vmem:[#allocation7 + $0x1d40] sm:$0xff] }
  0x4c   :  { %1743 = vmatpush.msra.mxu2 %v591_v14  ;;  %1784 = vmatpush.msrb.mxu0 %v924_v16  ;;  %v1005_v13 = vld [vmem:[#allocation7 + $0x1320] sm:$0xff]  ;;  %v1527_v14 = vld [vmem:[#allocation7 + $0x2370] sm:$0xff]  ;;  %v1158_v16 = vld [vmem:[#allocation7 + $0x17e8] sm:$0xff] }
  0x4d   :  { %1764 = vmatpush.msrb.mxu3 %v753_v17  ;;  %1722 = vmatpush.msrb.mxu1 %v429_v18  ;;  %v1320_v17 = vld [vmem:[#allocation7 + $0x1cf8] sm:$0xff] }
  0x4e   :  { %1744 = vmatpush.msra.mxu2 %v582_v19  ;;  %1785 = vmatpush.msrb.mxu0 %v915_v25  ;;  %v996_v18 = vld [vmem:[#allocation7 + $0x12d8] sm:$0xff]  ;;  %v1518_v19 = vld [vmem:[#allocation7 + $0x2328] sm:$0xff]  ;;  %v1509_v25 = vld [vmem:[#allocation7 + $0x22e0] sm:$0xff] }
  0x4f   :  { %3986 = vmatmul.msk.f32.gmra.mxu3 %vm161_vm0, %v4259_v30  ;;  %1723 = vmatpush.msrb.mxu1 %v420_v21  ;;  %v987_v21 = vld [vmem:[#allocation7 + $0x1290] sm:$0xff] }
  0x50   :  { %1765 = vmatpush.msrb.mxu3 %v744_v20  ;;  %1745 = vmatpush.msra.mxu2 %v573_v15  ;;  %v1311_v20 = vld [vmem:[#allocation7 + $0x1cb0] sm:$0xff]  ;;  %v1302_v15 = vld [vmem:[#allocation7 + $0x1c68] sm:$0xff] }
  0x51   :  { %3988 = vmatmul.msk.f32.gmra.mxu0 %vm161_vm0, %v4259_v30  ;;  %1724 = vmatpush.msrb.mxu1 %v411_v23  ;;  %v1095_v30 = vld [vmem:[#allocation7 + $0x15f0] sm:$0xff]  ;;  %v1149_v23 = vld [vmem:[#allocation7 + $0x17a0] sm:$0xff] }
  0x52   :  { %1766 = vmatpush.msrb.mxu3 %v735_v22  ;;  %1746 = vmatpush.msra.mxu2 %v564_v24  ;;  %v978_v22 = vld [vmem:[#allocation7 + $0x1248] sm:$0xff]  ;;  %v1293_v24 = vld [vmem:[#allocation7 + $0x1c20] sm:$0xff] }
  0x53   :  { %1725 = vmatpush.msrb.mxu1 %v402_v27  ;;  %1786 = vmatpush.msrb.mxu0 %v906_v29  ;;  %v1140_v27 = vld [vmem:[#allocation7 + $0x1758] sm:$0xff] }
  0x54   :  { %1767 = vmatpush.msrb.mxu3 %v726_v26  ;;  %1747 = vmatpush.msra.mxu2 %v555_v28  ;;  %v969_v26 = vld [vmem:[#allocation7 + $0x1200] sm:$0xff]  ;;  %v1284_v28 = vld [vmem:[#allocation7 + $0x1bd8] sm:$0xff] }
  0x55   :  { %1726 = vmatpush.msrb.mxu1 %v393_v32  ;;  %1787 = vmatpush.msrb.mxu0 %v897_v36  ;;  %v1500_v29 = vld [vmem:[#allocation7 + $0x2298] sm:$0xff]  ;;  %v1275_v32 = vld [vmem:[#allocation7 + $0x1b90] sm:$0xff]  ;;  %v1482_v36 = vld [vmem:[#allocation7 + $0x2208] sm:$0xff] }
  0x56   :  { %1768 = vmatpush.msrb.mxu3 %v717_v31  ;;  %1748 = vmatpush.msra.mxu2 %v546_v34  ;;  %v1131_v31 = vld [vmem:[#allocation7 + $0x1710] sm:$0xff]  ;;  %v1122_v34 = vld [vmem:[#allocation7 + $0x16c8] sm:$0xff] }
  0x57   :  { %1803 = vmatpush.msra.mxu1 %v1104_v33  ;;  %1788 = vmatpush.msrb.mxu0 %v888_v41  ;;  %v1491_v33 = vld [vmem:[#allocation7 + $0x2250] sm:$0xff]  ;;  %v1446_v41 = vld [vmem:[#allocation7 + $0x20e8] sm:$0xff] }
  0x58   :  { %1769 = vmatpush.msrb.mxu3 %v708_v35  ;;  %1749 = vmatpush.msra.mxu2 %v537_v37  ;;  %v1266_v35 = vld [vmem:[#allocation7 + $0x1b48] sm:$0xff]  ;;  %v1257_v37 = vld [vmem:[#allocation7 + $0x1b00] sm:$0xff] }
  0x59   :  { %1804 = vmatpush.msra.mxu1 %v1095_v30  ;;  %1789 = vmatpush.msrb.mxu0 %v879_v45  ;;  %v1113_v30 = vld [vmem:[#allocation7 + $0x1680] sm:$0xff]  ;;  %v1410_v45 = vld [vmem:[#allocation7 + $0x1fc8] sm:$0xff] }
  0x5a   :  { %1770 = vmatpush.msrb.mxu3 %v699_v38  ;;  %1826 = vmatpush.msrb.mxu2 %v1248_v39  ;;  %v1473_v38 = vld [vmem:[#allocation7 + $0x21c0] sm:$0xff]  ;;  %v1464_v39 = vld [vmem:[#allocation7 + $0x2178] sm:$0xff] }
  0x5b   :  { %1805 = vmatpush.msra.mxu1 %v1086_v40  ;;  %1790 = vmatpush.msrb.mxu0 %v870_v50  ;;  %v1455_v40 = vld [vmem:[#allocation7 + $0x2130] sm:$0xff] }
  0x5c   :  { %1771 = vmatpush.msrb.mxu3 %v690_v42  ;;  %1827 = vmatpush.msrb.mxu2 %v1239_v43  ;;  %v1437_v42 = vld [vmem:[#allocation7 + $0x20a0] sm:$0xff]  ;;  %v1428_v43 = vld [vmem:[#allocation7 + $0x2058] sm:$0xff]  ;;  %v1671_v50 = vld [vmem:[#allocation7 + $0x27f0] sm:$0xff] }
  0x5d   :  { %1806 = vmatpush.msra.mxu1 %v1077_v44  ;;  %1791 = vmatpush.msrb.mxu0 %v861_v54  ;;  %v1419_v44 = vld [vmem:[#allocation7 + $0x2010] sm:$0xff] }
  0x5e   :  { %1772 = vmatpush.msrb.mxu3 %v681_v46  ;;  %1828 = vmatpush.msrb.mxu2 %v1230_v47  ;;  %v1401_v46 = vld [vmem:[#allocation7 + $0x1f80] sm:$0xff] }
  0x5f   :  { %1807 = vmatpush.msra.mxu1 %v1068_v49  ;;  %1792 = vmatpush.msrb.mxu0 %v852_v58  ;;  %v1680_v49 = vld [vmem:[#allocation7 + $0x2838] sm:$0xff]  ;;  %v673_v58 = vld [vmem:[#allocation7 + $0x8c0] sm:$0xff] }
  0x60   :  { %1849 = vmatpush.msra.mxu3 %v1392_v48  ;;  %1829 = vmatpush.msrb.mxu2 %v1221_v51  ;;  %v1662_v51 = vld [vmem:[#allocation7 + $0x27a8] sm:$0xff] }
  0x61   :  { %1808 = vmatpush.msra.mxu1 %v1059_v53  ;;  %1793 = vmatpush.msrb.mxu0 %v843_v62 }
  0x62   :  { %1850 = vmatpush.msra.mxu3 %v1383_v52  ;;  %1830 = vmatpush.msrb.mxu2 %v1212_v55 }
  0x63   :  { %1809 = vmatpush.msra.mxu1 %v1050_v57  ;;  %1794 = vmatpush.msrb.mxu0 %v834_v2  ;;  %v529_v57 = vld [vmem:[#allocation7 + $0x440] sm:$0xff]  ;;  %v655_v2 = vld [vmem:[#allocation7 + $0x830] sm:$0xff] }
  0x64   :  { %1851 = vmatpush.msra.mxu3 %v1374_v56  ;;  %1831 = vmatpush.msrb.mxu2 %v1203_v59  ;;  %v1653_v56 = vld [vmem:[#allocation7 + $0x2760] sm:$0xff]  ;;  %v1644_v59 = vld [vmem:[#allocation7 + $0x2718] sm:$0xff] }
  0x65   :  { %1810 = vmatpush.msra.mxu1 %v1041_v61  ;;  %1795 = vmatpush.msrb.mxu0 %v825_v6  ;;  %v664_v61 = vld [vmem:[#allocation7 + $0x878] sm:$0xff] }
  0x66   :  { %1852 = vmatpush.msra.mxu3 %v1365_v60  ;;  %1832 = vmatpush.msrb.mxu2 %v1194_v63  ;;  %v520_v60 = vld [vmem:[#allocation7 + $0x3f8] sm:$0xff]  ;;  %v1635_v63 = vld [vmem:[#allocation7 + $0x26d0] sm:$0xff] }
  0x67   :  { %1811 = vmatpush.msra.mxu1 %v1032_v1  ;;  %1872 = vmatpush.msra.mxu0 %v1536_v10  ;;  %v1617_v10 = vld [vmem:[#allocation7 + $0x2640] sm:$0xff] }
  0x68   :  { %1853 = vmatpush.msra.mxu3 %v1356_v0  ;;  %1833 = vmatpush.msrb.mxu2 %v1185_v3  ;;  %v511_v0 = vld [vmem:[#allocation7 + $0x3b0] sm:$0xff]  ;;  %v1626_v3 = vld [vmem:[#allocation7 + $0x2688] sm:$0xff] }
  0x69   :  { %1812 = vmatpush.msra.mxu1 %v1023_v5  ;;  %1873 = vmatpush.msra.mxu0 %v1527_v14  ;;  %v484_v14 = vld [vmem:[#allocation7 + $0x2d8] sm:$0xff] }
  0x6a   :  { %1854 = vmatpush.msra.mxu3 %v1347_v4  ;;  %1834 = vmatpush.msrb.mxu2 %v1176_v7  ;;  %v502_v4 = vld [vmem:[#allocation7 + $0x368] sm:$0xff] }
  0x6b   :  { %1813 = vmatpush.msra.mxu1 %v1014_v9  ;;  %1874 = vmatpush.msra.mxu0 %v1518_v19  ;;  %v646_v7 = vld [vmem:[#allocation7 + $0x7e8] sm:$0xff]  ;;  %v475_v19 = vld [vmem:[#allocation7 + $0x290] sm:$0xff] }
  0x6c   :  { %1855 = vmatpush.msra.mxu3 %v1338_v8  ;;  %1835 = vmatpush.msrb.mxu2 %v1167_v11  ;;  %v493_v11 = vld [vmem:[#allocation7 + $0x320] sm:$0xff] }
  0x6d   :  { %1814 = vmatpush.msra.mxu1 %v1005_v13  ;;  %1875 = vmatpush.msra.mxu0 %v1509_v25  ;;  %v1608_v13 = vld [vmem:[#allocation7 + $0x25f8] sm:$0xff]  ;;  %v466_v25 = vld [vmem:[#allocation7 + $0x248] sm:$0xff] }
  0x6e   :  { %1856 = vmatpush.msra.mxu3 %v1329_v12  ;;  %1836 = vmatpush.msrb.mxu2 %v1158_v16  ;;  %v637_v12 = vld [vmem:[#allocation7 + $0x7a0] sm:$0xff]  ;;  %v628_v16 = vld [vmem:[#allocation7 + $0x758] sm:$0xff] }
  0x6f   :  { %1815 = vmatpush.msra.mxu1 %v996_v18  ;;  %1876 = vmatpush.msra.mxu0 %v1500_v29  ;;  %v1581_v29 = vld [vmem:[#allocation7 + $0x2520] sm:$0xff] }
  0x70   :  { %1857 = vmatpush.msra.mxu3 %v1320_v17  ;;  %1837 = vmatpush.msrb.mxu2 %v1149_v23  ;;  %v1599_v17 = vld [vmem:[#allocation7 + $0x25b0] sm:$0xff] }
  0x71   :  { %1816 = vmatpush.msra.mxu1 %v987_v21  ;;  %1877 = vmatpush.msra.mxu0 %v1491_v33  ;;  %v1590_v21 = vld [vmem:[#allocation7 + $0x2568] sm:$0xff]  ;;  %v601_v33 = vld [vmem:[#allocation7 + $0x680] sm:$0xff] }
  0x72   :  { %1858 = vmatpush.msra.mxu3 %v1311_v20  ;;  %1838 = vmatpush.msrb.mxu2 %v1140_v27  ;;  %v619_v20 = vld [vmem:[#allocation7 + $0x710] sm:$0xff] }
  0x73   :  { %1817 = vmatpush.msra.mxu1 %v978_v22  ;;  %1878 = vmatpush.msra.mxu0 %v1482_v36  ;;  %v448_v36 = vld [vmem:[#allocation7 + $0x1b8] sm:$0xff] }
  0x74   :  { %1859 = vmatpush.msra.mxu3 %v1302_v15  ;;  %1839 = vmatpush.msrb.mxu2 %v1131_v31 }
  0x75   :  { %1818 = vmatpush.msra.mxu1 %v969_v26  ;;  %1879 = vmatpush.msra.mxu0 %v1473_v38  ;;  %v610_v26 = vld [vmem:[#allocation7 + $0x6c8] sm:$0xff]  ;;  %v1563_v38 = vld [vmem:[#allocation7 + $0x2490] sm:$0xff] }
  0x76   :  { %1860 = vmatpush.msra.mxu3 %v1293_v24  ;;  %1840 = vmatpush.msrb.mxu2 %v1122_v34  ;;  %v817_v34 = vld [vmem:[#allocation7 + $0xd40] sm:$0xff] }
  0x77   :  { %1880 = vmatpush.msra.mxu0 %v1464_v39  ;;  %v439_v39 = vld [vmem:[#allocation7 + $0x170] sm:$0xff] }
  0x78   :  { %1861 = vmatpush.msra.mxu3 %v1284_v28  ;;  %1841 = vmatpush.msrb.mxu2 %v1113_v30  ;;  %v592_v30 = vld [vmem:[#allocation7 + $0x638] sm:$0xff] }
  0x79   :  { %1881 = vmatpush.msra.mxu0 %v1455_v40 }
  0x7a   :  { %1862 = vmatpush.msra.mxu3 %v1275_v32  ;;  %v457_v32 = vld [vmem:[#allocation7 + $0x200] sm:$0xff] }
  0x7b   :  { %1882 = vmatpush.msra.mxu0 %v1446_v41  ;;  %v583_v41 = vld [vmem:[#allocation7 + $0x5f0] sm:$0xff] }
  0x7c   :  { %1863 = vmatpush.msra.mxu3 %v1266_v35  ;;  %v1572_v35 = vld [vmem:[#allocation7 + $0x24d8] sm:$0xff] }
  0x7d   :  { %1883 = vmatpush.msra.mxu0 %v1437_v42  ;;  %v799_v42 = vld [vmem:[#allocation7 + $0xcb0] sm:$0xff] }
  0x7e   :  { %1864 = vmatpush.msra.mxu3 %v1257_v37  ;;  %v808_v37 = vld [vmem:[#allocation7 + $0xcf8] sm:$0xff] }
  0x7f   :  { %1884 = vmatpush.msra.mxu0 %v1428_v43 }
  0x81   :  { %1885 = vmatpush.msra.mxu0 %v1419_v44 }
  0x83   :  { %1886 = vmatpush.msra.mxu0 %v1410_v45  ;;  %v1554_v45 = vld [vmem:[#allocation7 + $0x2448] sm:$0xff] }
  0x85   :  { %1887 = vmatpush.msra.mxu0 %v1401_v46  ;;  %v430_v46 = vld [vmem:[#allocation7 + $0x128] sm:$0xff] }
  0xa3   :  { %v185_v47 = vpop.f32.mrf.mxu0 }
  0xa4   :  { %v4291_v48 = vmax.f32 %v185_v47, 0.0 }
  0xa6   :  { %1727 = vmatmul.f32.vlgmr.msrb.gmra.mxu1 %v4291_v48 }
  0xa7   :  { %1895 = vmatpush.msrb.mxu1 %v1680_v49 }
  0xa9   :  { %1896 = vmatpush.msrb.mxu1 %v1671_v50  ;;  %v574_v50 = vld [vmem:[#allocation7 + $0x5a8] sm:$0xff] }
  0xaa   :  { %v208_v52 = vpop.f32.mrf.mxu3  ;;  %v231_v53 = vpop.f32.mrf.mxu2 }
  0xab   :  { %v4294_v54 = vmax.f32 %v208_v52, 0.0  ;;  %v4296_v55 = vmax.f32 %v231_v53, 0.0  ;;  %1897 = vmatpush.msrb.mxu1 %v1662_v51  ;;  %v790_v51 = vld [vmem:[#allocation7 + $0xc68] sm:$0xff] }
  0xad   :  { %1750 = vmatmul.f32.vlgmr.msra.gmra.mxu2 %v4294_v54  ;;  %1773 = vmatmul.f32.vlgmr.msrb.gmra.mxu3 %v4296_v55 }
  0xae   :  { %1898 = vmatpush.msrb.mxu1 %v1653_v56  ;;  %1918 = vmatpush.msra.mxu2 %v529_v57  ;;  %v188_v62 = vpop.f32.mrf.mxu0  ;;  %v300_v18 = vpop.f32.mrf.mxu1  ;;  %v1545_v56 = vld [vmem:[#allocation7 + $0x2400] sm:$0xff] }
  0xaf   :  { %1941 = vmatpush.msrb.mxu3 %v673_v58  ;;  %v4300_v1 = vmax.f32 %v188_v62, 0.0  ;;  %v4309_v23 = vmax.f32 %v300_v18, 0.0  ;;  %v421_v57 = vld [vmem:[#allocation7 + $0xe0] sm:$0xff]  ;;  %v412_v62 = vld [vmem:[#allocation7 + $0x98] sm:$0xff] }
  0xb0   :  { %1899 = vmatpush.msrb.mxu1 %v1644_v59  ;;  %1919 = vmatpush.msra.mxu2 %v520_v60  ;;  %v565_v58 = vld [vmem:[#allocation7 + $0x560] sm:$0xff] }
  0xb1   :  { %1942 = vmatpush.msrb.mxu3 %v664_v61  ;;  %1730 = vmatmul.f32.gmra.mxu1 %v4300_v1  ;;  %v781_v60 = vld [vmem:[#allocation7 + $0xc20] sm:$0xff] }
  0xb2   :  { %1900 = vmatpush.msrb.mxu1 %v1635_v63  ;;  %1920 = vmatpush.msra.mxu2 %v511_v0  ;;  %v211_v5 = vpop.f32.mrf.mxu3  ;;  %v234_v6 = vpop.f32.mrf.mxu2  ;;  %v961_v61 = vld [vmem:[#allocation7 + $0x11c0] sm:$0xff]  ;;  %v556_v63 = vld [vmem:[#allocation7 + $0x518] sm:$0xff] }
  0xb3   :  { %1943 = vmatpush.msrb.mxu3 %v655_v2  ;;  %v4303_v8 = vmax.f32 %v211_v5, 0.0  ;;  %v4305_v9 = vmax.f32 %v234_v6, 0.0  ;;  %v772_v0 = vld [vmem:[#allocation7 + $0xbd8] sm:$0xff]  ;;  %v763_v5 = vld [vmem:[#allocation7 + $0xb90] sm:$0xff]  ;;  %v1249_v18 = vld [vmem:[#allocation7 + $0x1ac0] sm:$0xff] }
  0xb4   :  { %1901 = vmatpush.msrb.mxu1 %v1626_v3  ;;  %1921 = vmatpush.msra.mxu2 %v502_v4  ;;  %v952_v2 = vld [vmem:[#allocation7 + $0x1178] sm:$0xff]  ;;  %v403_v3 = vld [vmem:[#allocation7 + $0x50] sm:$0xff] }
  0xb5   :  { %1944 = vmatpush.msrb.mxu3 %v646_v7  ;;  %1753 = vmatmul.f32.gmra.mxu2 %v4303_v8  ;;  %v547_v4 = vld [vmem:[#allocation7 + $0x4d0] sm:$0xff] }
  0xb6   :  { %1776 = vmatmul.f32.gmra.mxu3 %v4305_v9  ;;  %1902 = vmatpush.msrb.mxu1 %v1617_v10  ;;  %v277_v15 = vpop.f32.mrf.mxu0  ;;  %v943_v7 = vld [vmem:[#allocation7 + $0x1130] sm:$0xff]  ;;  %v394_v10 = vld [vmem:[#allocation7 + $0x8] sm:$0xff] }
  0xb7   :  { %1922 = vmatpush.msra.mxu2 %v493_v11  ;;  %1945 = vmatpush.msrb.mxu3 %v637_v12  ;;  %v4315_v31 = vmax.f32 %v277_v15, 0.0  ;;  %v538_v11 = vld [vmem:[#allocation7 + $0x488] sm:$0xff]  ;;  %v1096_v15 = vld [vmem:[#allocation7 + $0x15f8] sm:$0xff] }
  0xb8   :  { %1903 = vmatpush.msrb.mxu1 %v1608_v13  ;;  %v303_v40 = vpop.f32.mrf.mxu1  ;;  %v754_v12 = vld [vmem:[#allocation7 + $0xb48] sm:$0xff] }
  0xb9   :  { %1923 = vmatpush.msra.mxu2 %v484_v14  ;;  %1946 = vmatpush.msrb.mxu3 %v628_v16  ;;  %v4323_v49 = vmax.f32 %v303_v40, 0.0  ;;  %v934_v14 = vld [vmem:[#allocation7 + $0x10e8] sm:$0xff]  ;;  %v1105_v16 = vld [vmem:[#allocation7 + $0x1640] sm:$0xff] }
  0xba   :  { %1904 = vmatpush.msrb.mxu1 %v1599_v17  ;;  %v254_v22 = vpop.f32.mrf.mxu3  ;;  %v323_v24 = vpop.f32.mrf.mxu2 }
  0xbb   :  { %1924 = vmatpush.msra.mxu2 %v475_v19  ;;  %1947 = vmatpush.msrb.mxu3 %v619_v20  ;;  %v4311_v27 = vmax.f32 %v254_v22, 0.0  ;;  %v4313_v28 = vmax.f32 %v323_v24, 0.0  ;;  %v745_v19 = vld [vmem:[#allocation7 + $0xb00] sm:$0xff]  ;;  %v1240_v22 = vld [vmem:[#allocation7 + $0x1a78] sm:$0xff] }
  0xbc   :  { %1905 = vmatpush.msrb.mxu1 %v1590_v21  ;;  %v925_v20 = vld [vmem:[#allocation7 + $0x10a0] sm:$0xff]  ;;  %v736_v24 = vld [vmem:[#allocation7 + $0xab8] sm:$0xff] }
  0xbd   :  { %1925 = vmatpush.msra.mxu2 %v466_v25  ;;  %1948 = vmatpush.msrb.mxu3 %v610_v26  ;;  %v916_v25 = vld [vmem:[#allocation7 + $0x1058] sm:$0xff]  ;;  %v1087_v26 = vld [vmem:[#allocation7 + $0x15b0] sm:$0xff] }
  0xbe   :  { %1796 = vmatmul.f32.vlgmr.msrb.gmra.mxu0 %v4311_v27  ;;  %1842 = vmatmul.f32.vlgmr.msrb.gmra.mxu2 %v4309_v23  ;;  %v280_v53 = vpop.f32.mrf.mxu0 }
  0xbf   :  { %1865 = vmatmul.f32.vlgmr.msra.gmra.mxu3 %v4313_v28  ;;  %1906 = vmatpush.msrb.mxu1 %v1581_v29  ;;  %v4327_v59 = vmax.f32 %v280_v53, 0.0  ;;  %v1231_v29 = vld [vmem:[#allocation7 + $0x1a30] sm:$0xff] }
  0xc0   :  { %1926 = vmatpush.msra.mxu2 %v457_v32  ;;  %1949 = vmatpush.msrb.mxu3 %v601_v33  ;;  %v727_v32 = vld [vmem:[#allocation7 + $0xa70] sm:$0xff] }
  0xc1   :  { %1964 = vmatpush.msrb.mxu0 %v817_v34  ;;  %1819 = vmatmul.f32.vlgmr.msra.gmra.mxu1 %v4315_v31  ;;  %v907_v34 = vld [vmem:[#allocation7 + $0x1010] sm:$0xff] }
  0xc2   :  { %1907 = vmatpush.msrb.mxu1 %v1572_v35  ;;  %1927 = vmatpush.msra.mxu2 %v448_v36  ;;  %v257_v43 = vpop.f32.mrf.mxu3  ;;  %v326_v44 = vpop.f32.mrf.mxu2  ;;  %v1078_v35 = vld [vmem:[#allocation7 + $0x1568] sm:$0xff]  ;;  %v1051_v53 = vld [vmem:[#allocation7 + $0x1490] sm:$0xff] }
  0xc3   :  { %1950 = vmatpush.msrb.mxu3 %v592_v30  ;;  %1965 = vmatpush.msrb.mxu0 %v808_v37  ;;  %v4321_v47 = vmax.f32 %v257_v43, 0.0  ;;  %v4325_v52 = vmax.f32 %v326_v44, 0.0  ;;  %v1222_v36 = vld [vmem:[#allocation7 + $0x19e8] sm:$0xff]  ;;  %v889_v43 = vld [vmem:[#allocation7 + $0xf80] sm:$0xff] }
  0xc4   :  { %1908 = vmatpush.msrb.mxu1 %v1563_v38  ;;  %1928 = vmatpush.msra.mxu2 %v439_v39  ;;  %v718_v30 = vld [vmem:[#allocation7 + $0xa28] sm:$0xff]  ;;  %v1069_v39 = vld [vmem:[#allocation7 + $0x1520] sm:$0xff] }
  0xc5   :  { %1951 = vmatpush.msrb.mxu3 %v583_v41  ;;  %1966 = vmatpush.msrb.mxu0 %v799_v42  ;;  %v898_v38 = vld [vmem:[#allocation7 + $0xfc8] sm:$0xff]  ;;  %v1213_v41 = vld [vmem:[#allocation7 + $0x19a0] sm:$0xff] }
  0xc6   :  { %1909 = vmatpush.msrb.mxu1 %v1554_v45  ;;  %1929 = vmatpush.msra.mxu2 %v430_v46  ;;  %v369_v17 = vpop.f32.mrf.mxu0  ;;  %v709_v42 = vld [vmem:[#allocation7 + $0x9e0] sm:$0xff]  ;;  %v1060_v45 = vld [vmem:[#allocation7 + $0x14d8] sm:$0xff] }
  0xc7   :  { %1952 = vmatpush.msrb.mxu3 %v574_v50  ;;  %1967 = vmatpush.msrb.mxu0 %v790_v51  ;;  %v4335_v21 = vmax.f32 %v369_v17, 0.0  ;;  %v1204_v46 = vld [vmem:[#allocation7 + $0x1958] sm:$0xff]  ;;  %v1006_v17 = vld [vmem:[#allocation7 + $0x1328] sm:$0xff] }
  0xc8   :  { %1799 = vmatmul.f32.gmra.mxu0 %v4321_v47  ;;  %1845 = vmatmul.f32.gmra.mxu2 %v4323_v49  ;;  %v700_v50 = vld [vmem:[#allocation7 + $0x998] sm:$0xff] }
  0xc9   :  { %1868 = vmatmul.f32.gmra.mxu3 %v4325_v52  ;;  %1910 = vmatpush.msrb.mxu1 %v1545_v56  ;;  %v880_v51 = vld [vmem:[#allocation7 + $0xf38] sm:$0xff]  ;;  %v1195_v56 = vld [vmem:[#allocation7 + $0x1910] sm:$0xff] }
  0xca   :  { %1930 = vmatpush.msra.mxu2 %v421_v57  ;;  %1953 = vmatpush.msrb.mxu3 %v565_v58  ;;  %v346_v6 = vpop.f32.mrf.mxu3  ;;  %v691_v57 = vld [vmem:[#allocation7 + $0x950] sm:$0xff] }
  0xcb   :  { %1968 = vmatpush.msrb.mxu0 %v781_v60  ;;  %1987 = vmatpush.msra.mxu1 %v961_v61  ;;  %v4333_v13 = vmax.f32 %v346_v6, 0.0  ;;  %v871_v58 = vld [vmem:[#allocation7 + $0xef0] sm:$0xff]  ;;  %v1042_v60 = vld [vmem:[#allocation7 + $0x1448] sm:$0xff]  ;;  %v1168_v6 = vld [vmem:[#allocation7 + $0x1838] sm:$0xff] }
  0xcc   :  { %1822 = vmatmul.f32.gmra.mxu1 %v4327_v59  ;;  %1931 = vmatpush.msra.mxu2 %v412_v62  ;;  %v1186_v61 = vld [vmem:[#allocation7 + $0x18c8] sm:$0xff] }
  0xcd   :  { %1954 = vmatpush.msrb.mxu3 %v556_v63  ;;  %1969 = vmatpush.msrb.mxu0 %v772_v0  ;;  %v682_v62 = vld [vmem:[#allocation7 + $0x908] sm:$0xff]  ;;  %v1033_v0 = vld [vmem:[#allocation7 + $0x1400] sm:$0xff] }
  0xce   :  { %1988 = vmatpush.msra.mxu1 %v952_v2  ;;  %1932 = vmatpush.msra.mxu2 %v403_v3  ;;  %v372_v40 = vpop.f32.mrf.mxu0  ;;  %v862_v63 = vld [vmem:[#allocation7 + $0xea8] sm:$0xff]  ;;  %v1177_v2 = vld [vmem:[#allocation7 + $0x1880] sm:$0xff] }
  0xcf   :  { %1955 = vmatpush.msrb.mxu3 %v547_v4  ;;  %1970 = vmatpush.msrb.mxu0 %v763_v5  ;;  %v4343_v44 = vmax.f32 %v372_v40, 0.0  ;;  %v1393_v3 = vld [vmem:[#allocation7 + $0x1f40] sm:$0xff]  ;;  %v1024_v5 = vld [vmem:[#allocation7 + $0x13b8] sm:$0xff]  ;;  %v1330_v40 = vld [vmem:[#allocation7 + $0x1d48] sm:$0xff] }
  0xd0   :  { %1989 = vmatpush.msra.mxu1 %v943_v7  ;;  %1933 = vmatpush.msra.mxu2 %v394_v10  ;;  %v853_v4 = vld [vmem:[#allocation7 + $0xe60] sm:$0xff]  ;;  %v1384_v7 = vld [vmem:[#allocation7 + $0x1ef8] sm:$0xff] }
  0xd1   :  { %1956 = vmatpush.msrb.mxu3 %v538_v11  ;;  %1971 = vmatpush.msrb.mxu0 %v754_v12  ;;  %v844_v10 = vld [vmem:[#allocation7 + $0xe18] sm:$0xff]  ;;  %v1015_v11 = vld [vmem:[#allocation7 + $0x1370] sm:$0xff] }
  0xd2   :  { %1990 = vmatpush.msra.mxu1 %v934_v14  ;;  %2010 = vmatpush.msrb.mxu2 %v1105_v16  ;;  %v349_v33 = vpop.f32.mrf.mxu3  ;;  %v1159_v12 = vld [vmem:[#allocation7 + $0x17f0] sm:$0xff] }
  0xd3   :  { %2033 = vmatpush.msra.mxu3 %v1249_v18  ;;  %1888 = vmatmul.f32.vlgmr.msra.gmra.mxu0 %v4333_v13  ;;  %v4341_v37 = vmax.f32 %v349_v33, 0.0  ;;  %v1375_v14 = vld [vmem:[#allocation7 + $0x1eb0] sm:$0xff]  ;;  %v1150_v18 = vld [vmem:[#allocation7 + $0x17a8] sm:$0xff]  ;;  %v1528_v33 = vld [vmem:[#allocation7 + $0x2378] sm:$0xff] }
  0xd4   :  { %1934 = vmatmul.f32.vlgmr.msra.gmra.mxu2 %v4291_v48  ;;  %1957 = vmatmul.f32.vlgmr.msrb.gmra.mxu3 %v4294_v54  ;;  %v835_v16 = vld [vmem:[#allocation7 + $0xdd0] sm:$0xff] }
  0xd5   :  { %1972 = vmatpush.msrb.mxu0 %v745_v19  ;;  %1991 = vmatpush.msra.mxu1 %v925_v20  ;;  %v1366_v19 = vld [vmem:[#allocation7 + $0x1e68] sm:$0xff] }
  0xd6   :  { %2011 = vmatpush.msrb.mxu2 %v1096_v15  ;;  %2034 = vmatpush.msra.mxu3 %v1240_v22  ;;  %v826_v20 = vld [vmem:[#allocation7 + $0xd88] sm:$0xff]  ;;  %v997_v15 = vld [vmem:[#allocation7 + $0x12e0] sm:$0xff] }
  0xd7   :  { %1911 = vmatmul.f32.vlgmr.msrb.gmra.mxu1 %v4335_v21  ;;  %1973 = vmatpush.msrb.mxu0 %v736_v24  ;;  %v1141_v22 = vld [vmem:[#allocation7 + $0x1760] sm:$0xff] }
  0xd8   :  { %1992 = vmatpush.msra.mxu1 %v916_v25  ;;  %2012 = vmatpush.msrb.mxu2 %v1087_v26  ;;  %v1357_v24 = vld [vmem:[#allocation7 + $0x1e20] sm:$0xff]  ;;  %v988_v26 = vld [vmem:[#allocation7 + $0x1298] sm:$0xff] }
  0xd9   :  { %2035 = vmatpush.msra.mxu3 %v1231_v29  ;;  %1974 = vmatpush.msrb.mxu0 %v727_v32  ;;  %v1537_v25 = vld [vmem:[#allocation7 + $0x23c0] sm:$0xff]  ;;  %v1132_v29 = vld [vmem:[#allocation7 + $0x1718] sm:$0xff] }
  0xda   :  { %1993 = vmatpush.msra.mxu1 %v907_v34  ;;  %2013 = vmatpush.msrb.mxu2 %v1078_v35  ;;  %v1348_v32 = vld [vmem:[#allocation7 + $0x1dd8] sm:$0xff]  ;;  %v979_v34 = vld [vmem:[#allocation7 + $0x1250] sm:$0xff] }
  0xdb   :  { %2036 = vmatpush.msra.mxu3 %v1222_v36  ;;  %1975 = vmatpush.msrb.mxu0 %v718_v30  ;;  %v1123_v35 = vld [vmem:[#allocation7 + $0x16d0] sm:$0xff] }
  0xdc   :  { %1994 = vmatpush.msra.mxu1 %v898_v38  ;;  %2014 = vmatpush.msrb.mxu2 %v1069_v39  ;;  %v1339_v36 = vld [vmem:[#allocation7 + $0x1d90] sm:$0xff]  ;;  %v970_v38 = vld [vmem:[#allocation7 + $0x1208] sm:$0xff] }
  0xdd   :  { %2037 = vmatpush.msra.mxu3 %v1213_v41  ;;  %1891 = vmatmul.f32.gmra.mxu0 %v4341_v37  ;;  %v1519_v30 = vld [vmem:[#allocation7 + $0x2330] sm:$0xff]  ;;  %v1114_v39 = vld [vmem:[#allocation7 + $0x1688] sm:$0xff] }
  0xde   :  { %1937 = vmatmul.f32.gmra.mxu2 %v4300_v1  ;;  %1960 = vmatmul.f32.gmra.mxu3 %v4303_v8  ;;  %v1510_v41 = vld [vmem:[#allocation7 + $0x22e8] sm:$0xff] }
  0xdf   :  { %1976 = vmatpush.msrb.mxu0 %v709_v42  ;;  %1995 = vmatpush.msra.mxu1 %v889_v43  ;;  %v1681_v42 = vld [vmem:[#allocation7 + $0x2840] sm:$0xff]  ;;  %v530_v43 = vld [vmem:[#allocation7 + $0x448] sm:$0xff] }
  0xe0   :  { %2015 = vmatpush.msrb.mxu2 %v1060_v45  ;;  %2038 = vmatpush.msra.mxu3 %v1204_v46  ;;  %v1321_v45 = vld [vmem:[#allocation7 + $0x1d00] sm:$0xff] }
  0xe1   :  { %1914 = vmatmul.f32.gmra.mxu1 %v4343_v44  ;;  %1977 = vmatpush.msrb.mxu0 %v700_v50  ;;  %v1501_v46 = vld [vmem:[#allocation7 + $0x22a0] sm:$0xff]  ;;  %v1672_v50 = vld [vmem:[#allocation7 + $0x27f8] sm:$0xff] }
  0xe2   :  { %1996 = vmatpush.msra.mxu1 %v880_v51  ;;  %2016 = vmatpush.msrb.mxu2 %v1051_v53  ;;  %v521_v51 = vld [vmem:[#allocation7 + $0x400] sm:$0xff]  ;;  %v1312_v53 = vld [vmem:[#allocation7 + $0x1cb8] sm:$0xff] }
  0xe3   :  { %2039 = vmatpush.msra.mxu3 %v1195_v56  ;;  %1978 = vmatpush.msrb.mxu0 %v691_v57  ;;  %v1492_v56 = vld [vmem:[#allocation7 + $0x2258] sm:$0xff]  ;;  %v1663_v57 = vld [vmem:[#allocation7 + $0x27b0] sm:$0xff] }
  0xe4   :  { %1997 = vmatpush.msra.mxu1 %v871_v58  ;;  %2017 = vmatpush.msrb.mxu2 %v1042_v60  ;;  %v512_v58 = vld [vmem:[#allocation7 + $0x3b8] sm:$0xff]  ;;  %v1303_v60 = vld [vmem:[#allocation7 + $0x1c70] sm:$0xff] }
  0xe5   :  { %2040 = vmatpush.msra.mxu3 %v1186_v61  ;;  %1979 = vmatpush.msrb.mxu0 %v682_v62  ;;  %v1483_v61 = vld [vmem:[#allocation7 + $0x2210] sm:$0xff]  ;;  %v1654_v62 = vld [vmem:[#allocation7 + $0x2768] sm:$0xff] }
  0xe6   :  { %1998 = vmatpush.msra.mxu1 %v862_v63  ;;  %2018 = vmatpush.msrb.mxu2 %v1033_v0  ;;  %v503_v63 = vld [vmem:[#allocation7 + $0x370] sm:$0xff]  ;;  %v1294_v0 = vld [vmem:[#allocation7 + $0x1c28] sm:$0xff] }
  0xe7   :  { %2041 = vmatpush.msra.mxu3 %v1177_v2  ;;  %2056 = vmatpush.msra.mxu0 %v1393_v3  ;;  %v1474_v2 = vld [vmem:[#allocation7 + $0x21c8] sm:$0xff]  ;;  %v1645_v3 = vld [vmem:[#allocation7 + $0x2720] sm:$0xff] }
  0xe8   :  { %1980 = vmatmul.f32.vlgmr.msrb.gmra.mxu0 %v4296_v55  ;;  %1999 = vmatpush.msra.mxu1 %v853_v4  ;;  %v494_v4 = vld [vmem:[#allocation7 + $0x328] sm:$0xff] }
  0xe9   :  { %2019 = vmatpush.msrb.mxu2 %v1024_v5  ;;  %2042 = vmatpush.msra.mxu3 %v1168_v6  ;;  %v1285_v5 = vld [vmem:[#allocation7 + $0x1be0] sm:$0xff] }
  0xea   :  { %2057 = vmatpush.msra.mxu0 %v1384_v7  ;;  %2000 = vmatpush.msra.mxu1 %v844_v10  ;;  %v1465_v6 = vld [vmem:[#allocation7 + $0x2180] sm:$0xff]  ;;  %v1636_v7 = vld [vmem:[#allocation7 + $0x26d8] sm:$0xff] }
  0xeb   :  { %2020 = vmatpush.msrb.mxu2 %v1015_v11  ;;  %2043 = vmatpush.msra.mxu3 %v1159_v12  ;;  %v485_v10 = vld [vmem:[#allocation7 + $0x2e0] sm:$0xff]  ;;  %v1276_v11 = vld [vmem:[#allocation7 + $0x1b98] sm:$0xff] }
  0xec   :  { %2058 = vmatpush.msra.mxu0 %v1375_v14  ;;  %2001 = vmatpush.msra.mxu1 %v835_v16  ;;  %v1456_v12 = vld [vmem:[#allocation7 + $0x2138] sm:$0xff]  ;;  %v1627_v14 = vld [vmem:[#allocation7 + $0x2690] sm:$0xff] }
  0xed   :  { %2021 = vmatpush.msrb.mxu2 %v1006_v17  ;;  %2044 = vmatpush.msra.mxu3 %v1150_v18  ;;  %v476_v16 = vld [vmem:[#allocation7 + $0x298] sm:$0xff]  ;;  %v1267_v17 = vld [vmem:[#allocation7 + $0x1b50] sm:$0xff] }
  0xee   :  { %2059 = vmatpush.msra.mxu0 %v1366_v19  ;;  %2002 = vmatpush.msra.mxu1 %v826_v20  ;;  %v1447_v18 = vld [vmem:[#allocation7 + $0x20f0] sm:$0xff]  ;;  %v1618_v19 = vld [vmem:[#allocation7 + $0x2648] sm:$0xff] }
  0xef   :  { %2022 = vmatpush.msrb.mxu2 %v997_v15  ;;  %2045 = vmatpush.msra.mxu3 %v1141_v22  ;;  %v467_v20 = vld [vmem:[#allocation7 + $0x250] sm:$0xff]  ;;  %v1258_v15 = vld [vmem:[#allocation7 + $0x1b08] sm:$0xff] }
  0xf0   :  { %2060 = vmatpush.msra.mxu0 %v1357_v24  ;;  %2003 = vmatmul.f32.vlgmr.msra.gmra.mxu1 %v4311_v27  ;;  %v1438_v22 = vld [vmem:[#allocation7 + $0x20a8] sm:$0xff]  ;;  %v1609_v24 = vld [vmem:[#allocation7 + $0x2600] sm:$0xff] }
  0xf1   :  { %1983 = vmatmul.f32.gmra.mxu0 %v4305_v9  ;;  %2079 = vmatpush.msrb.mxu1 %v1537_v25  ;;  %v458_v25 = vld [vmem:[#allocation7 + $0x208] sm:$0xff] }
  0xf2   :  { %2023 = vmatpush.msrb.mxu2 %v988_v26  ;;  %2046 = vmatpush.msra.mxu3 %v1132_v29  ;;  %v674_v26 = vld [vmem:[#allocation7 + $0x8c8] sm:$0xff]  ;;  %v1429_v29 = vld [vmem:[#allocation7 + $0x2060] sm:$0xff] }
  0xf3   :  { %2061 = vmatpush.msra.mxu0 %v1348_v32  ;;  %2080 = vmatpush.msrb.mxu1 %v1528_v33  ;;  %v1600_v32 = vld [vmem:[#allocation7 + $0x25b8] sm:$0xff]  ;;  %v449_v33 = vld [vmem:[#allocation7 + $0x1c0] sm:$0xff] }
  0xf4   :  { %2024 = vmatpush.msrb.mxu2 %v979_v34  ;;  %2047 = vmatpush.msra.mxu3 %v1123_v35  ;;  %v665_v34 = vld [vmem:[#allocation7 + $0x880] sm:$0xff]  ;;  %v1420_v35 = vld [vmem:[#allocation7 + $0x2018] sm:$0xff] }
  0xf5   :  { %2062 = vmatpush.msra.mxu0 %v1339_v36  ;;  %2081 = vmatpush.msrb.mxu1 %v1519_v30  ;;  %v1591_v36 = vld [vmem:[#allocation7 + $0x2570] sm:$0xff]  ;;  %v440_v30 = vld [vmem:[#allocation7 + $0x178] sm:$0xff] }
  0xf6   :  { %2025 = vmatpush.msrb.mxu2 %v970_v38  ;;  %2048 = vmatpush.msra.mxu3 %v1114_v39  ;;  %v656_v38 = vld [vmem:[#allocation7 + $0x838] sm:$0xff]  ;;  %v1411_v39 = vld [vmem:[#allocation7 + $0x1fd0] sm:$0xff] }
  0xf7   :  { %2063 = vmatpush.msra.mxu0 %v1330_v40  ;;  %2026 = vmatmul.f32.vlgmr.msrb.gmra.mxu2 %v4315_v31  ;;  %v1582_v40 = vld [vmem:[#allocation7 + $0x2528] sm:$0xff] }
  0xf8   :  { %2049 = vmatmul.f32.vlgmr.msra.gmra.mxu3 %v4309_v23  ;;  %2082 = vmatpush.msrb.mxu1 %v1510_v41  ;;  %v431_v41 = vld [vmem:[#allocation7 + $0x130] sm:$0xff] }
  0xf9   :  { %2102 = vmatpush.msra.mxu2 %v1681_v42  ;;  %2125 = vmatpush.msrb.mxu3 %v530_v43  ;;  %v647_v42 = vld [vmem:[#allocation7 + $0x7f0] sm:$0xff]  ;;  %v1402_v43 = vld [vmem:[#allocation7 + $0x1f88] sm:$0xff] }
  0xfa   :  { %2064 = vmatpush.msra.mxu0 %v1321_v45  ;;  %2006 = vmatmul.f32.gmra.mxu1 %v4321_v47  ;;  %v1573_v45 = vld [vmem:[#allocation7 + $0x24e0] sm:$0xff] }
  0xfb   :  { %2083 = vmatpush.msrb.mxu1 %v1501_v46  ;;  %2103 = vmatpush.msra.mxu2 %v1672_v50  ;;  %v422_v46 = vld [vmem:[#allocation7 + $0xe8] sm:$0xff] }
  0xfc   :  { %2126 = vmatpush.msrb.mxu3 %v521_v51  ;;  %2065 = vmatpush.msra.mxu0 %v1312_v53  ;;  %v638_v50 = vld [vmem:[#allocation7 + $0x7a8] sm:$0xff]  ;;  %v1564_v51 = vld [vmem:[#allocation7 + $0x2498] sm:$0xff] }
  0xfd   :  { %2084 = vmatpush.msrb.mxu1 %v1492_v56  ;;  %2104 = vmatpush.msra.mxu2 %v1663_v57  ;;  %v818_v53 = vld [vmem:[#allocation7 + $0xd48] sm:$0xff]  ;;  %v413_v56 = vld [vmem:[#allocation7 + $0xa0] sm:$0xff] }
  0xfe   :  { %2127 = vmatpush.msrb.mxu3 %v512_v58  ;;  %2066 = vmatpush.msra.mxu0 %v1303_v60  ;;  %v629_v57 = vld [vmem:[#allocation7 + $0x760] sm:$0xff]  ;;  %v1555_v58 = vld [vmem:[#allocation7 + $0x2450] sm:$0xff] }
  0xff   :  { %2085 = vmatpush.msrb.mxu1 %v1483_v61  ;;  %2105 = vmatpush.msra.mxu2 %v1654_v62  ;;  %v809_v60 = vld [vmem:[#allocation7 + $0xd00] sm:$0xff]  ;;  %v404_v61 = vld [vmem:[#allocation7 + $0x58] sm:$0xff] }
 0x100   :  { %2128 = vmatpush.msrb.mxu3 %v503_v63  ;;  %2067 = vmatpush.msra.mxu0 %v1294_v0  ;;  %v620_v62 = vld [vmem:[#allocation7 + $0x718] sm:$0xff]  ;;  %v1546_v63 = vld [vmem:[#allocation7 + $0x2408] sm:$0xff] }
 0x101   :  { %2029 = vmatmul.f32.gmra.mxu2 %v4327_v59  ;;  %2052 = vmatmul.f32.gmra.mxu3 %v4323_v49  ;;  %v800_v0 = vld [vmem:[#allocation7 + $0xcb8] sm:$0xff] }
 0x102   :  { %2086 = vmatpush.msrb.mxu1 %v1474_v2  ;;  %2106 = vmatpush.msra.mxu2 %v1645_v3  ;;  %v395_v2 = vld [vmem:[#allocation7 + $0x10] sm:$0xff] }
 0x103   :  { %2129 = vmatpush.msrb.mxu3 %v494_v4  ;;  %2068 = vmatpush.msra.mxu0 %v1285_v5  ;;  %v611_v3 = vld [vmem:[#allocation7 + $0x6d0] sm:$0xff]  ;;  %v962_v5 = vld [vmem:[#allocation7 + $0x11c8] sm:$0xff] }
 0x104   :  { %2087 = vmatpush.msrb.mxu1 %v1465_v6  ;;  %2107 = vmatpush.msra.mxu2 %v1636_v7  ;;  %v791_v4 = vld [vmem:[#allocation7 + $0xc70] sm:$0xff]  ;;  %v1106_v6 = vld [vmem:[#allocation7 + $0x1648] sm:$0xff] }
 0x105   :  { %2130 = vmatpush.msrb.mxu3 %v485_v10  ;;  %2069 = vmatpush.msra.mxu0 %v1276_v11  ;;  %v602_v7 = vld [vmem:[#allocation7 + $0x688] sm:$0xff]  ;;  %v953_v11 = vld [vmem:[#allocation7 + $0x1180] sm:$0xff] }
 0x106   :  { %2088 = vmatpush.msrb.mxu1 %v1456_v12  ;;  %2108 = vmatpush.msra.mxu2 %v1627_v14  ;;  %v782_v10 = vld [vmem:[#allocation7 + $0xc28] sm:$0xff]  ;;  %v1097_v12 = vld [vmem:[#allocation7 + $0x1600] sm:$0xff] }
 0x107   :  { %2131 = vmatpush.msrb.mxu3 %v476_v16  ;;  %2070 = vmatpush.msra.mxu0 %v1267_v17  ;;  %v593_v14 = vld [vmem:[#allocation7 + $0x640] sm:$0xff]  ;;  %v944_v17 = vld [vmem:[#allocation7 + $0x1138] sm:$0xff] }
 0x108   :  { %2089 = vmatpush.msrb.mxu1 %v1447_v18  ;;  %2109 = vmatpush.msra.mxu2 %v1618_v19  ;;  %v773_v16 = vld [vmem:[#allocation7 + $0xbe0] sm:$0xff]  ;;  %v1088_v18 = vld [vmem:[#allocation7 + $0x15b8] sm:$0xff] }
 0x109   :  { %2132 = vmatpush.msrb.mxu3 %v467_v20  ;;  %2071 = vmatpush.msra.mxu0 %v1258_v15  ;;  %v584_v19 = vld [vmem:[#allocation7 + $0x5f8] sm:$0xff]  ;;  %v935_v15 = vld [vmem:[#allocation7 + $0x10f0] sm:$0xff] }
 0x10a   :  { %2072 = vmatmul.f32.vlgmr.msra.gmra.mxu0 %v4313_v28  ;;  %2090 = vmatpush.msrb.mxu1 %v1438_v22  ;;  %v764_v20 = vld [vmem:[#allocation7 + $0xb98] sm:$0xff]  ;;  %v1079_v22 = vld [vmem:[#allocation7 + $0x1570] sm:$0xff] }
 0x10b   :  { %2110 = vmatpush.msra.mxu2 %v1609_v24  ;;  %2133 = vmatpush.msrb.mxu3 %v458_v25  ;;  %v575_v24 = vld [vmem:[#allocation7 + $0x5b0] sm:$0xff] }
 0x10c   :  { %2148 = vmatpush.msrb.mxu0 %v674_v26  ;;  %2091 = vmatpush.msrb.mxu1 %v1429_v29  ;;  %v755_v25 = vld [vmem:[#allocation7 + $0xb50] sm:$0xff]  ;;  %v926_v26 = vld [vmem:[#allocation7 + $0x10a8] sm:$0xff] }
 0x10d   :  { %2111 = vmatpush.msra.mxu2 %v1600_v32  ;;  %2134 = vmatpush.msrb.mxu3 %v449_v33  ;;  %v1070_v29 = vld [vmem:[#allocation7 + $0x1528] sm:$0xff] }
 0x10e   :  { %2149 = vmatpush.msrb.mxu0 %v665_v34  ;;  %2092 = vmatpush.msrb.mxu1 %v1420_v35  ;;  %v566_v32 = vld [vmem:[#allocation7 + $0x568] sm:$0xff]  ;;  %v917_v34 = vld [vmem:[#allocation7 + $0x1060] sm:$0xff] }
 0x10f   :  { %2112 = vmatpush.msra.mxu2 %v1591_v36  ;;  %2135 = vmatpush.msrb.mxu3 %v440_v30  ;;  %v746_v33 = vld [vmem:[#allocation7 + $0xb08] sm:$0xff]  ;;  %v1061_v35 = vld [vmem:[#allocation7 + $0x14e0] sm:$0xff] }
 0x110   :  { %2150 = vmatpush.msrb.mxu0 %v656_v38  ;;  %2093 = vmatpush.msrb.mxu1 %v1411_v39  ;;  %v557_v36 = vld [vmem:[#allocation7 + $0x520] sm:$0xff]  ;;  %v908_v38 = vld [vmem:[#allocation7 + $0x1018] sm:$0xff] }
 0x111   :  { %2113 = vmatpush.msra.mxu2 %v1582_v40  ;;  %2136 = vmatpush.msrb.mxu3 %v431_v41  ;;  %v737_v30 = vld [vmem:[#allocation7 + $0xac0] sm:$0xff]  ;;  %v1052_v39 = vld [vmem:[#allocation7 + $0x1498] sm:$0xff] }
 0x112   :  { %2151 = vmatpush.msrb.mxu0 %v647_v42  ;;  %2094 = vmatpush.msrb.mxu1 %v1402_v43  ;;  %v548_v40 = vld [vmem:[#allocation7 + $0x4d8] sm:$0xff]  ;;  %v899_v42 = vld [vmem:[#allocation7 + $0xfd0] sm:$0xff] }
 0x113   :  { %2075 = vmatmul.f32.gmra.mxu0 %v4325_v52  ;;  %2114 = vmatpush.msra.mxu2 %v1573_v45  ;;  %v728_v41 = vld [vmem:[#allocation7 + $0xa78] sm:$0xff]  ;;  %v1043_v43 = vld [vmem:[#allocation7 + $0x1450] sm:$0xff] }
 0x114   :  { %2137 = vmatpush.msrb.mxu3 %v422_v46  ;;  %2152 = vmatpush.msrb.mxu0 %v638_v50  ;;  %v539_v45 = vld [vmem:[#allocation7 + $0x490] sm:$0xff]  ;;  %v890_v50 = vld [vmem:[#allocation7 + $0xf88] sm:$0xff] }
 0x115   :  { %2095 = vmatmul.f32.vlgmr.msrb.gmra.mxu1 %v4333_v13  ;;  %2115 = vmatpush.msra.mxu2 %v1564_v51  ;;  %v719_v46 = vld [vmem:[#allocation7 + $0xa30] sm:$0xff]  ;;  %v1034_v51 = vld [vmem:[#allocation7 + $0x1408] sm:$0xff] }
 0x116   :  { %2171 = vmatpush.msra.mxu1 %v818_v53  ;;  %2138 = vmatpush.msrb.mxu3 %v413_v56  ;;  %v1250_v53 = vld [vmem:[#allocation7 + $0x1ac8] sm:$0xff] }
 0x117   :  { %2153 = vmatpush.msrb.mxu0 %v629_v57  ;;  %2116 = vmatpush.msra.mxu2 %v1555_v58  ;;  %v710_v56 = vld [vmem:[#allocation7 + $0x9e8] sm:$0xff]  ;;  %v881_v57 = vld [vmem:[#allocation7 + $0xf40] sm:$0xff] }
 0x118   :  { %2172 = vmatpush.msra.mxu1 %v809_v60  ;;  %2139 = vmatpush.msrb.mxu3 %v404_v61  ;;  %v1025_v58 = vld [vmem:[#allocation7 + $0x13c0] sm:$0xff] }
 0x119   :  { %2154 = vmatpush.msrb.mxu0 %v620_v62  ;;  %2117 = vmatpush.msra.mxu2 %v1546_v63  ;;  %v1241_v60 = vld [vmem:[#allocation7 + $0x1a80] sm:$0xff]  ;;  %v872_v62 = vld [vmem:[#allocation7 + $0xef8] sm:$0xff] }
 0x11a   :  { %2173 = vmatpush.msra.mxu1 %v800_v0  ;;  %2140 = vmatpush.msrb.mxu3 %v395_v2  ;;  %v701_v61 = vld [vmem:[#allocation7 + $0x9a0] sm:$0xff]  ;;  %v1016_v63 = vld [vmem:[#allocation7 + $0x1378] sm:$0xff] }
 0x11b   :  { %2155 = vmatpush.msrb.mxu0 %v611_v3  ;;  %2118 = vmatmul.f32.vlgmr.msra.gmra.mxu2 %v4335_v21  ;;  %v1232_v0 = vld [vmem:[#allocation7 + $0x1a38] sm:$0xff]  ;;  %v863_v3 = vld [vmem:[#allocation7 + $0xeb0] sm:$0xff] }
 0x11c   :  { %2141 = vmatmul.f32.vlgmr.msrb.gmra.mxu3 %v4291_v48  ;;  %2174 = vmatpush.msra.mxu1 %v791_v4  ;;  %v692_v2 = vld [vmem:[#allocation7 + $0x958] sm:$0xff]  ;;  %v1007_v4 = vld [vmem:[#allocation7 + $0x1330] sm:$0xff] }
 0x11d   :  { %2194 = vmatpush.msrb.mxu2 %v962_v5  ;;  %2217 = vmatpush.msra.mxu3 %v1106_v6  ;;  %v1223_v5 = vld [vmem:[#allocation7 + $0x19f0] sm:$0xff] }
 0x11e   :  { %2156 = vmatpush.msrb.mxu0 %v602_v7  ;;  %2098 = vmatmul.f32.gmra.mxu1 %v4341_v37  ;;  %v683_v6 = vld [vmem:[#allocation7 + $0x910] sm:$0xff]  ;;  %v854_v7 = vld [vmem:[#allocation7 + $0xe68] sm:$0xff] }
 0x11f   :  { %2175 = vmatpush.msra.mxu1 %v782_v10  ;;  %2195 = vmatpush.msrb.mxu2 %v953_v11  ;;  %v998_v10 = vld [vmem:[#allocation7 + $0x12e8] sm:$0xff] }
 0x120   :  { %2218 = vmatpush.msra.mxu3 %v1097_v12  ;;  %2157 = vmatpush.msrb.mxu0 %v593_v14  ;;  %v1214_v11 = vld [vmem:[#allocation7 + $0x19a8] sm:$0xff]  ;;  %v845_v12 = vld [vmem:[#allocation7 + $0xe20] sm:$0xff] }
 0x121   :  { %2176 = vmatpush.msra.mxu1 %v773_v16  ;;  %2196 = vmatpush.msrb.mxu2 %v944_v17  ;;  %v1394_v14 = vld [vmem:[#allocation7 + $0x1f48] sm:$0xff]  ;;  %v989_v16 = vld [vmem:[#allocation7 + $0x12a0] sm:$0xff] }
 0x122   :  { %2219 = vmatpush.msra.mxu3 %v1088_v18  ;;  %2158 = vmatpush.msrb.mxu0 %v584_v19  ;;  %v1205_v17 = vld [vmem:[#allocation7 + $0x1960] sm:$0xff]  ;;  %v836_v18 = vld [vmem:[#allocation7 + $0xdd8] sm:$0xff] }
 0x123   :  { %2177 = vmatpush.msra.mxu1 %v764_v20  ;;  %2197 = vmatpush.msrb.mxu2 %v935_v15  ;;  %v1385_v19 = vld [vmem:[#allocation7 + $0x1f00] sm:$0xff]  ;;  %v980_v20 = vld [vmem:[#allocation7 + $0x1258] sm:$0xff] }
 0x124   :  { %2220 = vmatpush.msra.mxu3 %v1079_v22  ;;  %2159 = vmatpush.msrb.mxu0 %v575_v24  ;;  %v1196_v15 = vld [vmem:[#allocation7 + $0x1918] sm:$0xff]  ;;  %v827_v22 = vld [vmem:[#allocation7 + $0xd90] sm:$0xff] }
 0x125   :  { %2121 = vmatmul.f32.gmra.mxu2 %v4343_v44  ;;  %2144 = vmatmul.f32.gmra.mxu3 %v4300_v1  ;;  %v1376_v24 = vld [vmem:[#allocation7 + $0x1eb8] sm:$0xff] }
 0x126   :  { %2178 = vmatpush.msra.mxu1 %v755_v25  ;;  %2198 = vmatpush.msrb.mxu2 %v926_v26  ;;  %v971_v25 = vld [vmem:[#allocation7 + $0x1210] sm:$0xff] }
 0x127   :  { %2221 = vmatpush.msra.mxu3 %v1070_v29  ;;  %2160 = vmatpush.msrb.mxu0 %v566_v32  ;;  %v1187_v26 = vld [vmem:[#allocation7 + $0x18d0] sm:$0xff]  ;;  %v1538_v32 = vld [vmem:[#allocation7 + $0x23c8] sm:$0xff] }
 0x128   :  { %2179 = vmatpush.msra.mxu1 %v746_v33  ;;  %2199 = vmatpush.msrb.mxu2 %v917_v34  ;;  %v1367_v29 = vld [vmem:[#allocation7 + $0x1e70] sm:$0xff]  ;;  %v1682_v33 = vld [vmem:[#allocation7 + $0x2848] sm:$0xff] }
 0x129   :  { %2222 = vmatpush.msra.mxu3 %v1061_v35  ;;  %2161 = vmatpush.msrb.mxu0 %v557_v36  ;;  %v1178_v34 = vld [vmem:[#allocation7 + $0x1888] sm:$0xff]  ;;  %v1529_v36 = vld [vmem:[#allocation7 + $0x2380] sm:$0xff] }
 0x12a   :  { %2180 = vmatpush.msra.mxu1 %v737_v30  ;;  %2200 = vmatpush.msrb.mxu2 %v908_v38  ;;  %v1358_v35 = vld [vmem:[#allocation7 + $0x1e28] sm:$0xff]  ;;  %v1673_v30 = vld [vmem:[#allocation7 + $0x2800] sm:$0xff] }
 0x12b   :  { %2223 = vmatpush.msra.mxu3 %v1052_v39  ;;  %2162 = vmatpush.msrb.mxu0 %v548_v40  ;;  %v1169_v38 = vld [vmem:[#allocation7 + $0x1840] sm:$0xff]  ;;  %v1520_v40 = vld [vmem:[#allocation7 + $0x2338] sm:$0xff] }
 0x12c   :  { %2181 = vmatpush.msra.mxu1 %v728_v41  ;;  %2201 = vmatpush.msrb.mxu2 %v899_v42  ;;  %v1349_v39 = vld [vmem:[#allocation7 + $0x1de0] sm:$0xff]  ;;  %v1664_v41 = vld [vmem:[#allocation7 + $0x27b8] sm:$0xff] }
 0x12d   :  { %2224 = vmatpush.msra.mxu3 %v1043_v43  ;;  %2163 = vmatpush.msrb.mxu0 %v539_v45  ;;  %v1160_v42 = vld [vmem:[#allocation7 + $0x17f8] sm:$0xff]  ;;  %v1511_v45 = vld [vmem:[#allocation7 + $0x22f0] sm:$0xff] }
 0x12e   :  { %2164 = vmatmul.f32.vlgmr.msrb.gmra.mxu0 %v4294_v54  ;;  %2182 = vmatpush.msra.mxu1 %v719_v46  ;;  %v1340_v43 = vld [vmem:[#allocation7 + $0x1d98] sm:$0xff]  ;;  %v1655_v46 = vld [vmem:[#allocation7 + $0x2770] sm:$0xff] }
 0x12f   :  { %2202 = vmatpush.msrb.mxu2 %v890_v50  ;;  %2225 = vmatpush.msra.mxu3 %v1034_v51  ;;  %v1151_v50 = vld [vmem:[#allocation7 + $0x17b0] sm:$0xff] }
 0x130   :  { %2240 = vmatpush.msra.mxu0 %v1250_v53  ;;  %2183 = vmatpush.msra.mxu1 %v710_v56  ;;  %v1331_v51 = vld [vmem:[#allocation7 + $0x1d50] sm:$0xff]  ;;  %v1502_v53 = vld [vmem:[#allocation7 + $0x22a8] sm:$0xff] }
 0x131   :  { %2203 = vmatpush.msrb.mxu2 %v881_v57  ;;  %2226 = vmatpush.msra.mxu3 %v1025_v58  ;;  %v1646_v56 = vld [vmem:[#allocation7 + $0x2728] sm:$0xff] }
 0x132   :  { %2241 = vmatpush.msra.mxu0 %v1241_v60  ;;  %2184 = vmatpush.msra.mxu1 %v701_v61  ;;  %v1142_v57 = vld [vmem:[#allocation7 + $0x1768] sm:$0xff]  ;;  %v1493_v60 = vld [vmem:[#allocation7 + $0x2260] sm:$0xff] }
 0x133   :  { %2204 = vmatpush.msrb.mxu2 %v872_v62  ;;  %2227 = vmatpush.msra.mxu3 %v1016_v63  ;;  %v1322_v58 = vld [vmem:[#allocation7 + $0x1d08] sm:$0xff]  ;;  %v1637_v61 = vld [vmem:[#allocation7 + $0x26e0] sm:$0xff] }
 0x134   :  { %2242 = vmatpush.msra.mxu0 %v1232_v0  ;;  %2185 = vmatpush.msra.mxu1 %v692_v2  ;;  %v1133_v62 = vld [vmem:[#allocation7 + $0x1720] sm:$0xff]  ;;  %v1484_v0 = vld [vmem:[#allocation7 + $0x2218] sm:$0xff] }
 0x135   :  { %2205 = vmatpush.msrb.mxu2 %v863_v3  ;;  %2228 = vmatpush.msra.mxu3 %v1007_v4  ;;  %v1313_v63 = vld [vmem:[#allocation7 + $0x1cc0] sm:$0xff]  ;;  %v1628_v2 = vld [vmem:[#allocation7 + $0x2698] sm:$0xff] }
 0x136   :  { %2243 = vmatpush.msra.mxu0 %v1223_v5  ;;  %2186 = vmatpush.msra.mxu1 %v683_v6  ;;  %v1124_v3 = vld [vmem:[#allocation7 + $0x16d8] sm:$0xff]  ;;  %v1475_v5 = vld [vmem:[#allocation7 + $0x21d0] sm:$0xff] }
 0x137   :  { %2167 = vmatmul.f32.gmra.mxu0 %v4303_v8  ;;  %2206 = vmatpush.msrb.mxu2 %v854_v7  ;;  %v1304_v4 = vld [vmem:[#allocation7 + $0x1c78] sm:$0xff]  ;;  %v1619_v6 = vld [vmem:[#allocation7 + $0x2650] sm:$0xff] }
 0x138   :  { %2229 = vmatpush.msra.mxu3 %v998_v10  ;;  %2244 = vmatpush.msra.mxu0 %v1214_v11  ;;  %v1115_v7 = vld [vmem:[#allocation7 + $0x1690] sm:$0xff]  ;;  %v1466_v11 = vld [vmem:[#allocation7 + $0x2188] sm:$0xff] }
 0x139   :  { %2187 = vmatmul.f32.vlgmr.msra.gmra.mxu1 %v4296_v55  ;;  %2207 = vmatpush.msrb.mxu2 %v845_v12  ;;  %v1295_v10 = vld [vmem:[#allocation7 + $0x1c30] sm:$0xff]  ;;  %v1610_v12 = vld [vmem:[#allocation7 + $0x2608] sm:$0xff] }
 0x13a   :  { %2263 = vmatpush.msrb.mxu1 %v1394_v14  ;;  %2230 = vmatpush.msra.mxu3 %v989_v16  ;;  %v531_v14 = vld [vmem:[#allocation7 + $0x450] sm:$0xff]  ;;  %v1286_v16 = vld [vmem:[#allocation7 + $0x1be8] sm:$0xff] }
 0x13b   :  { %2245 = vmatpush.msra.mxu0 %v1205_v17  ;;  %2208 = vmatpush.msrb.mxu2 %v836_v18  ;;  %v1457_v17 = vld [vmem:[#allocation7 + $0x2140] sm:$0xff] }
 0x13c   :  { %2264 = vmatpush.msrb.mxu1 %v1385_v19  ;;  %2231 = vmatpush.msra.mxu3 %v980_v20  ;;  %v1601_v18 = vld [vmem:[#allocation7 + $0x25c0] sm:$0xff]  ;;  %v522_v19 = vld [vmem:[#allocation7 + $0x408] sm:$0xff] }
 0x13d   :  { %2246 = vmatpush.msra.mxu0 %v1196_v15  ;;  %2209 = vmatpush.msrb.mxu2 %v827_v22  ;;  %v1277_v20 = vld [vmem:[#allocation7 + $0x1ba0] sm:$0xff]  ;;  %v1448_v15 = vld [vmem:[#allocation7 + $0x20f8] sm:$0xff] }
 0x13e   :  { %2265 = vmatpush.msrb.mxu1 %v1376_v24  ;;  %2232 = vmatpush.msra.mxu3 %v971_v25  ;;  %v1592_v22 = vld [vmem:[#allocation7 + $0x2578] sm:$0xff]  ;;  %v513_v24 = vld [vmem:[#allocation7 + $0x3c0] sm:$0xff] }
 0x13f   :  { %2247 = vmatpush.msra.mxu0 %v1187_v26  ;;  %2210 = vmatmul.f32.vlgmr.msrb.gmra.mxu2 %v4311_v27  ;;  %v1268_v25 = vld [vmem:[#allocation7 + $0x1b58] sm:$0xff]  ;;  %v1439_v26 = vld [vmem:[#allocation7 + $0x20b0] sm:$0xff] }
 0x140   :  { %2233 = vmatmul.f32.vlgmr.msra.gmra.mxu3 %v4315_v31  ;;  %2266 = vmatpush.msrb.mxu1 %v1367_v29  ;;  %v1583_v29 = vld [vmem:[#allocation7 + $0x2530] sm:$0xff] }
 0x141   :  { %2286 = vmatpush.msra.mxu2 %v1538_v32  ;;  %2309 = vmatpush.msrb.mxu3 %v1682_v33  ;;  %v504_v32 = vld [vmem:[#allocation7 + $0x378] sm:$0xff]  ;;  %v1259_v33 = vld [vmem:[#allocation7 + $0x1b10] sm:$0xff] }
 0x142   :  { %2248 = vmatpush.msra.mxu0 %v1178_v34  ;;  %2190 = vmatmul.f32.gmra.mxu1 %v4305_v9  ;;  %v1430_v34 = vld [vmem:[#allocation7 + $0x2068] sm:$0xff] }
 0x143   :  { %2267 = vmatpush.msrb.mxu1 %v1358_v35  ;;  %2287 = vmatpush.msra.mxu2 %v1529_v36  ;;  %v1574_v35 = vld [vmem:[#allocation7 + $0x24e8] sm:$0xff]  ;;  %v495_v36 = vld [vmem:[#allocation7 + $0x330] sm:$0xff] }
 0x144   :  { %2310 = vmatpush.msrb.mxu3 %v1673_v30  ;;  %2249 = vmatpush.msra.mxu0 %v1169_v38  ;;  %v1421_v30 = vld [vmem:[#allocation7 + $0x2020] sm:$0xff]  ;;  %v675_v38 = vld [vmem:[#allocation7 + $0x8d0] sm:$0xff] }
 0x145   :  { %2268 = vmatpush.msrb.mxu1 %v1349_v39  ;;  %2288 = vmatpush.msra.mxu2 %v1520_v40  ;;  %v1565_v39 = vld [vmem:[#allocation7 + $0x24a0] sm:$0xff]  ;;  %v486_v40 = vld [vmem:[#allocation7 + $0x2e8] sm:$0xff] }
 0x146   :  { %2311 = vmatpush.msrb.mxu3 %v1664_v41  ;;  %2250 = vmatpush.msra.mxu0 %v1160_v42  ;;  %v1412_v41 = vld [vmem:[#allocation7 + $0x1fd8] sm:$0xff]  ;;  %v666_v42 = vld [vmem:[#allocation7 + $0x888] sm:$0xff] }
 0x147   :  { %2269 = vmatpush.msrb.mxu1 %v1340_v43  ;;  %2289 = vmatpush.msra.mxu2 %v1511_v45  ;;  %v1556_v43 = vld [vmem:[#allocation7 + $0x2458] sm:$0xff]  ;;  %v477_v45 = vld [vmem:[#allocation7 + $0x2a0] sm:$0xff] }
 0x148   :  { %2312 = vmatpush.msrb.mxu3 %v1655_v46  ;;  %2251 = vmatpush.msra.mxu0 %v1151_v50  ;;  %v1403_v46 = vld [vmem:[#allocation7 + $0x1f90] sm:$0xff]  ;;  %v657_v50 = vld [vmem:[#allocation7 + $0x840] sm:$0xff] }
 0x149   :  { %2213 = vmatmul.f32.gmra.mxu2 %v4321_v47  ;;  %2236 = vmatmul.f32.gmra.mxu3 %v4327_v59 }
 0x14a   :  { %2270 = vmatpush.msrb.mxu1 %v1331_v51  ;;  %2290 = vmatpush.msra.mxu2 %v1502_v53  ;;  %v1547_v51 = vld [vmem:[#allocation7 + $0x2410] sm:$0xff]  ;;  %v468_v53 = vld [vmem:[#allocation7 + $0x258] sm:$0xff] }
 0x14b   :  { %2313 = vmatpush.msrb.mxu3 %v1646_v56  ;;  %2252 = vmatpush.msra.mxu0 %v1142_v57  ;;  %v648_v56 = vld [vmem:[#allocation7 + $0x7f8] sm:$0xff]  ;;  %v819_v57 = vld [vmem:[#allocation7 + $0xd50] sm:$0xff] }
 0x14c   :  { %2271 = vmatpush.msrb.mxu1 %v1322_v58  ;;  %2291 = vmatpush.msra.mxu2 %v1493_v60  ;;  %v963_v58 = vld [vmem:[#allocation7 + $0x11d0] sm:$0xff] }
 0x14d   :  { %2314 = vmatpush.msrb.mxu3 %v1637_v61  ;;  %2253 = vmatpush.msra.mxu0 %v1133_v62  ;;  %v459_v60 = vld [vmem:[#allocation7 + $0x210] sm:$0xff]  ;;  %v810_v62 = vld [vmem:[#allocation7 + $0xd08] sm:$0xff] }
 0x14e   :  { %2272 = vmatpush.msrb.mxu1 %v1313_v63  ;;  %2292 = vmatpush.msra.mxu2 %v1484_v0  ;;  %v639_v61 = vld [vmem:[#allocation7 + $0x7b0] sm:$0xff]  ;;  %v954_v63 = vld [vmem:[#allocation7 + $0x1188] sm:$0xff] }
 0x14f   :  { %2315 = vmatpush.msrb.mxu3 %v1628_v2  ;;  %2254 = vmatpush.msra.mxu0 %v1124_v3  ;;  %v450_v0 = vld [vmem:[#allocation7 + $0x1c8] sm:$0xff]  ;;  %v801_v3 = vld [vmem:[#allocation7 + $0xcc0] sm:$0xff] }
 0x150   :  { %2273 = vmatpush.msrb.mxu1 %v1304_v4  ;;  %2293 = vmatpush.msra.mxu2 %v1475_v5  ;;  %v630_v2 = vld [vmem:[#allocation7 + $0x768] sm:$0xff]  ;;  %v945_v4 = vld [vmem:[#allocation7 + $0x1140] sm:$0xff] }
 0x151   :  { %2316 = vmatpush.msrb.mxu3 %v1619_v6  ;;  %2255 = vmatpush.msra.mxu0 %v1115_v7  ;;  %v441_v5 = vld [vmem:[#allocation7 + $0x180] sm:$0xff]  ;;  %v792_v7 = vld [vmem:[#allocation7 + $0xc78] sm:$0xff] }
 0x152   :  { %2256 = vmatmul.f32.vlgmr.msra.gmra.mxu0 %v4309_v23  ;;  %2274 = vmatpush.msrb.mxu1 %v1295_v10  ;;  %v621_v6 = vld [vmem:[#allocation7 + $0x720] sm:$0xff]  ;;  %v936_v10 = vld [vmem:[#allocation7 + $0x10f8] sm:$0xff] }
 0x153   :  { %2294 = vmatpush.msra.mxu2 %v1466_v11  ;;  %2317 = vmatpush.msrb.mxu3 %v1610_v12  ;;  %v432_v11 = vld [vmem:[#allocation7 + $0x138] sm:$0xff] }
 0x154   :  { %2332 = vmatpush.msrb.mxu0 %v531_v14  ;;  %2275 = vmatpush.msrb.mxu1 %v1286_v16  ;;  %v612_v12 = vld [vmem:[#allocation7 + $0x6d8] sm:$0xff]  ;;  %v783_v14 = vld [vmem:[#allocation7 + $0xc30] sm:$0xff] }
 0x155   :  { %2295 = vmatpush.msra.mxu2 %v1457_v17  ;;  %2318 = vmatpush.msrb.mxu3 %v1601_v18  ;;  %v927_v16 = vld [vmem:[#allocation7 + $0x10b0] sm:$0xff] }
 0x156   :  { %2333 = vmatpush.msrb.mxu0 %v522_v19  ;;  %2276 = vmatpush.msrb.mxu1 %v1277_v20  ;;  %v423_v17 = vld [vmem:[#allocation7 + $0xf0] sm:$0xff]  ;;  %v774_v19 = vld [vmem:[#allocation7 + $0xbe8] sm:$0xff] }
 0x157   :  { %2296 = vmatpush.msra.mxu2 %v1448_v15  ;;  %2319 = vmatpush.msrb.mxu3 %v1592_v22  ;;  %v603_v18 = vld [vmem:[#allocation7 + $0x690] sm:$0xff]  ;;  %v918_v20 = vld [vmem:[#allocation7 + $0x1068] sm:$0xff] }
 0x158   :  { %2334 = vmatpush.msrb.mxu0 %v513_v24  ;;  %2277 = vmatpush.msrb.mxu1 %v1268_v25  ;;  %v414_v15 = vld [vmem:[#allocation7 + $0xa8] sm:$0xff]  ;;  %v765_v24 = vld [vmem:[#allocation7 + $0xba0] sm:$0xff] }
 0x159   :  { %2297 = vmatpush.msra.mxu2 %v1439_v26  ;;  %2320 = vmatpush.msrb.mxu3 %v1583_v29  ;;  %v594_v22 = vld [vmem:[#allocation7 + $0x648] sm:$0xff]  ;;  %v909_v25 = vld [vmem:[#allocation7 + $0x1020] sm:$0xff] }
 0x15a   :  { %2335 = vmatpush.msrb.mxu0 %v504_v32  ;;  %2278 = vmatpush.msrb.mxu1 %v1259_v33  ;;  %v405_v26 = vld [vmem:[#allocation7 + $0x60] sm:$0xff]  ;;  %v756_v32 = vld [vmem:[#allocation7 + $0xb58] sm:$0xff] }
 0x15b   :  { %2259 = vmatmul.f32.gmra.mxu0 %v4323_v49  ;;  %2298 = vmatpush.msra.mxu2 %v1430_v34  ;;  %v585_v29 = vld [vmem:[#allocation7 + $0x600] sm:$0xff]  ;;  %v900_v33 = vld [vmem:[#allocation7 + $0xfd8] sm:$0xff] }
 0x15c   :  { %2321 = vmatpush.msrb.mxu3 %v1574_v35  ;;  %2336 = vmatpush.msrb.mxu0 %v495_v36  ;;  %v396_v34 = vld [vmem:[#allocation7 + $0x18] sm:$0xff]  ;;  %v747_v36 = vld [vmem:[#allocation7 + $0xb10] sm:$0xff] }
 0x15d   :  { %2279 = vmatmul.f32.vlgmr.msrb.gmra.mxu1 %v4313_v28  ;;  %2299 = vmatpush.msra.mxu2 %v1421_v30  ;;  %v576_v35 = vld [vmem:[#allocation7 + $0x5b8] sm:$0xff]  ;;  %v891_v30 = vld [vmem:[#allocation7 + $0xf90] sm:$0xff] }
 0x15e   :  { %2355 = vmatpush.msra.mxu1 %v675_v38  ;;  %2322 = vmatpush.msrb.mxu3 %v1565_v39  ;;  %v1107_v38 = vld [vmem:[#allocation7 + $0x1650] sm:$0xff] }
 0x15f   :  { %2337 = vmatpush.msrb.mxu0 %v486_v40  ;;  %2300 = vmatpush.msra.mxu2 %v1412_v41  ;;  %v567_v39 = vld [vmem:[#allocation7 + $0x570] sm:$0xff]  ;;  %v738_v40 = vld [vmem:[#allocation7 + $0xac8] sm:$0xff] }
 0x160   :  { %2356 = vmatpush.msra.mxu1 %v666_v42  ;;  %2323 = vmatpush.msrb.mxu3 %v1556_v43  ;;  %v882_v41 = vld [vmem:[#allocation7 + $0xf48] sm:$0xff] }
 0x161   :  { %2338 = vmatpush.msrb.mxu0 %v477_v45  ;;  %2301 = vmatpush.msra.mxu2 %v1403_v46  ;;  %v1098_v42 = vld [vmem:[#allocation7 + $0x1608] sm:$0xff]  ;;  %v729_v45 = vld [vmem:[#allocation7 + $0xa80] sm:$0xff] }
 0x162   :  { %2357 = vmatpush.msra.mxu1 %v657_v50  ;;  %2324 = vmatpush.msrb.mxu3 %v1547_v51  ;;  %v558_v43 = vld [vmem:[#allocation7 + $0x528] sm:$0xff]  ;;  %v873_v46 = vld [vmem:[#allocation7 + $0xf00] sm:$0xff] }
 0x163   :  { %2339 = vmatpush.msrb.mxu0 %v468_v53  ;;  %2302 = vmatmul.f32.vlgmr.msra.gmra.mxu2 %v4333_v13  ;;  %v1089_v50 = vld [vmem:[#allocation7 + $0x15c0] sm:$0xff]  ;;  %v720_v53 = vld [vmem:[#allocation7 + $0xa38] sm:$0xff] }
 0x164   :  { %2325 = vmatmul.f32.vlgmr.msrb.gmra.mxu3 %v4335_v21  ;;  %2358 = vmatpush.msra.mxu1 %v648_v56  ;;  %v549_v51 = vld [vmem:[#allocation7 + $0x4e0] sm:$0xff]  ;;  %v864_v56 = vld [vmem:[#allocation7 + $0xeb8] sm:$0xff] }
 0x165   :  { %2378 = vmatpush.msrb.mxu2 %v819_v57  ;;  %2401 = vmatpush.msra.mxu3 %v963_v58  ;;  %v1080_v57 = vld [vmem:[#allocation7 + $0x1578] sm:$0xff] }
 0x166   :  { %2340 = vmatpush.msrb.mxu0 %v459_v60  ;;  %2282 = vmatmul.f32.gmra.mxu1 %v4325_v52  ;;  %v540_v58 = vld [vmem:[#allocation7 + $0x498] sm:$0xff]  ;;  %v711_v60 = vld [vmem:[#allocation7 + $0x9f0] sm:$0xff] }
 0x167   :  { %2359 = vmatpush.msra.mxu1 %v639_v61  ;;  %2379 = vmatpush.msrb.mxu2 %v810_v62  ;;  %v855_v61 = vld [vmem:[#allocation7 + $0xe70] sm:$0xff] }
 0x168   :  { %2402 = vmatpush.msra.mxu3 %v954_v63  ;;  %2341 = vmatpush.msrb.mxu0 %v450_v0  ;;  %v1071_v62 = vld [vmem:[#allocation7 + $0x1530] sm:$0xff]  ;;  %v702_v63 = vld [vmem:[#allocation7 + $0x9a8] sm:$0xff] }
 0x169   :  { %2360 = vmatpush.msra.mxu1 %v630_v2  ;;  %2380 = vmatpush.msrb.mxu2 %v801_v3  ;;  %v1251_v0 = vld [vmem:[#allocation7 + $0x1ad0] sm:$0xff]  ;;  %v846_v2 = vld [vmem:[#allocation7 + $0xe28] sm:$0xff] }
 0x16a   :  { %2403 = vmatpush.msra.mxu3 %v945_v4  ;;  %2342 = vmatpush.msrb.mxu0 %v441_v5  ;;  %v1062_v3 = vld [vmem:[#allocation7 + $0x14e8] sm:$0xff]  ;;  %v693_v4 = vld [vmem:[#allocation7 + $0x960] sm:$0xff] }
 0x16b   :  { %2361 = vmatpush.msra.mxu1 %v621_v6  ;;  %2381 = vmatpush.msrb.mxu2 %v792_v7  ;;  %v1242_v5 = vld [vmem:[#allocation7 + $0x1a88] sm:$0xff]  ;;  %v837_v6 = vld [vmem:[#allocation7 + $0xde0] sm:$0xff] }
 0x16c   :  { %2404 = vmatpush.msra.mxu3 %v936_v10  ;;  %2343 = vmatpush.msrb.mxu0 %v432_v11  ;;  %v1053_v7 = vld [vmem:[#allocation7 + $0x14a0] sm:$0xff]  ;;  %v684_v10 = vld [vmem:[#allocation7 + $0x918] sm:$0xff] }
 0x16d   :  { %2305 = vmatmul.f32.gmra.mxu2 %v4341_v37  ;;  %2328 = vmatmul.f32.gmra.mxu3 %v4343_v44  ;;  %v1233_v11 = vld [vmem:[#allocation7 + $0x1a40] sm:$0xff] }
 0x16e   :  { %2362 = vmatpush.msra.mxu1 %v612_v12  ;;  %2382 = vmatpush.msrb.mxu2 %v783_v14  ;;  %v828_v12 = vld [vmem:[#allocation7 + $0xd98] sm:$0xff] }
 0x16f   :  { %2405 = vmatpush.msra.mxu3 %v927_v16  ;;  %2344 = vmatpush.msrb.mxu0 %v423_v17  ;;  %v1044_v14 = vld [vmem:[#allocation7 + $0x1458] sm:$0xff]  ;;  %v1395_v17 = vld [vmem:[#allocation7 + $0x1f50] sm:$0xff] }
 0x170   :  { %2363 = vmatpush.msra.mxu1 %v603_v18  ;;  %2383 = vmatpush.msrb.mxu2 %v774_v19  ;;  %v1224_v16 = vld [vmem:[#allocation7 + $0x19f8] sm:$0xff]  ;;  %v1539_v18 = vld [vmem:[#allocation7 + $0x23d0] sm:$0xff] }
 0x171   :  { %2406 = vmatpush.msra.mxu3 %v918_v20  ;;  %2345 = vmatpush.msrb.mxu0 %v414_v15  ;;  %v1035_v19 = vld [vmem:[#allocation7 + $0x1410] sm:$0xff]  ;;  %v1386_v15 = vld [vmem:[#allocation7 + $0x1f08] sm:$0xff] }
 0x172   :  { %2364 = vmatpush.msra.mxu1 %v594_v22  ;;  %2384 = vmatpush.msrb.mxu2 %v765_v24  ;;  %v1215_v20 = vld [vmem:[#allocation7 + $0x19b0] sm:$0xff]  ;;  %v1530_v22 = vld [vmem:[#allocation7 + $0x2388] sm:$0xff] }
 0x173   :  { %2407 = vmatpush.msra.mxu3 %v909_v25  ;;  %2346 = vmatpush.msrb.mxu0 %v405_v26  ;;  %v1026_v24 = vld [vmem:[#allocation7 + $0x13c8] sm:$0xff]  ;;  %v1377_v26 = vld [vmem:[#allocation7 + $0x1ec0] sm:$0xff] }
 0x174   :  { %2365 = vmatpush.msra.mxu1 %v585_v29  ;;  %2385 = vmatpush.msrb.mxu2 %v756_v32  ;;  %v1206_v25 = vld [vmem:[#allocation7 + $0x1968] sm:$0xff]  ;;  %v1521_v29 = vld [vmem:[#allocation7 + $0x2340] sm:$0xff] }
 0x175   :  { %2408 = vmatpush.msra.mxu3 %v900_v33  ;;  %2347 = vmatpush.msrb.mxu0 %v396_v34  ;;  %v1017_v32 = vld [vmem:[#allocation7 + $0x1380] sm:$0xff]  ;;  %v1368_v34 = vld [vmem:[#allocation7 + $0x1e78] sm:$0xff] }
 0x176   :  { %2348 = vmatmul.f32.vlgmr.msrb.gmra.mxu0 %v4291_v48  ;;  %2366 = vmatpush.msra.mxu1 %v576_v35  ;;  %v1197_v33 = vld [vmem:[#allocation7 + $0x1920] sm:$0xff]  ;;  %v1512_v35 = vld [vmem:[#allocation7 + $0x22f8] sm:$0xff] }
 0x177   :  { %2386 = vmatpush.msrb.mxu2 %v747_v36  ;;  %2409 = vmatpush.msra.mxu3 %v891_v30  ;;  %v1008_v36 = vld [vmem:[#allocation7 + $0x1338] sm:$0xff] }
 0x178   :  { %2424 = vmatpush.msra.mxu0 %v1107_v38  ;;  %2367 = vmatpush.msra.mxu1 %v567_v39  ;;  %v1188_v30 = vld [vmem:[#allocation7 + $0x18d8] sm:$0xff]  ;;  %v1359_v38 = vld [vmem:[#allocation7 + $0x1e30] sm:$0xff] }
 0x179   :  { %2387 = vmatpush.msrb.mxu2 %v738_v40  ;;  %2410 = vmatpush.msra.mxu3 %v882_v41  ;;  %v1503_v39 = vld [vmem:[#allocation7 + $0x22b0] sm:$0xff] }
 0x17a   :  { %2425 = vmatpush.msra.mxu0 %v1098_v42  ;;  %2368 = vmatpush.msra.mxu1 %v558_v43  ;;  %v999_v40 = vld [vmem:[#allocation7 + $0x12f0] sm:$0xff]  ;;  %v1350_v42 = vld [vmem:[#allocation7 + $0x1de8] sm:$0xff] }
 0x17b   :  { %2388 = vmatpush.msrb.mxu2 %v729_v45  ;;  %2411 = vmatpush.msra.mxu3 %v873_v46  ;;  %v1179_v41 = vld [vmem:[#allocation7 + $0x1890] sm:$0xff]  ;;  %v1494_v43 = vld [vmem:[#allocation7 + $0x2268] sm:$0xff] }
 0x17c   :  { %2426 = vmatpush.msra.mxu0 %v1089_v50  ;;  %2369 = vmatpush.msra.mxu1 %v549_v51  ;;  %v990_v45 = vld [vmem:[#allocation7 + $0x12a8] sm:$0xff]  ;;  %v1341_v50 = vld [vmem:[#allocation7 + $0x1da0] sm:$0xff] }
 0x17d   :  { %2389 = vmatpush.msrb.mxu2 %v720_v53  ;;  %2412 = vmatpush.msra.mxu3 %v864_v56  ;;  %v1170_v46 = vld [vmem:[#allocation7 + $0x1848] sm:$0xff]  ;;  %v1485_v51 = vld [vmem:[#allocation7 + $0x2220] sm:$0xff] }
 0x17e   :  { %2427 = vmatpush.msra.mxu0 %v1080_v57  ;;  %2370 = vmatpush.msra.mxu1 %v540_v58  ;;  %v981_v53 = vld [vmem:[#allocation7 + $0x1260] sm:$0xff]  ;;  %v1332_v57 = vld [vmem:[#allocation7 + $0x1d58] sm:$0xff] }
 0x17f   :  { %2351 = vmatmul.f32.gmra.mxu0 %v4300_v1  ;;  %2390 = vmatpush.msrb.mxu2 %v711_v60  ;;  %v1161_v56 = vld [vmem:[#allocation7 + $0x1800] sm:$0xff]  ;;  %v1476_v58 = vld [vmem:[#allocation7 + $0x21d8] sm:$0xff] }
 0x180   :  { %2413 = vmatpush.msra.mxu3 %v855_v61  ;;  %2428 = vmatpush.msra.mxu0 %v1071_v62  ;;  %v972_v60 = vld [vmem:[#allocation7 + $0x1218] sm:$0xff]  ;;  %v1323_v62 = vld [vmem:[#allocation7 + $0x1d10] sm:$0xff] }
 0x181   :  { %2371 = vmatmul.f32.vlgmr.msra.gmra.mxu1 %v4294_v54  ;;  %2391 = vmatpush.msrb.mxu2 %v702_v63  ;;  %v1152_v61 = vld [vmem:[#allocation7 + $0x17b8] sm:$0xff]  ;;  %v1467_v63 = vld [vmem:[#allocation7 + $0x2190] sm:$0xff] }
 0x182   :  { %2447 = vmatpush.msrb.mxu1 %v1251_v0  ;;  %2414 = vmatpush.msra.mxu3 %v846_v2  ;;  %v1683_v0 = vld [vmem:[#allocation7 + $0x2850] sm:$0xff] }
 0x183   :  { %2429 = vmatpush.msra.mxu0 %v1062_v3  ;;  %2392 = vmatpush.msrb.mxu2 %v693_v4  ;;  %v1143_v2 = vld [vmem:[#allocation7 + $0x1770] sm:$0xff]  ;;  %v1314_v3 = vld [vmem:[#allocation7 + $0x1cc8] sm:$0xff] }
 0x184   :  { %2448 = vmatpush.msrb.mxu1 %v1242_v5  ;;  %2415 = vmatpush.msra.mxu3 %v837_v6  ;;  %v1458_v4 = vld [vmem:[#allocation7 + $0x2148] sm:$0xff] }
 0x185   :  { %2430 = vmatpush.msra.mxu0 %v1053_v7  ;;  %2393 = vmatpush.msrb.mxu2 %v684_v10  ;;  %v1674_v5 = vld [vmem:[#allocation7 + $0x2808] sm:$0xff]  ;;  %v1305_v7 = vld [vmem:[#allocation7 + $0x1c80] sm:$0xff] }
 0x186   :  { %2449 = vmatpush.msrb.mxu1 %v1233_v11  ;;  %2416 = vmatpush.msra.mxu3 %v828_v12  ;;  %v1134_v6 = vld [vmem:[#allocation7 + $0x1728] sm:$0xff]  ;;  %v1449_v10 = vld [vmem:[#allocation7 + $0x2100] sm:$0xff] }
 0x187   :  { %2431 = vmatpush.msra.mxu0 %v1044_v14  ;;  %2394 = vmatmul.f32.vlgmr.msrb.gmra.mxu2 %v4296_v55  ;;  %v1665_v11 = vld [vmem:[#allocation7 + $0x27c0] sm:$0xff]  ;;  %v1296_v14 = vld [vmem:[#allocation7 + $0x1c38] sm:$0xff] }
 0x188   :  { %2417 = vmatmul.f32.vlgmr.msra.gmra.mxu3 %v4311_v27  ;;  %2450 = vmatpush.msrb.mxu1 %v1224_v16  ;;  %v1125_v12 = vld [vmem:[#allocation7 + $0x16e0] sm:$0xff]  ;;  %v1440_v16 = vld [vmem:[#allocation7 + $0x20b8] sm:$0xff] }
 0x189   :  { %2470 = vmatpush.msra.mxu2 %v1395_v17  ;;  %2493 = vmatpush.msrb.mxu3 %v1539_v18  ;;  %v1656_v17 = vld [vmem:[#allocation7 + $0x2778] sm:$0xff] }
 0x18a   :  { %2432 = vmatpush.msra.mxu0 %v1035_v19  ;;  %2374 = vmatmul.f32.gmra.mxu1 %v4303_v8  ;;  %v1116_v18 = vld [vmem:[#allocation7 + $0x1698] sm:$0xff]  ;;  %v1287_v19 = vld [vmem:[#allocation7 + $0x1bf0] sm:$0xff] }
 0x18b   :  { %2451 = vmatpush.msrb.mxu1 %v1215_v20  ;;  %2471 = vmatpush.msra.mxu2 %v1386_v15  ;;  %v1431_v20 = vld [vmem:[#allocation7 + $0x2070] sm:$0xff] }
 0x18c   :  { %2494 = vmatpush.msrb.mxu3 %v1530_v22  ;;  %2433 = vmatpush.msra.mxu0 %v1026_v24  ;;  %v1647_v15 = vld [vmem:[#allocation7 + $0x2730] sm:$0xff]  ;;  %v1278_v22 = vld [vmem:[#allocation7 + $0x1ba8] sm:$0xff]  ;;  %v532_v24 = vld [vmem:[#allocation7 + $0x458] sm:$0xff] }
 0x18d   :  { %2452 = vmatpush.msrb.mxu1 %v1206_v25  ;;  %2472 = vmatpush.msra.mxu2 %v1377_v26  ;;  %v1422_v25 = vld [vmem:[#allocation7 + $0x2028] sm:$0xff] }
 0x18e   :  { %2495 = vmatpush.msrb.mxu3 %v1521_v29  ;;  %2434 = vmatpush.msra.mxu0 %v1017_v32  ;;  %v1638_v26 = vld [vmem:[#allocation7 + $0x26e8] sm:$0xff]  ;;  %v1269_v29 = vld [vmem:[#allocation7 + $0x1b60] sm:$0xff]  ;;  %v523_v32 = vld [vmem:[#allocation7 + $0x410] sm:$0xff] }
 0x18f   :  { %2453 = vmatpush.msrb.mxu1 %v1197_v33  ;;  %2473 = vmatpush.msra.mxu2 %v1368_v34  ;;  %v1413_v33 = vld [vmem:[#allocation7 + $0x1fe0] sm:$0xff] }
 0x190   :  { %2496 = vmatpush.msrb.mxu3 %v1512_v35  ;;  %2435 = vmatpush.msra.mxu0 %v1008_v36  ;;  %v1629_v34 = vld [vmem:[#allocation7 + $0x26a0] sm:$0xff]  ;;  %v1260_v35 = vld [vmem:[#allocation7 + $0x1b18] sm:$0xff]  ;;  %v514_v36 = vld [vmem:[#allocation7 + $0x3c8] sm:$0xff] }
 0x191   :  { %2397 = vmatmul.f32.gmra.mxu2 %v4305_v9  ;;  %2420 = vmatmul.f32.gmra.mxu3 %v4321_v47 }
 0x192   :  { %2454 = vmatpush.msrb.mxu1 %v1188_v30  ;;  %2474 = vmatpush.msra.mxu2 %v1359_v38  ;;  %v1404_v30 = vld [vmem:[#allocation7 + $0x1f98] sm:$0xff] }
 0x193   :  { %2497 = vmatpush.msrb.mxu3 %v1503_v39  ;;  %2436 = vmatpush.msra.mxu0 %v999_v40  ;;  %v1620_v38 = vld [vmem:[#allocation7 + $0x2658] sm:$0xff]  ;;  %v505_v39 = vld [vmem:[#allocation7 + $0x380] sm:$0xff] }
 0x194   :  { %2455 = vmatpush.msrb.mxu1 %v1179_v41  ;;  %2475 = vmatpush.msra.mxu2 %v1350_v42  ;;  %v676_v40 = vld [vmem:[#allocation7 + $0x8d8] sm:$0xff]  ;;  %v1611_v42 = vld [vmem:[#allocation7 + $0x2610] sm:$0xff] }
 0x195   :  { %2498 = vmatpush.msrb.mxu3 %v1494_v43  ;;  %2437 = vmatpush.msra.mxu0 %v990_v45  ;;  %v820_v41 = vld [vmem:[#allocation7 + $0xd58] sm:$0xff]  ;;  %v667_v45 = vld [vmem:[#allocation7 + $0x890] sm:$0xff] }
 0x196   :  { %2456 = vmatpush.msrb.mxu1 %v1170_v46  ;;  %2476 = vmatpush.msra.mxu2 %v1341_v50  ;;  %v496_v43 = vld [vmem:[#allocation7 + $0x338] sm:$0xff]  ;;  %v811_v46 = vld [vmem:[#allocation7 + $0xd10] sm:$0xff]  ;;  %v1602_v50 = vld [vmem:[#allocation7 + $0x25c8] sm:$0xff] }
 0x197   :  { %2499 = vmatpush.msrb.mxu3 %v1485_v51  ;;  %2438 = vmatpush.msra.mxu0 %v981_v53  ;;  %v487_v51 = vld [vmem:[#allocation7 + $0x2f0] sm:$0xff]  ;;  %v658_v53 = vld [vmem:[#allocation7 + $0x848] sm:$0xff] }
 0x198   :  { %2457 = vmatpush.msrb.mxu1 %v1161_v56  ;;  %2477 = vmatpush.msra.mxu2 %v1332_v57  ;;  %v802_v56 = vld [vmem:[#allocation7 + $0xcc8] sm:$0xff]  ;;  %v1593_v57 = vld [vmem:[#allocation7 + $0x2580] sm:$0xff] }
 0x199   :  { %2500 = vmatpush.msrb.mxu3 %v1476_v58  ;;  %2439 = vmatpush.msra.mxu0 %v972_v60  ;;  %v478_v58 = vld [vmem:[#allocation7 + $0x2a8] sm:$0xff]  ;;  %v649_v60 = vld [vmem:[#allocation7 + $0x800] sm:$0xff] }
 0x19a   :  { %2440 = vmatmul.f32.vlgmr.msra.gmra.mxu0 %v4315_v31  ;;  %2458 = vmatpush.msrb.mxu1 %v1152_v61  ;;  %v793_v61 = vld [vmem:[#allocation7 + $0xc80] sm:$0xff] }
 0x19b   :  { %2478 = vmatpush.msra.mxu2 %v1323_v62  ;;  %2501 = vmatpush.msrb.mxu3 %v1467_v63  ;;  %v1584_v62 = vld [vmem:[#allocation7 + $0x2538] sm:$0xff]  ;;  %v469_v63 = vld [vmem:[#allocation7 + $0x260] sm:$0xff] }
 0x19c   :  { %2516 = vmatpush.msrb.mxu0 %v1683_v0  ;;  %2459 = vmatpush.msrb.mxu1 %v1143_v2  ;;  %v640_v0 = vld [vmem:[#allocation7 + $0x7b8] sm:$0xff] }
 0x19d   :  { %2479 = vmatpush.msra.mxu2 %v1314_v3  ;;  %2502 = vmatpush.msrb.mxu3 %v1458_v4  ;;  %v784_v2 = vld [vmem:[#allocation7 + $0xc38] sm:$0xff]  ;;  %v1575_v3 = vld [vmem:[#allocation7 + $0x24f0] sm:$0xff] }
 0x19e   :  { %2517 = vmatpush.msrb.mxu0 %v1674_v5  ;;  %2460 = vmatpush.msrb.mxu1 %v1134_v6  ;;  %v460_v4 = vld [vmem:[#allocation7 + $0x218] sm:$0xff]  ;;  %v631_v5 = vld [vmem:[#allocation7 + $0x770] sm:$0xff] }
 0x19f   :  { %2480 = vmatpush.msra.mxu2 %v1305_v7  ;;  %2503 = vmatpush.msrb.mxu3 %v1449_v10  ;;  %v775_v6 = vld [vmem:[#allocation7 + $0xbf0] sm:$0xff]  ;;  %v1566_v7 = vld [vmem:[#allocation7 + $0x24a8] sm:$0xff] }
 0x1a0   :  { %2518 = vmatpush.msrb.mxu0 %v1665_v11  ;;  %2461 = vmatpush.msrb.mxu1 %v1125_v12  ;;  %v451_v10 = vld [vmem:[#allocation7 + $0x1d0] sm:$0xff]  ;;  %v622_v11 = vld [vmem:[#allocation7 + $0x728] sm:$0xff] }
 0x1a1   :  { %2481 = vmatpush.msra.mxu2 %v1296_v14  ;;  %2504 = vmatpush.msrb.mxu3 %v1440_v16  ;;  %v766_v12 = vld [vmem:[#allocation7 + $0xba8] sm:$0xff]  ;;  %v1557_v14 = vld [vmem:[#allocation7 + $0x2460] sm:$0xff] }
 0x1a2   :  { %2519 = vmatpush.msrb.mxu0 %v1656_v17  ;;  %2462 = vmatpush.msrb.mxu1 %v1116_v18  ;;  %v442_v16 = vld [vmem:[#allocation7 + $0x188] sm:$0xff]  ;;  %v613_v17 = vld [vmem:[#allocation7 + $0x6e0] sm:$0xff] }
 0x1a3   :  { %2443 = vmatmul.f32.gmra.mxu0 %v4327_v59  ;;  %2482 = vmatpush.msra.mxu2 %v1287_v19  ;;  %v757_v18 = vld [vmem:[#allocation7 + $0xb60] sm:$0xff]  ;;  %v1548_v19 = vld [vmem:[#allocation7 + $0x2418] sm:$0xff] }
 0x1a4   :  { %2505 = vmatpush.msrb.mxu3 %v1431_v20  ;;  %2520 = vmatpush.msrb.mxu0 %v1647_v15  ;;  %v433_v20 = vld [vmem:[#allocation7 + $0x140] sm:$0xff]  ;;  %v604_v15 = vld [vmem:[#allocation7 + $0x698] sm:$0xff] }
 0x1a5   :  { %2463 = vmatmul.f32.vlgmr.msrb.gmra.mxu1 %v4309_v23  ;;  %2483 = vmatpush.msra.mxu2 %v1278_v22  ;;  %v748_v22 = vld [vmem:[#allocation7 + $0xb18] sm:$0xff] }
 0x1a6   :  { %2539 = vmatpush.msra.mxu1 %v532_v24  ;;  %2506 = vmatpush.msrb.mxu3 %v1422_v25  ;;  %v964_v24 = vld [vmem:[#allocation7 + $0x11d8] sm:$0xff] }
 0x1a7   :  { %2521 = vmatpush.msrb.mxu0 %v1638_v26  ;;  %2484 = vmatpush.msra.mxu2 %v1269_v29  ;;  %v424_v25 = vld [vmem:[#allocation7 + $0xf8] sm:$0xff]  ;;  %v595_v26 = vld [vmem:[#allocation7 + $0x650] sm:$0xff] }
 0x1a8   :  { %2540 = vmatpush.msra.mxu1 %v523_v32  ;;  %2507 = vmatpush.msrb.mxu3 %v1413_v33  ;;  %v739_v29 = vld [vmem:[#allocation7 + $0xad0] sm:$0xff] }
 0x1a9   :  { %2522 = vmatpush.msrb.mxu0 %v1629_v34  ;;  %2485 = vmatpush.msra.mxu2 %v1260_v35  ;;  %v955_v32 = vld [vmem:[#allocation7 + $0x1190] sm:$0xff]  ;;  %v586_v34 = vld [vmem:[#allocation7 + $0x608] sm:$0xff] }
 0x1aa   :  { %2541 = vmatpush.msra.mxu1 %v514_v36  ;;  %2508 = vmatpush.msrb.mxu3 %v1404_v30  ;;  %v415_v33 = vld [vmem:[#allocation7 + $0xb0] sm:$0xff]  ;;  %v730_v35 = vld [vmem:[#allocation7 + $0xa88] sm:$0xff] }
 0x1ab   :  { %2523 = vmatpush.msrb.mxu0 %v1620_v38  ;;  %2486 = vmatmul.f32.vlgmr.msra.gmra.mxu2 %v4313_v28  ;;  %v946_v36 = vld [vmem:[#allocation7 + $0x1148] sm:$0xff]  ;;  %v4398_v38 = vpop.f32.mrf.mxu1 }
 0x1ac   :  { %2509 = vmatmul.f32.vlgmr.msrb.gmra.mxu3 %v4333_v13  ;;  %2542 = vmatpush.msra.mxu1 %v505_v39  ;;  %v406_v30 = vld [vmem:[#allocation7 + $0x68] sm:$0xff]  ;;  %v4400_v39 = vpop.f32.mrf.mxu2 }
 0x1ad   :  { %2562 = vmatpush.msrb.mxu2 %v676_v40  ;;  %2585 = vmatpush.msra.mxu3 %v820_v41  ;;  %v577_v40 = vld [vmem:[#allocation7 + $0x5c0] sm:$0xff] }
 0x1ae   :  { %2524 = vmatpush.msrb.mxu0 %v1611_v42  ;;  %2466 = vmatmul.f32.gmra.mxu1 %v4323_v49  ;;  %v721_v41 = vld [vmem:[#allocation7 + $0xa40] sm:$0xff] }
 0x1af   :  { %2543 = vmatpush.msra.mxu1 %v496_v43  ;;  %2563 = vmatpush.msrb.mxu2 %v667_v45  ;;  %v937_v42 = vld [vmem:[#allocation7 + $0x1100] sm:$0xff]  ;;  %v568_v45 = vld [vmem:[#allocation7 + $0x578] sm:$0xff] }
 0x1b0   :  { %2586 = vmatpush.msra.mxu3 %v811_v46  ;;  %2525 = vmatpush.msrb.mxu0 %v1602_v50  ;;  %v397_v43 = vld [vmem:[#allocation7 + $0x20] sm:$0xff]  ;;  %v712_v46 = vld [vmem:[#allocation7 + $0x9f8] sm:$0xff] }
 0x1b1   :  { %2544 = vmatpush.msra.mxu1 %v487_v51  ;;  %2564 = vmatpush.msrb.mxu2 %v658_v53  ;;  %v928_v50 = vld [vmem:[#allocation7 + $0x10b8] sm:$0xff]  ;;  %v559_v51 = vld [vmem:[#allocation7 + $0x530] sm:$0xff] }
 0x1b2   :  { %2587 = vmatpush.msra.mxu3 %v802_v56  ;;  %2526 = vmatpush.msrb.mxu0 %v1593_v57  ;;  %v1108_v53 = vld [vmem:[#allocation7 + $0x1658] sm:$0xff]  ;;  %v703_v56 = vld [vmem:[#allocation7 + $0x9b0] sm:$0xff]  ;;  %v4403_v57 = vpop.f32.mrf.mxu3 }
 0x1b3   :  { %2545 = vmatpush.msra.mxu1 %v478_v58  ;;  %2565 = vmatpush.msrb.mxu2 %v649_v60  ;;  %v919_v58 = vld [vmem:[#allocation7 + $0x1070] sm:$0xff]  ;;  %v550_v60 = vld [vmem:[#allocation7 + $0x4e8] sm:$0xff] }
 0x1b4   :  { %2588 = vmatpush.msra.mxu3 %v793_v61  ;;  %2527 = vmatpush.msrb.mxu0 %v1584_v62  ;;  %v1099_v61 = vld [vmem:[#allocation7 + $0x1610] sm:$0xff]  ;;  %v694_v62 = vld [vmem:[#allocation7 + $0x968] sm:$0xff] }
 0x1b5   :  { %2489 = vmatmul.f32.gmra.mxu2 %v4325_v52  ;;  %2512 = vmatmul.f32.gmra.mxu3 %v4341_v37 }
 0x1b6   :  { %2546 = vmatpush.msra.mxu1 %v469_v63  ;;  %2566 = vmatpush.msrb.mxu2 %v640_v0  ;;  %v4406_v63 = vpop.f32.mrf.mxu1  ;;  %v910_v0 = vld [vmem:[#allocation7 + $0x1028] sm:$0xff] }
 0x1b7   :  { %2589 = vmatpush.msra.mxu3 %v784_v2  ;;  %2528 = vmatpush.msrb.mxu0 %v1575_v3  ;;  %v541_v2 = vld [vmem:[#allocation7 + $0x4a0] sm:$0xff]  ;;  %v4408_v3 = vpop.f32.mrf.mxu0 }
 0x1b8   :  { %2547 = vmatpush.msra.mxu1 %v460_v4  ;;  %2567 = vmatpush.msrb.mxu2 %v631_v5  ;;  %v1090_v4 = vld [vmem:[#allocation7 + $0x15c8] sm:$0xff]  ;;  %v685_v5 = vld [vmem:[#allocation7 + $0x920] sm:$0xff] }
 0x1b9   :  { %2590 = vmatpush.msra.mxu3 %v775_v6  ;;  %2529 = vmatpush.msrb.mxu0 %v1566_v7  ;;  %v4410_v6 = vpop.f32.mrf.mxu2  ;;  %v901_v7 = vld [vmem:[#allocation7 + $0xfe0] sm:$0xff] }
 0x1ba   :  { %2548 = vmatpush.msra.mxu1 %v451_v10  ;;  %2568 = vmatpush.msrb.mxu2 %v622_v11  ;;  %v1081_v10 = vld [vmem:[#allocation7 + $0x1580] sm:$0xff]  ;;  %v1252_v11 = vld [vmem:[#allocation7 + $0x1ad8] sm:$0xff] }
 0x1bb   :  { %2591 = vmatpush.msra.mxu3 %v766_v12  ;;  %2530 = vmatpush.msrb.mxu0 %v1557_v14  ;;  %v1396_v12 = vld [vmem:[#allocation7 + $0x1f58] sm:$0xff] }
 0x1bc   :  { %2549 = vmatpush.msra.mxu1 %v442_v16  ;;  %2569 = vmatpush.msrb.mxu2 %v613_v17  ;;  %v892_v14 = vld [vmem:[#allocation7 + $0xf98] sm:$0xff]  ;;  %v1243_v17 = vld [vmem:[#allocation7 + $0x1a90] sm:$0xff] }
 0x1bd   :  { %2592 = vmatpush.msra.mxu3 %v757_v18  ;;  %2531 = vmatpush.msrb.mxu0 %v1548_v19  ;;  %v1072_v16 = vld [vmem:[#allocation7 + $0x1538] sm:$0xff]  ;;  %v1387_v18 = vld [vmem:[#allocation7 + $0x1f10] sm:$0xff] }
 0x1be   :  { %2532 = vmatmul.f32.vlgmr.msrb.gmra.mxu0 %v4335_v21  ;;  %2550 = vmatpush.msra.mxu1 %v433_v20  ;;  %v883_v19 = vld [vmem:[#allocation7 + $0xf50] sm:$0xff]  ;;  %v4414_v20 = vpop.f32.mrf.mxu3 }
 0x1bf   :  { %2570 = vmatpush.msrb.mxu2 %v604_v15  ;;  %2593 = vmatpush.msra.mxu3 %v748_v22  ;;  %v1063_v15 = vld [vmem:[#allocation7 + $0x14f0] sm:$0xff]  ;;  %v1234_v22 = vld [vmem:[#allocation7 + $0x1a48] sm:$0xff] }
 0x1c0   :  { %2608 = vmatpush.msra.mxu0 %v964_v24  ;;  %2551 = vmatpush.msra.mxu1 %v424_v25  ;;  %v1378_v24 = vld [vmem:[#allocation7 + $0x1ec8] sm:$0xff] }
 0x1c1   :  { %2571 = vmatpush.msrb.mxu2 %v595_v26  ;;  %2594 = vmatpush.msra.mxu3 %v739_v29  ;;  %v874_v25 = vld [vmem:[#allocation7 + $0xf08] sm:$0xff]  ;;  %v4417_v26 = vpop.f32.mrf.mxu1 }
 0x1c2   :  { %2609 = vmatpush.msra.mxu0 %v955_v32  ;;  %2552 = vmatpush.msra.mxu1 %v415_v33  ;;  %v1054_v29 = vld [vmem:[#allocation7 + $0x14a8] sm:$0xff]  ;;  %v1225_v32 = vld [vmem:[#allocation7 + $0x1a00] sm:$0xff]  ;;  %v4419_v33 = vpop.f32.mrf.mxu0 }
 0x1c3   :  { %2572 = vmatpush.msrb.mxu2 %v586_v34  ;;  %2595 = vmatpush.msra.mxu3 %v730_v35  ;;  %v1369_v34 = vld [vmem:[#allocation7 + $0x1e80] sm:$0xff] }
 0x1c4   :  { %2610 = vmatpush.msra.mxu0 %v946_v36  ;;  %2553 = vmatpush.msra.mxu1 %v406_v30  ;;  %v865_v35 = vld [vmem:[#allocation7 + $0xec0] sm:$0xff]  ;;  %v4421_v36 = vpop.f32.mrf.mxu2 }
 0x1c5   :  { %2573 = vmatpush.msrb.mxu2 %v577_v40  ;;  %2596 = vmatpush.msra.mxu3 %v721_v41  ;;  %v1045_v30 = vld [vmem:[#allocation7 + $0x1460] sm:$0xff]  ;;  %v1216_v40 = vld [vmem:[#allocation7 + $0x19b8] sm:$0xff] }
 0x1c6   :  { %2611 = vmatpush.msra.mxu0 %v937_v42  ;;  %2554 = vmatpush.msra.mxu1 %v397_v43  ;;  %v1360_v41 = vld [vmem:[#allocation7 + $0x1e38] sm:$0xff] }
 0x1c7   :  { %2535 = vmatmul.f32.gmra.mxu0 %v4343_v44  ;;  %2574 = vmatpush.msrb.mxu2 %v568_v45  ;;  %v856_v42 = vld [vmem:[#allocation7 + $0xe78] sm:$0xff]  ;;  %v1207_v45 = vld [vmem:[#allocation7 + $0x1970] sm:$0xff] }
 0x1c8   :  { %2597 = vmatpush.msra.mxu3 %v712_v46  ;;  %2612 = vmatpush.msra.mxu0 %v928_v50  ;;  %v1036_v43 = vld [vmem:[#allocation7 + $0x1418] sm:$0xff]  ;;  %v1351_v46 = vld [vmem:[#allocation7 + $0x1df0] sm:$0xff] }
 0x1c9   :  { %2555 = vmatmul.f32.vlgmr.msra.gmra.mxu1 %v4291_v48  ;;  %2575 = vmatpush.msrb.mxu2 %v559_v51  ;;  %v847_v50 = vld [vmem:[#allocation7 + $0xe30] sm:$0xff] }
 0x1ca   :  { %2631 = vmatpush.msrb.mxu1 %v1108_v53  ;;  %2598 = vmatpush.msra.mxu3 %v703_v56  ;;  %v1027_v51 = vld [vmem:[#allocation7 + $0x13d0] sm:$0xff]  ;;  %v1198_v53 = vld [vmem:[#allocation7 + $0x1928] sm:$0xff]  ;;  %v4425_v56 = vpop.f32.mrf.mxu3 }
 0x1cb   :  { %2613 = vmatpush.msra.mxu0 %v919_v58  ;;  %2576 = vmatpush.msrb.mxu2 %v550_v60  ;;  %v1342_v58 = vld [vmem:[#allocation7 + $0x1da8] sm:$0xff] }
 0x1cc   :  { %2632 = vmatpush.msrb.mxu1 %v1099_v61  ;;  %2599 = vmatpush.msra.mxu3 %v694_v62  ;;  %v838_v60 = vld [vmem:[#allocation7 + $0xde8] sm:$0xff]  ;;  %v1189_v62 = vld [vmem:[#allocation7 + $0x18e0] sm:$0xff] }
 0x1cd   :  { %2614 = vmatpush.msra.mxu0 %v910_v0  ;;  %2577 = vmatpush.msrb.mxu2 %v541_v2  ;;  %v1018_v61 = vld [vmem:[#allocation7 + $0x1388] sm:$0xff]  ;;  %v4427_v0 = vpop.f32.mrf.mxu1  ;;  %v1333_v2 = vld [vmem:[#allocation7 + $0x1d60] sm:$0xff] }
 0x1ce   :  { %2633 = vmatpush.msrb.mxu1 %v1090_v4  ;;  %2600 = vmatpush.msra.mxu3 %v685_v5  ;;  %v829_v4 = vld [vmem:[#allocation7 + $0xda0] sm:$0xff]  ;;  %v4429_v5 = vpop.f32.mrf.mxu0 }
 0x1cf   :  { %2615 = vmatpush.msra.mxu0 %v901_v7  ;;  %2578 = vmatmul.f32.vlgmr.msrb.gmra.mxu2 %v4294_v54  ;;  %v1009_v7 = vld [vmem:[#allocation7 + $0x1340] sm:$0xff] }
 0x1d0   :  { %2601 = vmatmul.f32.vlgmr.msra.gmra.mxu3 %v4296_v55  ;;  %2634 = vmatpush.msrb.mxu1 %v1081_v10  ;;  %v4431_v10 = vpop.f32.mrf.mxu2 }
 0x1d1   :  { %2654 = vmatpush.msra.mxu2 %v1252_v11  ;;  %2677 = vmatpush.msrb.mxu3 %v1396_v12  ;;  %4879 = vst [vmem:[#allocation19_spill] sm:$0xff] %v4431_v10  ;;  %v1180_v11 = vld [vmem:[#allocation7 + $0x1898] sm:$0xff] }
 0x1d2   :  { %2616 = vmatpush.msra.mxu0 %v892_v14  ;;  %2558 = vmatmul.f32.gmra.mxu1 %v4300_v1  ;;  %v1324_v12 = vld [vmem:[#allocation7 + $0x1d18] sm:$0xff] }
 0x1d3   :  { %2635 = vmatpush.msrb.mxu1 %v1072_v16  ;;  %2655 = vmatpush.msra.mxu2 %v1243_v17  ;;  %v1540_v14 = vld [vmem:[#allocation7 + $0x23d8] sm:$0xff]  ;;  %v1171_v17 = vld [vmem:[#allocation7 + $0x1850] sm:$0xff] }
 0x1d4   :  { %2678 = vmatpush.msrb.mxu3 %v1387_v18  ;;  %2617 = vmatpush.msra.mxu0 %v883_v19  ;;  %v1000_v16 = vld [vmem:[#allocation7 + $0x12f8] sm:$0xff]  ;;  %v1315_v18 = vld [vmem:[#allocation7 + $0x1cd0] sm:$0xff] }
 0x1d5   :  { %2636 = vmatpush.msrb.mxu1 %v1063_v15  ;;  %2656 = vmatpush.msra.mxu2 %v1234_v22  ;;  %v1531_v19 = vld [vmem:[#allocation7 + $0x2390] sm:$0xff]  ;;  %v1162_v22 = vld [vmem:[#allocation7 + $0x1808] sm:$0xff]  ;;  %v696_v10 = vld [vmem:[#allocation7 + $0x978] sm:$0xff] }
 0x1d6   :  { %2679 = vmatpush.msrb.mxu3 %v1378_v24  ;;  %2618 = vmatpush.msra.mxu0 %v874_v25  ;;  %v991_v15 = vld [vmem:[#allocation7 + $0x12b0] sm:$0xff]  ;;  %v1306_v24 = vld [vmem:[#allocation7 + $0x1c88] sm:$0xff] }
 0x1d7   :  { %2637 = vmatpush.msrb.mxu1 %v1054_v29  ;;  %2657 = vmatpush.msra.mxu2 %v1225_v32  ;;  %v1522_v25 = vld [vmem:[#allocation7 + $0x2348] sm:$0xff]  ;;  %v4434_v32 = vpop.f32.mrf.mxu3 }
 0x1d8   :  { %2680 = vmatpush.msrb.mxu3 %v1369_v34  ;;  %2619 = vmatpush.msra.mxu0 %v865_v35  ;;  %v982_v29 = vld [vmem:[#allocation7 + $0x1268] sm:$0xff]  ;;  %4880 = vst [vmem:[#allocation20_spill] sm:$0xff] %v4434_v32  ;;  %v1153_v34 = vld [vmem:[#allocation7 + $0x17c0] sm:$0xff] }
 0x1d9   :  { %2581 = vmatmul.f32.gmra.mxu2 %v4303_v8  ;;  %2604 = vmatmul.f32.gmra.mxu3 %v4305_v9  ;;  %v1297_v35 = vld [vmem:[#allocation7 + $0x1c40] sm:$0xff] }
 0x1da   :  { %2638 = vmatpush.msrb.mxu1 %v1045_v30  ;;  %2658 = vmatpush.msra.mxu2 %v1216_v40  ;;  %v1513_v30 = vld [vmem:[#allocation7 + $0x2300] sm:$0xff] }
 0x1db   :  { %2681 = vmatpush.msrb.mxu3 %v1360_v41  ;;  %2620 = vmatpush.msra.mxu0 %v856_v42  ;;  %v973_v40 = vld [vmem:[#allocation7 + $0x1220] sm:$0xff]  ;;  %v4436_v41 = vpop.f32.mrf.mxu1  ;;  %v1144_v42 = vld [vmem:[#allocation7 + $0x1778] sm:$0xff] }
 0x1dc   :  { %2639 = vmatpush.msrb.mxu1 %v1036_v43  ;;  %2659 = vmatpush.msra.mxu2 %v1207_v45  ;;  %4881 = vst [vmem:[#allocation21_spill] sm:$0xff] %v4436_v41  ;;  %v4438_v43 = vpop.f32.mrf.mxu0  ;;  %v1288_v45 = vld [vmem:[#allocation7 + $0x1bf8] sm:$0xff]  ;;  %v1038_v41 = vld [vmem:[#allocation7 + $0x1428] sm:$0xff] }
 0x1dd   :  { %2682 = vmatpush.msrb.mxu3 %v1351_v46  ;;  %2621 = vmatpush.msra.mxu0 %v847_v50  ;;  %4882 = vst [vmem:[#allocation22_spill] sm:$0xff] %v4438_v43  ;;  %v1504_v46 = vld [vmem:[#allocation7 + $0x22b8] sm:$0xff]  ;;  %v4440_v50 = vpop.f32.mrf.mxu2 }
 0x1de   :  { %2640 = vmatpush.msrb.mxu1 %v1027_v51  ;;  %2660 = vmatpush.msra.mxu2 %v1198_v53  ;;  %v1135_v51 = vld [vmem:[#allocation7 + $0x1730] sm:$0xff]  ;;  %v1684_v53 = vld [vmem:[#allocation7 + $0x2858] sm:$0xff] }
 0x1df   :  { %2683 = vmatpush.msrb.mxu3 %v1342_v58  ;;  %2622 = vmatpush.msra.mxu0 %v838_v60  ;;  %v1279_v58 = vld [vmem:[#allocation7 + $0x1bb0] sm:$0xff] }
 0x1e0   :  { %2641 = vmatpush.msrb.mxu1 %v1018_v61  ;;  %2661 = vmatpush.msra.mxu2 %v1189_v62  ;;  %v1495_v60 = vld [vmem:[#allocation7 + $0x2270] sm:$0xff]  ;;  %v1126_v61 = vld [vmem:[#allocation7 + $0x16e8] sm:$0xff] }
 0x1e1   :  { %2684 = vmatpush.msrb.mxu3 %v1333_v2  ;;  %2623 = vmatpush.msra.mxu0 %v829_v4  ;;  %v1675_v62 = vld [vmem:[#allocation7 + $0x2810] sm:$0xff]  ;;  %v1270_v2 = vld [vmem:[#allocation7 + $0x1b68] sm:$0xff] }
 0x1e2   :  { %2624 = vmatmul.f32.vlgmr.msra.gmra.mxu0 %v4311_v27  ;;  %2642 = vmatpush.msrb.mxu1 %v1009_v7  ;;  %v1486_v4 = vld [vmem:[#allocation7 + $0x2228] sm:$0xff]  ;;  %v1117_v7 = vld [vmem:[#allocation7 + $0x16a0] sm:$0xff] }
 0x1e3   :  { %2662 = vmatpush.msra.mxu2 %v1180_v11  ;;  %2685 = vmatpush.msrb.mxu3 %v1324_v12  ;;  %v1666_v11 = vld [vmem:[#allocation7 + $0x27c8] sm:$0xff]  ;;  %v1261_v12 = vld [vmem:[#allocation7 + $0x1b20] sm:$0xff] }
 0x1e4   :  { %2700 = vmatpush.msrb.mxu0 %v1540_v14  ;;  %2643 = vmatpush.msrb.mxu1 %v1000_v16  ;;  %v4444_v14 = vpop.f32.mrf.mxu3  ;;  %v1477_v16 = vld [vmem:[#allocation7 + $0x21e0] sm:$0xff] }
 0x1e5   :  { %2663 = vmatpush.msra.mxu2 %v1171_v17  ;;  %2686 = vmatpush.msrb.mxu3 %v1315_v18  ;;  %v1657_v17 = vld [vmem:[#allocation7 + $0x2780] sm:$0xff]  ;;  %v4446_v18 = vpop.f32.mrf.mxu1 }
 0x1e6   :  { %2701 = vmatpush.msrb.mxu0 %v1531_v19  ;;  %2644 = vmatpush.msrb.mxu1 %v991_v15  ;;  %4883 = vst [vmem:[#allocation23_spill] sm:$0xff] %v4446_v18  ;;  %v533_v19 = vld [vmem:[#allocation7 + $0x460] sm:$0xff]  ;;  %v947_v18 = vld [vmem:[#allocation7 + $0x1150] sm:$0xff] }
 0x1e7   :  { %2664 = vmatpush.msra.mxu2 %v1162_v22  ;;  %2687 = vmatpush.msrb.mxu3 %v1306_v24  ;;  %v677_v15 = vld [vmem:[#allocation7 + $0x8e0] sm:$0xff]  ;;  %v4448_v22 = vpop.f32.mrf.mxu0  ;;  %v1468_v24 = vld [vmem:[#allocation7 + $0x2198] sm:$0xff] }
 0x1e8   :  { %2702 = vmatpush.msrb.mxu0 %v1522_v25  ;;  %2645 = vmatpush.msrb.mxu1 %v982_v29  ;;  %v4451_v25 = vpop.f32.mrf.mxu2  ;;  %v1648_v29 = vld [vmem:[#allocation7 + $0x2738] sm:$0xff] }
 0x1e9   :  { %2665 = vmatpush.msra.mxu2 %v1153_v34  ;;  %2688 = vmatpush.msrb.mxu3 %v1297_v35  ;;  %v524_v34 = vld [vmem:[#allocation7 + $0x418] sm:$0xff] }
 0x1ea   :  { %2703 = vmatpush.msrb.mxu0 %v1513_v30  ;;  %2646 = vmatpush.msrb.mxu1 %v973_v40  ;;  %v668_v35 = vld [vmem:[#allocation7 + $0x898] sm:$0xff]  ;;  %v1459_v30 = vld [vmem:[#allocation7 + $0x2150] sm:$0xff] }
 0x1eb   :  { %2627 = vmatmul.f32.gmra.mxu0 %v4321_v47  ;;  %2666 = vmatpush.msra.mxu2 %v1144_v42  ;;  %v1639_v40 = vld [vmem:[#allocation7 + $0x26f0] sm:$0xff] }
 0x1ec   :  { %2689 = vmatpush.msrb.mxu3 %v1288_v45  ;;  %2704 = vmatpush.msrb.mxu0 %v1504_v46  ;;  %v515_v42 = vld [vmem:[#allocation7 + $0x3d0] sm:$0xff]  ;;  %v1450_v46 = vld [vmem:[#allocation7 + $0x2108] sm:$0xff] }
 0x1ed   :  { %2647 = vmatmul.f32.vlgmr.msrb.gmra.mxu1 %v4315_v31  ;;  %2667 = vmatpush.msra.mxu2 %v1135_v51  ;;  %v659_v45 = vld [vmem:[#allocation7 + $0x850] sm:$0xff]  ;;  %v1630_v51 = vld [vmem:[#allocation7 + $0x26a8] sm:$0xff] }
 0x1ee   :  { %2723 = vmatpush.msra.mxu1 %v1684_v53  ;;  %2690 = vmatpush.msrb.mxu3 %v1279_v58  ;;  %v506_v53 = vld [vmem:[#allocation7 + $0x388] sm:$0xff] }
 0x1ef   :  { %2705 = vmatpush.msrb.mxu0 %v1495_v60  ;;  %2668 = vmatpush.msra.mxu2 %v1126_v61  ;;  %v650_v58 = vld [vmem:[#allocation7 + $0x808] sm:$0xff]  ;;  %v1441_v60 = vld [vmem:[#allocation7 + $0x20c0] sm:$0xff]  ;;  %v4455_v61 = vpop.f32.mrf.mxu3 }
 0x1f0   :  { %2724 = vmatpush.msra.mxu1 %v1675_v62  ;;  %2691 = vmatpush.msrb.mxu3 %v1270_v2  ;;  %v4457_v62 = vpop.f32.mrf.mxu1  ;;  %v1621_v2 = vld [vmem:[#allocation7 + $0x2660] sm:$0xff] }
 0x1f1   :  { %2706 = vmatpush.msrb.mxu0 %v1486_v4  ;;  %2669 = vmatpush.msra.mxu2 %v1117_v7  ;;  %v497_v4 = vld [vmem:[#allocation7 + $0x340] sm:$0xff]  ;;  %v4459_v7 = vpop.f32.mrf.mxu2 }
 0x1f2   :  { %2725 = vmatpush.msra.mxu1 %v1666_v11  ;;  %2692 = vmatpush.msrb.mxu3 %v1261_v12  ;;  %v641_v11 = vld [vmem:[#allocation7 + $0x7c0] sm:$0xff]  ;;  %v1432_v12 = vld [vmem:[#allocation7 + $0x2078] sm:$0xff] }
 0x1f3   :  { %2707 = vmatpush.msrb.mxu0 %v1477_v16  ;;  %2670 = vmatmul.f32.vlgmr.msra.gmra.mxu2 %v4309_v23  ;;  %v4461_v16 = vpop.f32.mrf.mxu0 }
 0x1f4   :  { %2693 = vmatmul.f32.vlgmr.msrb.gmra.mxu3 %v4313_v28  ;;  %2726 = vmatpush.msra.mxu1 %v1657_v17  ;;  %v1612_v17 = vld [vmem:[#allocation7 + $0x2618] sm:$0xff] }
 0x1f5   :  { %2746 = vmatpush.msrb.mxu2 %v533_v19  ;;  %2769 = vmatpush.msra.mxu3 %v677_v15  ;;  %v488_v19 = vld [vmem:[#allocation7 + $0x2f8] sm:$0xff] }
 0x1f6   :  { %2708 = vmatpush.msrb.mxu0 %v1468_v24  ;;  %2650 = vmatmul.f32.gmra.mxu1 %v4327_v59  ;;  %v632_v15 = vld [vmem:[#allocation7 + $0x778] sm:$0xff]  ;;  %v1423_v24 = vld [vmem:[#allocation7 + $0x2030] sm:$0xff] }
 0x1f7   :  { %2727 = vmatpush.msra.mxu1 %v1648_v29  ;;  %2747 = vmatpush.msrb.mxu2 %v524_v34  ;;  %v1603_v29 = vld [vmem:[#allocation7 + $0x25d0] sm:$0xff] }
 0x1f8   :  { %2770 = vmatpush.msra.mxu3 %v668_v35  ;;  %2709 = vmatpush.msrb.mxu0 %v1459_v30  ;;  %v479_v34 = vld [vmem:[#allocation7 + $0x2b0] sm:$0xff]  ;;  %v1414_v30 = vld [vmem:[#allocation7 + $0x1fe8] sm:$0xff] }
 0x1f9   :  { %2728 = vmatpush.msra.mxu1 %v1639_v40  ;;  %2748 = vmatpush.msrb.mxu2 %v515_v42  ;;  %v623_v35 = vld [vmem:[#allocation7 + $0x730] sm:$0xff]  ;;  %v1594_v40 = vld [vmem:[#allocation7 + $0x2588] sm:$0xff] }
 0x1fa   :  { %2771 = vmatpush.msra.mxu3 %v659_v45  ;;  %2710 = vmatpush.msrb.mxu0 %v1450_v46  ;;  %v470_v42 = vld [vmem:[#allocation7 + $0x268] sm:$0xff]  ;;  %v4465_v45 = vpop.f32.mrf.mxu3 }
 0x1fb   :  { %2729 = vmatpush.msra.mxu1 %v1630_v51  ;;  %2749 = vmatpush.msrb.mxu2 %v506_v53  ;;  %v614_v46 = vld [vmem:[#allocation7 + $0x6e8] sm:$0xff]  ;;  %v1405_v51 = vld [vmem:[#allocation7 + $0x1fa0] sm:$0xff] }
 0x1fc   :  { %2772 = vmatpush.msra.mxu3 %v650_v58  ;;  %2711 = vmatpush.msrb.mxu0 %v1441_v60  ;;  %v1585_v53 = vld [vmem:[#allocation7 + $0x2540] sm:$0xff]  ;;  %v4467_v58 = vpop.f32.mrf.mxu1 }
 0x1fd   :  { %2673 = vmatmul.f32.gmra.mxu2 %v4323_v49  ;;  %2696 = vmatmul.f32.gmra.mxu3 %v4325_v52  ;;  %4884 = vst [vmem:[#allocation24_spill] sm:$0xff] %v4467_v58  ;;  %v461_v60 = vld [vmem:[#allocation7 + $0x220] sm:$0xff]  ;;  %v1011_v58 = vld [vmem:[#allocation7 + $0x1350] sm:$0xff] }
 0x1fe   :  { %2730 = vmatpush.msra.mxu1 %v1621_v2  ;;  %2750 = vmatpush.msrb.mxu2 %v497_v4  ;;  %v605_v2 = vld [vmem:[#allocation7 + $0x6a0] sm:$0xff]  ;;  %v4469_v4 = vpop.f32.mrf.mxu0 }
 0x1ff   :  { %2773 = vmatpush.msra.mxu3 %v641_v11  ;;  %2712 = vmatpush.msrb.mxu0 %v1432_v12  ;;  %4885 = vst [vmem:[#allocation25_spill] sm:$0xff] %v4469_v4  ;;  %v821_v11 = vld [vmem:[#allocation7 + $0xd60] sm:$0xff]  ;;  %v1576_v12 = vld [vmem:[#allocation7 + $0x24f8] sm:$0xff] }
 0x200   :  { %2731 = vmatpush.msra.mxu1 %v1612_v17  ;;  %2751 = vmatpush.msrb.mxu2 %v488_v19  ;;  %v4471_v17 = vpop.f32.mrf.mxu2  ;;  %v452_v19 = vld [vmem:[#allocation7 + $0x1d8] sm:$0xff] }
 0x201   :  { %2774 = vmatpush.msra.mxu3 %v632_v15  ;;  %2713 = vmatpush.msrb.mxu0 %v1423_v24  ;;  %4886 = vst [vmem:[#allocation26_spill] sm:$0xff] %v4471_v17  ;;  %v596_v15 = vld [vmem:[#allocation7 + $0x658] sm:$0xff] }
 0x202   :  { %2732 = vmatpush.msra.mxu1 %v1603_v29  ;;  %2752 = vmatpush.msrb.mxu2 %v479_v34  ;;  %v812_v24 = vld [vmem:[#allocation7 + $0xd18] sm:$0xff]  ;;  %v1567_v29 = vld [vmem:[#allocation7 + $0x24b0] sm:$0xff] }
 0x203   :  { %2775 = vmatpush.msra.mxu3 %v623_v35  ;;  %2714 = vmatpush.msrb.mxu0 %v1414_v30  ;;  %v443_v34 = vld [vmem:[#allocation7 + $0x190] sm:$0xff] }
 0x204   :  { %2733 = vmatpush.msra.mxu1 %v1594_v40  ;;  %2753 = vmatpush.msrb.mxu2 %v470_v42  ;;  %v587_v35 = vld [vmem:[#allocation7 + $0x610] sm:$0xff]  ;;  %v1558_v40 = vld [vmem:[#allocation7 + $0x2468] sm:$0xff] }
 0x205   :  { %2776 = vmatpush.msra.mxu3 %v614_v46  ;;  %2715 = vmatpush.msrb.mxu0 %v1405_v51  ;;  %v803_v30 = vld [vmem:[#allocation7 + $0xcd0] sm:$0xff]  ;;  %v434_v42 = vld [vmem:[#allocation7 + $0x148] sm:$0xff] }
 0x206   :  { %2716 = vmatmul.f32.vlgmr.msrb.gmra.mxu0 %v4333_v13  ;;  %2734 = vmatpush.msra.mxu1 %v1585_v53  ;;  %v578_v46 = vld [vmem:[#allocation7 + $0x5c8] sm:$0xff]  ;;  %v1549_v53 = vld [vmem:[#allocation7 + $0x2420] sm:$0xff] }
 0x207   :  { %2754 = vmatpush.msrb.mxu2 %v461_v60  ;;  %2777 = vmatpush.msra.mxu3 %v605_v2  ;;  %v794_v51 = vld [vmem:[#allocation7 + $0xc88] sm:$0xff]  ;;  %v4474_v60 = vpop.f32.mrf.mxu3  ;;  %v4476_v2 = vpop.f32.mrf.mxu1 }
 0x208   :  { %2792 = vmatpush.msra.mxu0 %v821_v11  ;;  %2735 = vmatpush.msra.mxu1 %v1576_v12  ;;  %4887 = vst [vmem:[#allocation27_spill] sm:$0xff] %v4474_v60  ;;  %v425_v11 = vld [vmem:[#allocation7 + $0x100] sm:$0xff]  ;;  %v1082_v60 = vld [vmem:[#allocation7 + $0x1588] sm:$0xff] }
 0x209   :  { %2755 = vmatpush.msrb.mxu2 %v452_v19  ;;  %2778 = vmatpush.msra.mxu3 %v596_v15  ;;  %4888 = vst [vmem:[#allocation28_spill] sm:$0xff] %v4476_v2  ;;  %v569_v12 = vld [vmem:[#allocation7 + $0x580] sm:$0xff]  ;;  %v4478_v15 = vpop.f32.mrf.mxu2 }
 0x20a   :  { %2793 = vmatpush.msra.mxu0 %v812_v24  ;;  %2736 = vmatpush.msra.mxu1 %v1567_v29  ;;  %v785_v19 = vld [vmem:[#allocation7 + $0xc40] sm:$0xff]  ;;  %4889 = vst [vmem:[#allocation29_spill] sm:$0xff] %v4478_v15  ;;  %v416_v24 = vld [vmem:[#allocation7 + $0xb8] sm:$0xff]  ;;  %v4480_v29 = vpop.f32.mrf.mxu0  ;;  %v903_v15 = vld [vmem:[#allocation7 + $0xff0] sm:$0xff] }
 0x20b   :  { %2756 = vmatpush.msrb.mxu2 %v443_v34  ;;  %2779 = vmatpush.msra.mxu3 %v587_v35  ;;  %4890 = vst [vmem:[#allocation30_spill] sm:$0xff] %v4480_v29  ;;  %v965_v34 = vld [vmem:[#allocation7 + $0x11e0] sm:$0xff]  ;;  %v560_v35 = vld [vmem:[#allocation7 + $0x538] sm:$0xff]  ;;  %v542_v29 = vld [vmem:[#allocation7 + $0x4a8] sm:$0xff] }
 0x20c   :  { %2794 = vmatpush.msra.mxu0 %v803_v30  ;;  %2737 = vmatpush.msra.mxu1 %v1558_v40  ;;  %v776_v30 = vld [vmem:[#allocation7 + $0xbf8] sm:$0xff]  ;;  %v407_v40 = vld [vmem:[#allocation7 + $0x70] sm:$0xff] }
 0x20d   :  { %2757 = vmatpush.msrb.mxu2 %v434_v42  ;;  %2780 = vmatpush.msra.mxu3 %v578_v46  ;;  %v956_v42 = vld [vmem:[#allocation7 + $0x1198] sm:$0xff]  ;;  %v551_v46 = vld [vmem:[#allocation7 + $0x4f0] sm:$0xff] }
 0x20e   :  { %2795 = vmatpush.msra.mxu0 %v794_v51  ;;  %2738 = vmatpush.msra.mxu1 %v1549_v53  ;;  %v767_v51 = vld [vmem:[#allocation7 + $0xbb0] sm:$0xff]  ;;  %v398_v53 = vld [vmem:[#allocation7 + $0x28] sm:$0xff] }
 0x20f   :  { %2719 = vmatmul.f32.gmra.mxu0 %v4341_v37  ;;  %2758 = vmatpush.msrb.mxu2 %v425_v11  ;;  %v4484_v11 = vpop.f32.mrf.mxu3  ;;  %v4486_v43 = vpop.f32.mrf.mxu1 }
 0x210   :  { %2781 = vmatpush.msra.mxu3 %v569_v12  ;;  %2796 = vmatpush.msra.mxu0 %v785_v19  ;;  %4891 = vst [vmem:[#allocation31_spill] sm:$0xff] %v4484_v11  ;;  %v758_v12 = vld [vmem:[#allocation7 + $0xb68] sm:$0xff] }
 0x211   :  { %2739 = vmatmul.f32.vlgmr.msra.gmra.mxu1 %v4335_v21  ;;  %2759 = vmatpush.msrb.mxu2 %v416_v24  ;;  %v938_v19 = vld [vmem:[#allocation7 + $0x1108] sm:$0xff]  ;;  %4892 = vst [vmem:[#allocation32_spill] sm:$0xff] %v4486_v43  ;;  %v1109_v24 = vld [vmem:[#allocation7 + $0x1660] sm:$0xff]  ;;  %v731_v43 = vld [vmem:[#allocation7 + $0xa90] sm:$0xff] }
 0x212   :  { %2815 = vmatpush.msrb.mxu1 %v965_v34  ;;  %2782 = vmatpush.msra.mxu3 %v560_v35  ;;  %v1253_v34 = vld [vmem:[#allocation7 + $0x1ae0] sm:$0xff]  ;;  %v4488_v35 = vpop.f32.mrf.mxu0  ;;  %v714_v11 = vld [vmem:[#allocation7 + $0xa08] sm:$0xff] }
 0x213   :  { %2797 = vmatpush.msra.mxu0 %v776_v30  ;;  %2760 = vmatpush.msrb.mxu2 %v407_v40  ;;  %4893 = vst [vmem:[#allocation33_spill] sm:$0xff] %v4488_v35  ;;  %v749_v30 = vld [vmem:[#allocation7 + $0xb20] sm:$0xff]  ;;  %v4491_v40 = vpop.f32.mrf.mxu2 }
 0x214   :  { %2816 = vmatpush.msrb.mxu1 %v956_v42  ;;  %2783 = vmatpush.msra.mxu3 %v551_v46  ;;  %4894 = vst [vmem:[#allocation34_spill] sm:$0xff] %v4491_v40  ;;  %v929_v42 = vld [vmem:[#allocation7 + $0x10c0] sm:$0xff]  ;;  %v1100_v46 = vld [vmem:[#allocation7 + $0x1618] sm:$0xff]  ;;  %v911_v40 = vld [vmem:[#allocation7 + $0x1030] sm:$0xff] }
 0x215   :  { %2798 = vmatpush.msra.mxu0 %v767_v51  ;;  %2761 = vmatpush.msrb.mxu2 %v398_v53  ;;  %v1244_v51 = vld [vmem:[#allocation7 + $0x1a98] sm:$0xff]  ;;  %v1091_v53 = vld [vmem:[#allocation7 + $0x15d0] sm:$0xff] }
 0x216   :  { %2817 = vmatpush.msrb.mxu1 %v947_v18  ;;  %2784 = vmatpush.msra.mxu3 %v542_v29  ;;  %v740_v18 = vld [vmem:[#allocation7 + $0xad8] sm:$0xff] }
 0x217   :  { %2799 = vmatpush.msra.mxu0 %v758_v12  ;;  %2762 = vmatmul.f32.vlgmr.msrb.gmra.mxu2 %v4291_v48  ;;  %v920_v29 = vld [vmem:[#allocation7 + $0x1078] sm:$0xff]  ;;  %v1235_v12 = vld [vmem:[#allocation7 + $0x1a50] sm:$0xff]  ;;  %v4497_v32 = vpop.f32.mrf.mxu1 }
 0x218   :  { %2785 = vmatmul.f32.vlgmr.msra.gmra.mxu3 %v4294_v54  ;;  %2818 = vmatpush.msrb.mxu1 %v938_v19  ;;  %v1226_v19 = vld [vmem:[#allocation7 + $0x1a08] sm:$0xff]  ;;  %4896 = vst [vmem:[#allocation36_spill] sm:$0xff] %v4497_v32 }
 0x219   :  { %2838 = vmatpush.msra.mxu2 %v1109_v24  ;;  %2861 = vmatpush.msrb.mxu3 %v1253_v34  ;;  %v722_v24 = vld [vmem:[#allocation7 + $0xa48] sm:$0xff]  ;;  %v4495_v34 = vpop.f32.mrf.mxu3 }
 0x21a   :  { %2800 = vmatpush.msra.mxu0 %v749_v30  ;;  %2742 = vmatmul.f32.gmra.mxu1 %v4343_v44  ;;  %4895 = vst [vmem:[#allocation35_spill] sm:$0xff] %v4495_v34  ;;  %v902_v30 = vld [vmem:[#allocation7 + $0xfe8] sm:$0xff]  ;;  %v1064_v34 = vld [vmem:[#allocation7 + $0x14f8] sm:$0xff] }
 0x21b   :  { %2819 = vmatpush.msrb.mxu1 %v929_v42  ;;  %2839 = vmatpush.msra.mxu2 %v1100_v46  ;;  %v1073_v42 = vld [vmem:[#allocation7 + $0x1540] sm:$0xff]  ;;  %v4499_v46 = vpop.f32.mrf.mxu2 }
 0x21c   :  { %2862 = vmatpush.msrb.mxu3 %v1244_v51  ;;  %2801 = vmatpush.msra.mxu0 %v740_v18  ;;  %4897 = vst [vmem:[#allocation37_spill] sm:$0xff] %v4499_v46  ;;  %v1217_v51 = vld [vmem:[#allocation7 + $0x19c0] sm:$0xff]  ;;  %v1046_v46 = vld [vmem:[#allocation7 + $0x1468] sm:$0xff] }
 0x21d   :  { %2820 = vmatpush.msrb.mxu1 %v920_v29  ;;  %2840 = vmatpush.msra.mxu2 %v1091_v53  ;;  %v713_v18 = vld [vmem:[#allocation7 + $0xa00] sm:$0xff]  ;;  %v4501_v29 = vpop.f32.mrf.mxu0 }
 0x21e   :  { %2863 = vmatpush.msrb.mxu3 %v1235_v12  ;;  %2802 = vmatpush.msra.mxu0 %v731_v43  ;;  %4898 = vst [vmem:[#allocation38_spill] sm:$0xff] %v4501_v29  ;;  %v893_v53 = vld [vmem:[#allocation7 + $0xfa0] sm:$0xff]  ;;  %v1208_v43 = vld [vmem:[#allocation7 + $0x1978] sm:$0xff]  ;;  %v1055_v12 = vld [vmem:[#allocation7 + $0x14b0] sm:$0xff] }
 0x21f   :  { %2821 = vmatpush.msrb.mxu1 %v911_v40  ;;  %2841 = vmatpush.msra.mxu2 %v1082_v60  ;;  %v704_v60 = vld [vmem:[#allocation7 + $0x9b8] sm:$0xff]  ;;  %v875_v29 = vld [vmem:[#allocation7 + $0xf10] sm:$0xff] }
 0x220   :  { %2864 = vmatpush.msrb.mxu3 %v1226_v19  ;;  %2803 = vmatpush.msra.mxu0 %v722_v24  ;;  %v884_v40 = vld [vmem:[#allocation7 + $0xf58] sm:$0xff]  ;;  %v1199_v19 = vld [vmem:[#allocation7 + $0x1930] sm:$0xff] }
 0x221   :  { %2765 = vmatmul.f32.gmra.mxu2 %v4300_v1  ;;  %2788 = vmatmul.f32.gmra.mxu3 %v4303_v8  ;;  %v695_v24 = vld [vmem:[#allocation7 + $0x970] sm:$0xff]  ;;  %v4505_v32 = vpop.f32.mrf.mxu3 }
 0x222   :  { %2822 = vmatpush.msrb.mxu1 %v902_v30  ;;  %2842 = vmatpush.msra.mxu2 %v1073_v42  ;;  %4899 = vst [vmem:[#allocation39_spill] sm:$0xff] %v4505_v32  ;;  %v1190_v30 = vld [vmem:[#allocation7 + $0x18e8] sm:$0xff] }
 0x223   :  { %2865 = vmatpush.msrb.mxu3 %v1217_v51  ;;  %2804 = vmatpush.msra.mxu0 %v713_v18  ;;  %v686_v42 = vld [vmem:[#allocation7 + $0x928] sm:$0xff]  ;;  %v4507_v18 = vpop.f32.mrf.mxu1  ;;  %v4511_v32 = vpop.f32.mrf.mxu2 }
 0x224   :  { %2823 = vmatpush.msrb.mxu1 %v893_v53  ;;  %2843 = vmatpush.msra.mxu2 %v1064_v34  ;;  %v866_v51 = vld [vmem:[#allocation7 + $0xec8] sm:$0xff]  ;;  %4900 = vst [vmem:[#allocation40_spill] sm:$0xff] %v4507_v18  ;;  %v1037_v34 = vld [vmem:[#allocation7 + $0x1420] sm:$0xff] }
 0x225   :  { %2866 = vmatpush.msrb.mxu3 %v1208_v43  ;;  %2805 = vmatpush.msra.mxu0 %v704_v60  ;;  %v1181_v53 = vld [vmem:[#allocation7 + $0x18a0] sm:$0xff]  ;;  %v4509_v35 = vpop.f32.mrf.mxu0  ;;  %4902 = vst [vmem:[#allocation42_spill] sm:$0xff] %v4511_v32  ;;  %v1010_v32 = vld [vmem:[#allocation7 + $0x1348] sm:$0xff] }
 0x226   :  { %2824 = vmatpush.msrb.mxu1 %v884_v40  ;;  %2844 = vmatpush.msra.mxu2 %v1055_v12  ;;  %4901 = vst [vmem:[#allocation41_spill] sm:$0xff] %v4509_v35  ;;  %v1397_v43 = vld [vmem:[#allocation7 + $0x1f60] sm:$0xff]  ;;  %v1028_v40 = vld [vmem:[#allocation7 + $0x13d8] sm:$0xff]  ;;  %v1154_v18 = vld [vmem:[#allocation7 + $0x17c8] sm:$0xff] }
 0x227   :  { %2867 = vmatpush.msrb.mxu3 %v1199_v19  ;;  %2806 = vmatpush.msra.mxu0 %v695_v24  ;;  %v857_v60 = vld [vmem:[#allocation7 + $0xe80] sm:$0xff]  ;;  %v1172_v12 = vld [vmem:[#allocation7 + $0x1858] sm:$0xff]  ;;  %v1163_v24 = vld [vmem:[#allocation7 + $0x1810] sm:$0xff] }
 0x228   :  { %2825 = vmatpush.msrb.mxu1 %v875_v29  ;;  %2845 = vmatpush.msra.mxu2 %v1046_v46  ;;  %v1388_v19 = vld [vmem:[#allocation7 + $0x1f18] sm:$0xff]  ;;  %v1019_v46 = vld [vmem:[#allocation7 + $0x1390] sm:$0xff]  ;;  %v830_v35 = vld [vmem:[#allocation7 + $0xda8] sm:$0xff] }
 0x229   :  { %2868 = vmatpush.msrb.mxu3 %v1190_v30  ;;  %2807 = vmatpush.msra.mxu0 %v686_v42  ;;  %v848_v29 = vld [vmem:[#allocation7 + $0xe38] sm:$0xff]  ;;  %v1379_v30 = vld [vmem:[#allocation7 + $0x1ed0] sm:$0xff] }
 0x22a   :  { %2808 = vmatmul.f32.vlgmr.msra.gmra.mxu0 %v4296_v55  ;;  %2826 = vmatpush.msrb.mxu1 %v866_v51  ;;  %v839_v42 = vld [vmem:[#allocation7 + $0xdf0] sm:$0xff]  ;;  %v1370_v51 = vld [vmem:[#allocation7 + $0x1e88] sm:$0xff] }
 0x22b   :  { %2846 = vmatpush.msra.mxu2 %v1037_v34  ;;  %2869 = vmatpush.msrb.mxu3 %v1181_v53  ;;  %v4514_v34 = vpop.f32.mrf.mxu3  ;;  %v4516_v53 = vpop.f32.mrf.mxu1 }
 0x22c   :  { %2884 = vmatpush.msrb.mxu0 %v1397_v43  ;;  %2827 = vmatpush.msrb.mxu1 %v857_v60  ;;  %4903 = vst [vmem:[#allocation43_spill] sm:$0xff] %v4514_v34  ;;  %v1001_v43 = vld [vmem:[#allocation7 + $0x1300] sm:$0xff]  ;;  %v1118_v34 = vld [vmem:[#allocation7 + $0x16a8] sm:$0xff] }
 0x22d   :  { %2847 = vmatpush.msra.mxu2 %v1028_v40  ;;  %2870 = vmatpush.msrb.mxu3 %v1172_v12  ;;  %4904 = vst [vmem:[#allocation44_spill] sm:$0xff] %v4516_v53  ;;  %v1145_v60 = vld [vmem:[#allocation7 + $0x1780] sm:$0xff]  ;;  %v4518_v12 = vpop.f32.mrf.mxu2 }
 0x22e   :  { %2885 = vmatpush.msrb.mxu0 %v1388_v19  ;;  %2828 = vmatpush.msrb.mxu1 %v848_v29  ;;  %v1361_v40 = vld [vmem:[#allocation7 + $0x1e40] sm:$0xff]  ;;  %4905 = vst [vmem:[#allocation45_spill] sm:$0xff] %v4518_v12  ;;  %v992_v19 = vld [vmem:[#allocation7 + $0x12b8] sm:$0xff]  ;;  %v4520_v29 = vpop.f32.mrf.mxu0 }
 0x22f   :  { %2848 = vmatpush.msra.mxu2 %v1019_v46  ;;  %2871 = vmatpush.msrb.mxu3 %v1163_v24  ;;  %4906 = vst [vmem:[#allocation46_spill] sm:$0xff] %v4520_v29  ;;  %v1541_v46 = vld [vmem:[#allocation7 + $0x23e0] sm:$0xff]  ;;  %v1136_v24 = vld [vmem:[#allocation7 + $0x1738] sm:$0xff]  ;;  %v1523_v29 = vld [vmem:[#allocation7 + $0x2350] sm:$0xff] }
 0x230   :  { %2886 = vmatpush.msrb.mxu0 %v1379_v30  ;;  %2829 = vmatpush.msrb.mxu1 %v839_v42  ;;  %v1352_v30 = vld [vmem:[#allocation7 + $0x1df8] sm:$0xff]  ;;  %v983_v42 = vld [vmem:[#allocation7 + $0x1270] sm:$0xff] }
 0x231   :  { %2849 = vmatpush.msra.mxu2 %v1010_v32  ;;  %2872 = vmatpush.msrb.mxu3 %v1154_v18  ;;  %v1532_v32 = vld [vmem:[#allocation7 + $0x2398] sm:$0xff]  ;;  %v1127_v18 = vld [vmem:[#allocation7 + $0x16f0] sm:$0xff] }
 0x232   :  { %2887 = vmatpush.msrb.mxu0 %v1370_v51  ;;  %2830 = vmatpush.msrb.mxu1 %v830_v35  ;;  %v1343_v35 = vld [vmem:[#allocation7 + $0x1db0] sm:$0xff]  ;;  %v974_v51 = vld [vmem:[#allocation7 + $0x1228] sm:$0xff] }
 0x233   :  { %2811 = vmatmul.f32.gmra.mxu0 %v4305_v9  ;;  %2850 = vmatpush.msra.mxu2 %v1001_v43  ;;  %v4524_v43 = vpop.f32.mrf.mxu3  ;;  %v4526_v12 = vpop.f32.mrf.mxu1 }
 0x234   :  { %2873 = vmatpush.msrb.mxu3 %v1145_v60  ;;  %2888 = vmatpush.msrb.mxu0 %v1361_v40  ;;  %4907 = vst [vmem:[#allocation47_spill] sm:$0xff] %v4524_v43  ;;  %v1334_v60 = vld [vmem:[#allocation7 + $0x1d68] sm:$0xff] }
 0x235   :  { %2831 = vmatmul.f32.vlgmr.msrb.gmra.mxu1 %v4311_v27  ;;  %2851 = vmatpush.msra.mxu2 %v992_v19  ;;  %v1514_v40 = vld [vmem:[#allocation7 + $0x2308] sm:$0xff]  ;;  %4908 = vst [vmem:[#allocation48_spill] sm:$0xff] %v4526_v12  ;;  %v1685_v19 = vld [vmem:[#allocation7 + $0x2860] sm:$0xff]  ;;  %v1307_v12 = vld [vmem:[#allocation7 + $0x1c90] sm:$0xff] }
 0x236   :  { %2907 = vmatpush.msra.mxu1 %v1541_v46  ;;  %2874 = vmatpush.msrb.mxu3 %v1136_v24  ;;  %v534_v46 = vld [vmem:[#allocation7 + $0x468] sm:$0xff]  ;;  %v4528_v24 = vpop.f32.mrf.mxu0 }
 0x237   :  { %2889 = vmatpush.msrb.mxu0 %v1352_v30  ;;  %2852 = vmatpush.msra.mxu2 %v983_v42  ;;  %4909 = vst [vmem:[#allocation49_spill] sm:$0xff] %v4528_v24  ;;  %v1325_v30 = vld [vmem:[#allocation7 + $0x1d20] sm:$0xff]  ;;  %v4531_v42 = vpop.f32.mrf.mxu2  ;;  %v1658_v43 = vld [vmem:[#allocation7 + $0x2788] sm:$0xff] }
 0x238   :  { %2908 = vmatpush.msra.mxu1 %v1532_v32  ;;  %2875 = vmatpush.msrb.mxu3 %v1127_v18  ;;  %4910 = vst [vmem:[#allocation50_spill] sm:$0xff] %v4531_v42  ;;  %v1505_v32 = vld [vmem:[#allocation7 + $0x22c0] sm:$0xff]  ;;  %v1676_v18 = vld [vmem:[#allocation7 + $0x2818] sm:$0xff]  ;;  %v1487_v42 = vld [vmem:[#allocation7 + $0x2230] sm:$0xff] }
 0x239   :  { %2890 = vmatpush.msrb.mxu0 %v1343_v35  ;;  %2853 = vmatpush.msra.mxu2 %v974_v51  ;;  %v525_v35 = vld [vmem:[#allocation7 + $0x420] sm:$0xff]  ;;  %v1667_v51 = vld [vmem:[#allocation7 + $0x27d0] sm:$0xff] }
 0x23a   :  { %2909 = vmatpush.msra.mxu1 %v1523_v29  ;;  %2876 = vmatpush.msrb.mxu3 %v1118_v34  ;;  %v1316_v29 = vld [vmem:[#allocation7 + $0x1cd8] sm:$0xff] }
 0x23b   :  { %2891 = vmatpush.msrb.mxu0 %v1334_v60  ;;  %2854 = vmatmul.f32.vlgmr.msra.gmra.mxu2 %v4315_v31  ;;  %v1496_v34 = vld [vmem:[#allocation7 + $0x2278] sm:$0xff]  ;;  %v4537_v53 = vpop.f32.mrf.mxu1 }
 0x23c   :  { %2877 = vmatmul.f32.vlgmr.msrb.gmra.mxu3 %v4309_v23  ;;  %2910 = vmatpush.msra.mxu1 %v1514_v40  ;;  %v516_v60 = vld [vmem:[#allocation7 + $0x3d8] sm:$0xff]  ;;  %v507_v40 = vld [vmem:[#allocation7 + $0x390] sm:$0xff]  ;;  %4912 = vst [vmem:[#allocation52_spill] sm:$0xff] %v4537_v53 }
 0x23d   :  { %2930 = vmatpush.msrb.mxu2 %v1685_v19  ;;  %2953 = vmatpush.msra.mxu3 %v534_v46  ;;  %v1298_v19 = vld [vmem:[#allocation7 + $0x1c48] sm:$0xff]  ;;  %v4535_v46 = vpop.f32.mrf.mxu3 }
 0x23e   :  { %2892 = vmatpush.msrb.mxu0 %v1325_v30  ;;  %2834 = vmatmul.f32.gmra.mxu1 %v4321_v47  ;;  %4911 = vst [vmem:[#allocation51_spill] sm:$0xff] %v4535_v46  ;;  %v1478_v30 = vld [vmem:[#allocation7 + $0x21e8] sm:$0xff]  ;;  %v1640_v46 = vld [vmem:[#allocation7 + $0x26f8] sm:$0xff] }
 0x23f   :  { %2911 = vmatpush.msra.mxu1 %v1505_v32  ;;  %2931 = vmatpush.msrb.mxu2 %v1676_v18  ;;  %v1649_v32 = vld [vmem:[#allocation7 + $0x2740] sm:$0xff]  ;;  %v4539_v18 = vpop.f32.mrf.mxu2 }
 0x240   :  { %2954 = vmatpush.msra.mxu3 %v525_v35  ;;  %2893 = vmatpush.msrb.mxu0 %v1316_v29  ;;  %4913 = vst [vmem:[#allocation53_spill] sm:$0xff] %v4539_v18  ;;  %v498_v35 = vld [vmem:[#allocation7 + $0x348] sm:$0xff]  ;;  %v1289_v29 = vld [vmem:[#allocation7 + $0x1c00] sm:$0xff] }
 0x241   :  { %2912 = vmatpush.msra.mxu1 %v1496_v34  ;;  %2932 = vmatpush.msrb.mxu2 %v1667_v51  ;;  %v4541_v34 = vpop.f32.mrf.mxu0  ;;  %v1469_v51 = vld [vmem:[#allocation7 + $0x21a0] sm:$0xff]  ;;  %v1622_v18 = vld [vmem:[#allocation7 + $0x2668] sm:$0xff] }
 0x242   :  { %2955 = vmatpush.msra.mxu3 %v516_v60  ;;  %2894 = vmatpush.msrb.mxu0 %v1307_v12  ;;  %4914 = vst [vmem:[#allocation54_spill] sm:$0xff] %v4541_v34  ;;  %v489_v12 = vld [vmem:[#allocation7 + $0x300] sm:$0xff]  ;;  %v1631_v60 = vld [vmem:[#allocation7 + $0x26b0] sm:$0xff] }
 0x243   :  { %2913 = vmatpush.msra.mxu1 %v1487_v42  ;;  %2933 = vmatpush.msrb.mxu2 %v1658_v43  ;;  %v1280_v43 = vld [vmem:[#allocation7 + $0x1bb8] sm:$0xff]  ;;  %v1451_v34 = vld [vmem:[#allocation7 + $0x2110] sm:$0xff] }
 0x244   :  { %2956 = vmatpush.msra.mxu3 %v507_v40  ;;  %2895 = vmatpush.msrb.mxu0 %v1298_v19  ;;  %v1460_v42 = vld [vmem:[#allocation7 + $0x2158] sm:$0xff]  ;;  %v1271_v19 = vld [vmem:[#allocation7 + $0x1b70] sm:$0xff] }
 0x245   :  { %2857 = vmatmul.f32.gmra.mxu2 %v4327_v59  ;;  %2880 = vmatmul.f32.gmra.mxu3 %v4323_v49  ;;  %v480_v40 = vld [vmem:[#allocation7 + $0x2b8] sm:$0xff]  ;;  %v4545_v53 = vpop.f32.mrf.mxu3 }
 0x246   :  { %2914 = vmatpush.msra.mxu1 %v1478_v30  ;;  %2934 = vmatpush.msrb.mxu2 %v1649_v32  ;;  %4915 = vst [vmem:[#allocation55_spill] sm:$0xff] %v4545_v53  ;;  %v471_v30 = vld [vmem:[#allocation7 + $0x270] sm:$0xff]  ;;  %v1262_v32 = vld [vmem:[#allocation7 + $0x1b28] sm:$0xff] }
 0x247   :  { %2957 = vmatpush.msra.mxu3 %v498_v35  ;;  %2896 = vmatpush.msrb.mxu0 %v1289_v29  ;;  %v1442_v35 = vld [vmem:[#allocation7 + $0x20c8] sm:$0xff]  ;;  %v4547_v29 = vpop.f32.mrf.mxu1  ;;  %v4551_v53 = vpop.f32.mrf.mxu2 }
 0x248   :  { %2915 = vmatpush.msra.mxu1 %v1469_v51  ;;  %2935 = vmatpush.msrb.mxu2 %v1640_v46  ;;  %4916 = vst [vmem:[#allocation56_spill] sm:$0xff] %v4547_v29  ;;  %v1613_v46 = vld [vmem:[#allocation7 + $0x2620] sm:$0xff]  ;;  %v462_v51 = vld [vmem:[#allocation7 + $0x228] sm:$0xff] }
 0x249   :  { %2958 = vmatpush.msra.mxu3 %v489_v12  ;;  %2897 = vmatpush.msrb.mxu0 %v1280_v43  ;;  %v4549_v24 = vpop.f32.mrf.mxu0  ;;  %v678_v12 = vld [vmem:[#allocation7 + $0x8e8] sm:$0xff]  ;;  %v1433_v43 = vld [vmem:[#allocation7 + $0x2080] sm:$0xff]  ;;  %4918 = vst [vmem:[#allocation58_spill] sm:$0xff] %v4551_v53 }
 0x24a   :  { %2916 = vmatpush.msra.mxu1 %v1460_v42  ;;  %2936 = vmatpush.msrb.mxu2 %v1631_v60  ;;  %4917 = vst [vmem:[#allocation57_spill] sm:$0xff] %v4549_v24  ;;  %v1604_v42 = vld [vmem:[#allocation7 + $0x25d8] sm:$0xff]  ;;  %v453_v60 = vld [vmem:[#allocation7 + $0x1e0] sm:$0xff]  ;;  %v1586_v53 = vld [vmem:[#allocation7 + $0x2548] sm:$0xff] }
 0x24b   :  { %2959 = vmatpush.msra.mxu3 %v480_v40  ;;  %2898 = vmatpush.msrb.mxu0 %v1271_v19  ;;  %v669_v40 = vld [vmem:[#allocation7 + $0x8a0] sm:$0xff]  ;;  %v444_v19 = vld [vmem:[#allocation7 + $0x198] sm:$0xff]  ;;  %v435_v24 = vld [vmem:[#allocation7 + $0x150] sm:$0xff] }
 0x24c   :  { %2917 = vmatpush.msra.mxu1 %v1451_v34  ;;  %2937 = vmatpush.msrb.mxu2 %v1622_v18  ;;  %v1424_v34 = vld [vmem:[#allocation7 + $0x2038] sm:$0xff]  ;;  %v1595_v18 = vld [vmem:[#allocation7 + $0x2590] sm:$0xff]  ;;  %v1406_v29 = vld [vmem:[#allocation7 + $0x1fa8] sm:$0xff] }
 0x24d   :  { %2960 = vmatpush.msra.mxu3 %v471_v30  ;;  %2899 = vmatpush.msrb.mxu0 %v1262_v32  ;;  %v660_v30 = vld [vmem:[#allocation7 + $0x858] sm:$0xff]  ;;  %v1415_v32 = vld [vmem:[#allocation7 + $0x1ff0] sm:$0xff] }
 0x24e   :  { %2900 = vmatmul.f32.vlgmr.msrb.gmra.mxu0 %v4313_v28  ;;  %2918 = vmatpush.msra.mxu1 %v1442_v35  ;;  %v651_v35 = vld [vmem:[#allocation7 + $0x810] sm:$0xff] }
 0x24f   :  { %2938 = vmatpush.msrb.mxu2 %v1613_v46  ;;  %2961 = vmatpush.msra.mxu3 %v462_v51  ;;  %v4554_v46 = vpop.f32.mrf.mxu3  ;;  %v4556_v51 = vpop.f32.mrf.mxu1 }
 0x250   :  { %2976 = vmatpush.msra.mxu0 %v678_v12  ;;  %2919 = vmatpush.msra.mxu1 %v1433_v43  ;;  %4919 = vst [vmem:[#allocation59_spill] sm:$0xff] %v4554_v46  ;;  %v1577_v12 = vld [vmem:[#allocation7 + $0x2500] sm:$0xff]  ;;  %v426_v43 = vld [vmem:[#allocation7 + $0x108] sm:$0xff]  ;;  %v399_v46 = vld [vmem:[#allocation7 + $0x30] sm:$0xff] }
 0x251   :  { %2939 = vmatpush.msrb.mxu2 %v1604_v42  ;;  %2962 = vmatpush.msra.mxu3 %v453_v60  ;;  %4920 = vst [vmem:[#allocation60_spill] sm:$0xff] %v4556_v51  ;;  %v642_v42 = vld [vmem:[#allocation7 + $0x7c8] sm:$0xff]  ;;  %v4558_v60 = vpop.f32.mrf.mxu2 }
 0x252   :  { %2977 = vmatpush.msra.mxu0 %v669_v40  ;;  %2920 = vmatpush.msra.mxu1 %v1424_v34  ;;  %4921 = vst [vmem:[#allocation61_spill] sm:$0xff] %v4558_v60  ;;  %v1568_v40 = vld [vmem:[#allocation7 + $0x24b8] sm:$0xff]  ;;  %v4560_v34 = vpop.f32.mrf.mxu0 }
 0x253   :  { %2940 = vmatpush.msrb.mxu2 %v1595_v18  ;;  %2963 = vmatpush.msra.mxu3 %v444_v19  ;;  %4922 = vst [vmem:[#allocation62_spill] sm:$0xff] %v4560_v34  ;;  %v822_v18 = vld [vmem:[#allocation7 + $0xd68] sm:$0xff]  ;;  %v417_v19 = vld [vmem:[#allocation7 + $0xc0] sm:$0xff]  ;;  %v804_v34 = vld [vmem:[#allocation7 + $0xcd8] sm:$0xff] }
 0x254   :  { %2978 = vmatpush.msra.mxu0 %v660_v30  ;;  %2921 = vmatpush.msra.mxu1 %v1415_v32  ;;  %v633_v30 = vld [vmem:[#allocation7 + $0x780] sm:$0xff]  ;;  %v1559_v32 = vld [vmem:[#allocation7 + $0x2470] sm:$0xff] }
 0x255   :  { %2941 = vmatpush.msrb.mxu2 %v1586_v53  ;;  %2964 = vmatpush.msra.mxu3 %v435_v24  ;;  %v813_v53 = vld [vmem:[#allocation7 + $0xd20] sm:$0xff]  ;;  %v408_v24 = vld [vmem:[#allocation7 + $0x78] sm:$0xff] }
 0x256   :  { %2979 = vmatpush.msra.mxu0 %v651_v35  ;;  %2922 = vmatpush.msra.mxu1 %v1406_v29  ;;  %v624_v29 = vld [vmem:[#allocation7 + $0x738] sm:$0xff]  ;;  %v1550_v35 = vld [vmem:[#allocation7 + $0x2428] sm:$0xff] }
 0x257   :  { %2903 = vmatmul.f32.gmra.mxu0 %v4325_v52  ;;  %2942 = vmatpush.msrb.mxu2 %v1577_v12  ;;  %v4564_v12 = vpop.f32.mrf.mxu3  ;;  %v4566_v60 = vpop.f32.mrf.mxu1 }
 0x258   :  { %2965 = vmatpush.msra.mxu3 %v426_v43  ;;  %2980 = vmatpush.msra.mxu0 %v642_v42  ;;  %4923 = vst [vmem:[#allocation63_spill] sm:$0xff] %v4564_v12  ;;  %v615_v43 = vld [vmem:[#allocation7 + $0x6f0] sm:$0xff] }
 0x259   :  { %2923 = vmatmul.f32.vlgmr.msra.gmra.mxu1 %v4333_v13  ;;  %2943 = vmatpush.msrb.mxu2 %v1568_v40  ;;  %v795_v42 = vld [vmem:[#allocation7 + $0xc90] sm:$0xff]  ;;  %4924 = vst [vmem:[#allocation64_spill] sm:$0xff] %v4566_v60  ;;  %v966_v40 = vld [vmem:[#allocation7 + $0x11e8] sm:$0xff] }
 0x25a   :  { %2999 = vmatpush.msrb.mxu1 %v822_v18  ;;  %2966 = vmatpush.msra.mxu3 %v417_v19  ;;  %v1110_v18 = vld [vmem:[#allocation7 + $0x1668] sm:$0xff]  ;;  %v4568_v19 = vpop.f32.mrf.mxu0  ;;  %v939_v60 = vld [vmem:[#allocation7 + $0x1110] sm:$0xff] }
 0x25b   :  { %2981 = vmatpush.msra.mxu0 %v633_v30  ;;  %2944 = vmatpush.msrb.mxu2 %v1559_v32  ;;  %4925 = vst [vmem:[#allocation65_spill] sm:$0xff] %v4568_v19  ;;  %v606_v30 = vld [vmem:[#allocation7 + $0x6a8] sm:$0xff]  ;;  %v4571_v32 = vpop.f32.mrf.mxu2  ;;  %v588_v19 = vld [vmem:[#allocation7 + $0x618] sm:$0xff] }
 0x25c   :  { %3000 = vmatpush.msrb.mxu1 %v813_v53  ;;  %2967 = vmatpush.msra.mxu3 %v408_v24  ;;  %4926 = vst [vmem:[#allocation66_spill] sm:$0xff] %v4571_v32  ;;  %v786_v53 = vld [vmem:[#allocation7 + $0xc48] sm:$0xff]  ;;  %v957_v24 = vld [vmem:[#allocation7 + $0x11a0] sm:$0xff]  ;;  %v768_v32 = vld [vmem:[#allocation7 + $0xbb8] sm:$0xff] }
 0x25d   :  { %2982 = vmatpush.msra.mxu0 %v624_v29  ;;  %2945 = vmatpush.msrb.mxu2 %v1550_v35  ;;  %v1101_v29 = vld [vmem:[#allocation7 + $0x1620] sm:$0xff]  ;;  %v948_v35 = vld [vmem:[#allocation7 + $0x1158] sm:$0xff] }
 0x25e   :  { %3001 = vmatpush.msrb.mxu1 %v804_v34  ;;  %2968 = vmatpush.msra.mxu3 %v399_v46  ;;  %v597_v34 = vld [vmem:[#allocation7 + $0x660] sm:$0xff] }
 0x25f   :  { %2983 = vmatpush.msra.mxu0 %v615_v43  ;;  %2946 = vmatmul.f32.vlgmr.msrb.gmra.mxu2 %v4335_v21  ;;  %v777_v46 = vld [vmem:[#allocation7 + $0xc00] sm:$0xff]  ;;  %v1092_v43 = vld [vmem:[#allocation7 + $0x15d8] sm:$0xff]  ;;  %v2556_v12 = vpop.f32.mrf.mxu1 }
 0x260   :  { %2969 = vmatmul.f32.vlgmr.msra.gmra.mxu3 %v4291_v48  ;;  %3002 = vmatpush.msrb.mxu1 %v795_v42  ;;  %v1083_v42 = vld [vmem:[#allocation7 + $0x1590] sm:$0xff] }
 0x261   :  { %3022 = vmatpush.msra.mxu2 %v966_v40  ;;  %3045 = vmatpush.msrb.mxu3 %v1110_v18  ;;  %v579_v40 = vld [vmem:[#allocation7 + $0x5d0] sm:$0xff]  ;;  %v4575_v18 = vpop.f32.mrf.mxu3 }
 0x262   :  { %2984 = vmatpush.msra.mxu0 %v606_v30  ;;  %2926 = vmatmul.f32.gmra.mxu1 %v4341_v37  ;;  %4927 = vst [vmem:[#allocation67_spill] sm:$0xff] %v4575_v18  ;;  %v759_v30 = vld [vmem:[#allocation7 + $0xb70] sm:$0xff]  ;;  %v4577_v51 = vpop.f32.mrf.mxu0  ;;  %v4581_v18 = vld [vmem:[#allocation8] sm:$0xff] }
 0x263   :  { %3003 = vmatpush.msrb.mxu1 %v786_v53  ;;  %3023 = vmatpush.msra.mxu2 %v957_v24  ;;  %v930_v53 = vld [vmem:[#allocation7 + $0x10c8] sm:$0xff]  ;;  %v2579_v24 = vpop.f32.mrf.mxu2  ;;  %4928 = vst [vmem:[#allocation68_spill] sm:$0xff] %v4577_v51  ;;  %v732_v51 = vld [vmem:[#allocation7 + $0xa98] sm:$0xff]  ;;  %v1697_v17 = vperm.slane %v4581_v18, 4 }
 0x264   :  { %3046 = vmatpush.msrb.mxu3 %v1101_v29  ;;  %2985 = vmatpush.msra.mxu0 %v597_v34  ;;  %v1074_v29 = vld [vmem:[#allocation7 + $0x1548] sm:$0xff] }
 0x265   :  { %3004 = vmatpush.msrb.mxu1 %v777_v46  ;;  %3024 = vmatpush.msra.mxu2 %v948_v35  ;;  %v570_v34 = vld [vmem:[#allocation7 + $0x588] sm:$0xff]  ;;  %v921_v35 = vld [vmem:[#allocation7 + $0x1080] sm:$0xff]  ;;  %v2557_v2 = vadd.f32 %v2556_v12, %v1697_v17  ;;  %v867_v12 = vld [vmem:[#allocation7 + $0xed0] sm:$0xff] }
 0x266   :  { %3047 = vmatpush.msrb.mxu3 %v1092_v43  ;;  %2986 = vmatpush.msra.mxu0 %v588_v19  ;;  %v750_v46 = vld [vmem:[#allocation7 + $0xb28] sm:$0xff]  ;;  %v1065_v19 = vld [vmem:[#allocation7 + $0x1500] sm:$0xff]  ;;  %v912_v43 = vld [vmem:[#allocation7 + $0x1038] sm:$0xff] }
 0x267   :  { %3005 = vmatpush.msrb.mxu1 %v768_v32  ;;  %3025 = vmatpush.msra.mxu2 %v939_v60  ;;  %v561_v32 = vld [vmem:[#allocation7 + $0x540] sm:$0xff] }
 0x268   :  { %3048 = vmatpush.msrb.mxu3 %v1083_v42  ;;  %2987 = vmatpush.msra.mxu0 %v579_v40  ;;  %v741_v60 = vld [vmem:[#allocation7 + $0xae0] sm:$0xff]  ;;  %v1056_v42 = vld [vmem:[#allocation7 + $0x14b8] sm:$0xff] }
 0x269   :  { %2949 = vmatmul.f32.gmra.mxu2 %v4343_v44  ;;  %2972 = vmatmul.f32.gmra.mxu3 %v4300_v1  ;;  %v552_v40 = vld [vmem:[#allocation7 + $0x4f8] sm:$0xff] }
 0x26a   :  { %3006 = vmatpush.msrb.mxu1 %v759_v30  ;;  %3026 = vmatpush.msra.mxu2 %v930_v53  ;;  %v2602_v30 = vpop.f32.mrf.mxu3  ;;  %v1047_v53 = vld [vmem:[#allocation7 + $0x1470] sm:$0xff] }
 0x26b   :  { %3049 = vmatpush.msrb.mxu3 %v1074_v29  ;;  %2988 = vmatpush.msra.mxu0 %v570_v34  ;;  %v543_v29 = vld [vmem:[#allocation7 + $0x4b0] sm:$0xff]  ;;  %v2582_v18 = vpop.f32.mrf.mxu2 }
 0x26c   :  { %3007 = vmatpush.msrb.mxu1 %v750_v46  ;;  %3027 = vmatpush.msra.mxu2 %v921_v35  ;;  %v723_v34 = vld [vmem:[#allocation7 + $0xa50] sm:$0xff]  ;;  %v2559_v46 = vpop.f32.mrf.mxu1  ;;  %v894_v35 = vld [vmem:[#allocation7 + $0xfa8] sm:$0xff] }
 0x26d   :  { %3050 = vmatpush.msrb.mxu3 %v1065_v19  ;;  %2989 = vmatpush.msra.mxu0 %v561_v32  ;;  %v1254_v19 = vld [vmem:[#allocation7 + $0x1ae8] sm:$0xff]  ;;  %v2625_v32 = vpop.f32.mrf.mxu0 }
 0x26e   :  { %3008 = vmatpush.msrb.mxu1 %v741_v60  ;;  %3028 = vmatpush.msra.mxu2 %v912_v43  ;;  %v885_v60 = vld [vmem:[#allocation7 + $0xf60] sm:$0xff] }
 0x26f   :  { %3051 = vmatpush.msrb.mxu3 %v1056_v42  ;;  %2990 = vmatpush.msra.mxu0 %v552_v40  ;;  %v1029_v43 = vld [vmem:[#allocation7 + $0x13e0] sm:$0xff] }
 0x270   :  { %3009 = vmatpush.msrb.mxu1 %v732_v51  ;;  %3029 = vmatpush.msra.mxu2 %v903_v15  ;;  %v1245_v42 = vld [vmem:[#allocation7 + $0x1aa0] sm:$0xff]  ;;  %v2580_v51 = vadd.f32 %v2579_v24, %v2557_v2  ;;  %v876_v15 = vld [vmem:[#allocation7 + $0xf18] sm:$0xff]  ;;  %v858_v2 = vld [vmem:[#allocation7 + $0xe88] sm:$0xff] }
 0x271   :  { %3052 = vmatpush.msrb.mxu3 %v1047_v53  ;;  %2991 = vmatpush.msra.mxu0 %v543_v29  ;;  %v705_v40 = vld [vmem:[#allocation7 + $0x9c0] sm:$0xff]  ;;  %v1020_v53 = vld [vmem:[#allocation7 + $0x1398] sm:$0xff]  ;;  %v1002_v24 = vld [vmem:[#allocation7 + $0x1308] sm:$0xff] }
 0x272   :  { %2992 = vmatmul.f32.vlgmr.msra.gmra.mxu0 %v4294_v54  ;;  %3010 = vmatpush.msrb.mxu1 %v723_v34  ;;  %v1236_v29 = vld [vmem:[#allocation7 + $0x1a58] sm:$0xff]  ;;  %v1227_v34 = vld [vmem:[#allocation7 + $0x1a10] sm:$0xff]  ;;  %v2605_v4 = vpop.f32.mrf.mxu3 }
 0x273   :  { %3030 = vmatpush.msra.mxu2 %v894_v35  ;;  %3053 = vmatpush.msrb.mxu3 %v1038_v41  ;;  %v687_v35 = vld [vmem:[#allocation7 + $0x930] sm:$0xff]  ;;  %v2603_v41 = vadd.f32 %v2602_v30, %v2580_v51  ;;  %v1398_v30 = vld [vmem:[#allocation7 + $0x1f68] sm:$0xff]  ;;  %v993_v51 = vld [vmem:[#allocation7 + $0x12c0] sm:$0xff] }
 0x274   :  { %3068 = vmatpush.msrb.mxu0 %v1254_v19  ;;  %3011 = vmatpush.msrb.mxu1 %v714_v11  ;;  %v2648_v11 = vpop.f32.mrf.mxu1  ;;  %v1218_v19 = vld [vmem:[#allocation7 + $0x19c8] sm:$0xff] }
 0x275   :  { %3031 = vmatpush.msra.mxu2 %v885_v60  ;;  %3054 = vmatpush.msrb.mxu3 %v1029_v43  ;;  %v2626_v60 = vadd.f32 %v2625_v32, %v2603_v41  ;;  %v849_v43 = vld [vmem:[#allocation7 + $0xe40] sm:$0xff]  ;;  %v975_v41 = vld [vmem:[#allocation7 + $0x1230] sm:$0xff] }
 0x276   :  { %3069 = vmatpush.msrb.mxu0 %v1245_v42  ;;  %3012 = vmatpush.msrb.mxu1 %v705_v40  ;;  %v2671_v42 = vpop.f32.mrf.mxu2  ;;  %v2560_v40 = vadd.f32 %v2559_v46, %v1697_v17  ;;  %v1389_v32 = vld [vmem:[#allocation7 + $0x1f20] sm:$0xff]  ;;  %v1200_v17 = vld [vmem:[#allocation7 + $0x1938] sm:$0xff]  ;;  %v831_v46 = vld [vmem:[#allocation7 + $0xdb0] sm:$0xff] }
 0x277   :  { %3032 = vmatpush.msra.mxu2 %v876_v15  ;;  %3055 = vmatpush.msrb.mxu3 %v1020_v53  ;;  %v2628_v15 = vpop.f32.mrf.mxu0  ;;  %v1209_v53 = vld [vmem:[#allocation7 + $0x1980] sm:$0xff] }
 0x278   :  { %3070 = vmatpush.msrb.mxu0 %v1236_v29  ;;  %3013 = vmatpush.msrb.mxu1 %v696_v10  ;;  %v2649_v10 = vadd.f32 %v2648_v11, %v2626_v60  ;;  %v840_v29 = vld [vmem:[#allocation7 + $0xdf8] sm:$0xff]  ;;  %v1686_v60 = vld [vmem:[#allocation7 + $0x2868] sm:$0xff] }
 0x279   :  { %3033 = vmatpush.msra.mxu2 %v867_v12  ;;  %3056 = vmatpush.msrb.mxu3 %v1011_v58  ;;  %v2583_v58 = vadd.f32 %v2582_v18, %v2560_v40  ;;  %v984_v12 = vld [vmem:[#allocation7 + $0x1278] sm:$0xff]  ;;  %v1371_v18 = vld [vmem:[#allocation7 + $0x1e90] sm:$0xff] }
 0x27a   :  { %3071 = vmatpush.msrb.mxu0 %v1227_v34  ;;  %3014 = vmatpush.msrb.mxu1 %v687_v35  ;;  %v2672_v34 = vadd.f32 %v2671_v42, %v2649_v10  ;;  %v1380_v35 = vld [vmem:[#allocation7 + $0x1ed8] sm:$0xff]  ;;  %v2694_v11 = vpop.f32.mrf.mxu3  ;;  %v1182_v42 = vld [vmem:[#allocation7 + $0x18a8] sm:$0xff] }
 0x27b   :  { %2995 = vmatmul.f32.gmra.mxu0 %v4303_v8  ;;  %3034 = vmatpush.msra.mxu2 %v858_v2  ;;  %v1191_v2 = vld [vmem:[#allocation7 + $0x18f0] sm:$0xff]  ;;  %v1362_v10 = vld [vmem:[#allocation7 + $0x1e48] sm:$0xff] }
 0x27c   :  { %3057 = vmatpush.msrb.mxu3 %v1002_v24  ;;  %3072 = vmatpush.msrb.mxu0 %v1218_v19  ;;  %v2606_v24 = vadd.f32 %v2605_v4, %v2583_v58  ;;  %v1542_v19 = vld [vmem:[#allocation7 + $0x23e8] sm:$0xff]  ;;  %v2695_v40 = vadd.f32 %v2694_v11, %v2672_v34  ;;  %v1533_v4 = vld [vmem:[#allocation7 + $0x23a0] sm:$0xff]  ;;  %v1164_v34 = vld [vmem:[#allocation7 + $0x1818] sm:$0xff] }
 0x27d   :  { %3015 = vmatmul.f32.vlgmr.msrb.gmra.mxu1 %v4296_v55  ;;  %3035 = vmatpush.msra.mxu2 %v849_v43  ;;  %v2651_v43 = vpop.f32.mrf.mxu1  ;;  %v1677_v58 = vld [vmem:[#allocation7 + $0x2820] sm:$0xff]  ;;  %v1659_v11 = vld [vmem:[#allocation7 + $0x2790] sm:$0xff] }
 0x27e   :  { %3091 = vmatpush.msra.mxu1 %v1398_v30  ;;  %3058 = vmatpush.msrb.mxu3 %v993_v51  ;;  %v2629_v30 = vadd.f32 %v2628_v15, %v2606_v24  ;;  %v1353_v15 = vld [vmem:[#allocation7 + $0x1e00] sm:$0xff]  ;;  %v1155_v24 = vld [vmem:[#allocation7 + $0x17d0] sm:$0xff] }
 0x27f   :  { %3073 = vmatpush.msrb.mxu0 %v1209_v53  ;;  %3036 = vmatpush.msra.mxu2 %v840_v29 }
 0x280   :  { %3092 = vmatpush.msra.mxu1 %v1389_v32  ;;  %3059 = vmatpush.msrb.mxu3 %v984_v12  ;;  %v2674_v53 = vpop.f32.mrf.mxu2  ;;  %v2652_v32 = vadd.f32 %v2651_v43, %v2629_v30  ;;  %v1173_v12 = vld [vmem:[#allocation7 + $0x1860] sm:$0xff]  ;;  %v1146_v30 = vld [vmem:[#allocation7 + $0x1788] sm:$0xff] }
 0x281   :  { %3074 = vmatpush.msrb.mxu0 %v1200_v17  ;;  %3037 = vmatpush.msra.mxu2 %v831_v46  ;;  %v1524_v17 = vld [vmem:[#allocation7 + $0x2358] sm:$0xff] }
 0x282   :  { %3093 = vmatpush.msra.mxu1 %v1380_v35  ;;  %3060 = vmatpush.msrb.mxu3 %v975_v41  ;;  %v1668_v46 = vld [vmem:[#allocation7 + $0x27d8] sm:$0xff]  ;;  %v2675_v35 = vadd.f32 %v2674_v53, %v2652_v32  ;;  %v1641_v53 = vld [vmem:[#allocation7 + $0x2700] sm:$0xff] }
 0x283   :  { %3075 = vmatpush.msrb.mxu0 %v1191_v2  ;;  %3038 = vmatmul.f32.vlgmr.msra.gmra.mxu2 %v4311_v27  ;;  %v2717_v51 = vpop.f32.mrf.mxu0  ;;  %v1344_v41 = vld [vmem:[#allocation7 + $0x1db8] sm:$0xff]  ;;  %v1515_v2 = vld [vmem:[#allocation7 + $0x2310] sm:$0xff] }
 0x284   :  { %3061 = vmatmul.f32.vlgmr.msrb.gmra.mxu3 %v4315_v31  ;;  %3094 = vmatpush.msra.mxu1 %v1371_v18  ;;  %v2718_v29 = vadd.f32 %v2717_v51, %v2695_v40  ;;  %v2697_v18 = vpop.f32.mrf.mxu3  ;;  %v1650_v40 = vld [vmem:[#allocation7 + $0x2748] sm:$0xff] }
 0x285   :  { %3114 = vmatpush.msrb.mxu2 %v1542_v19  ;;  %3137 = vmatpush.msra.mxu3 %v1686_v60  ;;  %v1335_v19 = vld [vmem:[#allocation7 + $0x1d70] sm:$0xff]  ;;  %v1506_v60 = vld [vmem:[#allocation7 + $0x22c8] sm:$0xff]  ;;  %v2698_v43 = vadd.f32 %v2697_v18, %v2675_v35  ;;  %v1308_v35 = vld [vmem:[#allocation7 + $0x1c98] sm:$0xff] }
 0x286   :  { %3076 = vmatpush.msrb.mxu0 %v1182_v42  ;;  %3018 = vmatmul.f32.gmra.mxu1 %v4305_v9  ;;  %v1326_v51 = vld [vmem:[#allocation7 + $0x1d28] sm:$0xff] }
 0x287   :  { %3095 = vmatpush.msra.mxu1 %v1362_v10  ;;  %3115 = vmatpush.msrb.mxu2 %v1533_v4  ;;  %v1497_v10 = vld [vmem:[#allocation7 + $0x2280] sm:$0xff]  ;;  %v1470_v18 = vld [vmem:[#allocation7 + $0x21a8] sm:$0xff] }
 0x288   :  { %3138 = vmatpush.msra.mxu3 %v1677_v58  ;;  %3077 = vmatpush.msrb.mxu0 %v1173_v12  ;;  %v1137_v58 = vld [vmem:[#allocation7 + $0x1740] sm:$0xff] }
 0x289   :  { %3096 = vmatpush.msra.mxu1 %v1353_v15  ;;  %3116 = vmatpush.msrb.mxu2 %v1524_v17  ;;  %v1317_v12 = vld [vmem:[#allocation7 + $0x1ce0] sm:$0xff]  ;;  %v1488_v15 = vld [vmem:[#allocation7 + $0x2238] sm:$0xff] }
 0x28a   :  { %3139 = vmatpush.msra.mxu3 %v1668_v46  ;;  %3078 = vmatpush.msrb.mxu0 %v1164_v34  ;;  %v1632_v46 = vld [vmem:[#allocation7 + $0x26b8] sm:$0xff] }
 0x28b   :  { %3097 = vmatpush.msra.mxu1 %v1344_v41  ;;  %3117 = vmatpush.msrb.mxu2 %v1515_v2  ;;  %v1128_v34 = vld [vmem:[#allocation7 + $0x16f8] sm:$0xff]  ;;  %v1479_v41 = vld [vmem:[#allocation7 + $0x21f0] sm:$0xff] }
 0x28c   :  { %3140 = vmatpush.msra.mxu3 %v1659_v11  ;;  %3079 = vmatpush.msrb.mxu0 %v1155_v24  ;;  %v2720_v42 = vpop.f32.mrf.mxu0  ;;  %v1623_v2 = vld [vmem:[#allocation7 + $0x2670] sm:$0xff] }
 0x28d   :  { %3041 = vmatmul.f32.gmra.mxu2 %v4321_v47  ;;  %3064 = vmatmul.f32.gmra.mxu3 %v4327_v59  ;;  %v2721_v4 = vadd.f32 %v2720_v42, %v2698_v43  ;;  %v1119_v11 = vld [vmem:[#allocation7 + $0x16b0] sm:$0xff]  ;;  %v1461_v43 = vld [vmem:[#allocation7 + $0x2160] sm:$0xff] }
 0x28e   :  { %3098 = vmatpush.msra.mxu1 %v1335_v19  ;;  %3118 = vmatpush.msrb.mxu2 %v1506_v60  ;;  %v2740_v32 = vpop.f32.mrf.mxu1  ;;  %v1299_v24 = vld [vmem:[#allocation7 + $0x1c50] sm:$0xff]  ;;  %v1290_v60 = vld [vmem:[#allocation7 + $0x1c08] sm:$0xff]  ;;  %v1281_v42 = vld [vmem:[#allocation7 + $0x1bc0] sm:$0xff] }
 0x28f   :  { %3141 = vmatpush.msra.mxu3 %v1650_v40  ;;  %3080 = vmatpush.msrb.mxu0 %v1146_v30  ;;  %v4592_v17 = vadd.f32 %v2740_v32, %v2718_v29  ;;  %v1614_v29 = vld [vmem:[#allocation7 + $0x2628] sm:$0xff]  ;;  %v535_v19 = vld [vmem:[#allocation7 + $0x470] sm:$0xff]  ;;  %v1605_v40 = vld [vmem:[#allocation7 + $0x25e0] sm:$0xff] }
 0x290   :  { %3099 = vmatpush.msra.mxu1 %v1326_v51  ;;  %3119 = vmatpush.msrb.mxu2 %v1497_v10  ;;  %v526_v30 = vld [vmem:[#allocation7 + $0x428] sm:$0xff]  ;;  %v1452_v10 = vld [vmem:[#allocation7 + $0x2118] sm:$0xff]  ;;  %v517_v32 = vld [vmem:[#allocation7 + $0x3e0] sm:$0xff] }
 0x291   :  { %3142 = vmatpush.msra.mxu3 %v1641_v53  ;;  %3081 = vmatpush.msrb.mxu0 %v1137_v58  ;;  %v1596_v53 = vld [vmem:[#allocation7 + $0x2598] sm:$0xff] }
 0x292   :  { %3100 = vmatpush.msra.mxu1 %v1317_v12  ;;  %3120 = vmatpush.msrb.mxu2 %v1488_v15  ;;  %v1272_v12 = vld [vmem:[#allocation7 + $0x1b78] sm:$0xff]  ;;  %v1443_v15 = vld [vmem:[#allocation7 + $0x20d0] sm:$0xff] }
 0x293   :  { %3143 = vmatpush.msra.mxu3 %v1632_v46  ;;  %3082 = vmatpush.msrb.mxu0 %v1128_v34  ;;  %v1587_v46 = vld [vmem:[#allocation7 + $0x2550] sm:$0xff]  ;;  %v508_v34 = vld [vmem:[#allocation7 + $0x398] sm:$0xff] }
 0x294   :  { %3101 = vmatpush.msra.mxu1 %v1308_v35  ;;  %3121 = vmatpush.msrb.mxu2 %v1479_v41  ;;  %v1263_v35 = vld [vmem:[#allocation7 + $0x1b30] sm:$0xff]  ;;  %v1434_v41 = vld [vmem:[#allocation7 + $0x2088] sm:$0xff] }
 0x295   :  { %3144 = vmatpush.msra.mxu3 %v1623_v2  ;;  %3083 = vmatpush.msrb.mxu0 %v1119_v11  ;;  %v1578_v2 = vld [vmem:[#allocation7 + $0x2508] sm:$0xff]  ;;  %v1425_v11 = vld [vmem:[#allocation7 + $0x2040] sm:$0xff] }
 0x296   :  { %3084 = vmatmul.f32.vlgmr.msrb.gmra.mxu0 %v4309_v23  ;;  %3102 = vmatpush.msra.mxu1 %v1299_v24  ;;  %v679_v24 = vld [vmem:[#allocation7 + $0x8f0] sm:$0xff] }
 0x297   :  { %3122 = vmatpush.msrb.mxu2 %v1470_v18  ;;  %3145 = vmatpush.msra.mxu3 %v1614_v29  ;;  %v2743_v51 = vpop.f32.mrf.mxu1  ;;  %v1569_v18 = vld [vmem:[#allocation7 + $0x24c0] sm:$0xff]  ;;  %v490_v29 = vld [vmem:[#allocation7 + $0x308] sm:$0xff] }
 0x298   :  { %3160 = vmatpush.msra.mxu0 %v535_v19  ;;  %3103 = vmatpush.msra.mxu1 %v1290_v60  ;;  %v4595_v58 = vadd.f32 %v2743_v51, %v2721_v4  ;;  %v499_v4 = vld [vmem:[#allocation7 + $0x350] sm:$0xff]  ;;  %v1416_v19 = vld [vmem:[#allocation7 + $0x1ff8] sm:$0xff]  ;;  %v670_v60 = vld [vmem:[#allocation7 + $0x8a8] sm:$0xff] }
 0x299   :  { %3123 = vmatpush.msrb.mxu2 %v1461_v43  ;;  %3146 = vmatpush.msra.mxu3 %v1605_v40  ;;  %v1560_v43 = vld [vmem:[#allocation7 + $0x2478] sm:$0xff]  ;;  %v481_v40 = vld [vmem:[#allocation7 + $0x2c0] sm:$0xff]  ;;  %v1551_v51 = vld [vmem:[#allocation7 + $0x2430] sm:$0xff] }
 0x29a   :  { %3161 = vmatpush.msra.mxu0 %v526_v30  ;;  %3104 = vmatpush.msra.mxu1 %v1281_v42  ;;  %v1407_v30 = vld [vmem:[#allocation7 + $0x1fb0] sm:$0xff]  ;;  %v661_v42 = vld [vmem:[#allocation7 + $0x860] sm:$0xff] }
 0x29b   :  { %3124 = vmatpush.msrb.mxu2 %v1452_v10  ;;  %3147 = vmatpush.msra.mxu3 %v1596_v53  ;;  %v472_v10 = vld [vmem:[#allocation7 + $0x278] sm:$0xff] }
 0x29c   :  { %3162 = vmatpush.msra.mxu0 %v517_v32  ;;  %3105 = vmatpush.msra.mxu1 %v1272_v12  ;;  %v652_v53 = vld [vmem:[#allocation7 + $0x818] sm:$0xff]  ;;  %v823_v32 = vld [vmem:[#allocation7 + $0xd70] sm:$0xff] }
 0x29d   :  { %3125 = vmatpush.msrb.mxu2 %v1443_v15  ;;  %3148 = vmatpush.msra.mxu3 %v1587_v46  ;;  %v967_v12 = vld [vmem:[#allocation7 + $0x11f0] sm:$0xff] }
 0x29e   :  { %3163 = vmatpush.msra.mxu0 %v508_v34  ;;  %3106 = vmatpush.msra.mxu1 %v1263_v35  ;;  %v463_v15 = vld [vmem:[#allocation7 + $0x230] sm:$0xff]  ;;  %v814_v34 = vld [vmem:[#allocation7 + $0xd28] sm:$0xff] }
 0x29f   :  { %3087 = vmatmul.f32.gmra.mxu0 %v4323_v49  ;;  %3126 = vmatpush.msrb.mxu2 %v1434_v41  ;;  %v643_v46 = vld [vmem:[#allocation7 + $0x7d0] sm:$0xff]  ;;  %v958_v35 = vld [vmem:[#allocation7 + $0x11a8] sm:$0xff] }
 0x2a0   :  { %3149 = vmatpush.msra.mxu3 %v1578_v2  ;;  %3164 = vmatpush.msra.mxu0 %v499_v4  ;;  %v454_v41 = vld [vmem:[#allocation7 + $0x1e8] sm:$0xff]  ;;  %v805_v4 = vld [vmem:[#allocation7 + $0xce0] sm:$0xff] }
 0x2a1   :  { %3107 = vmatmul.f32.vlgmr.msra.gmra.mxu1 %v4313_v28  ;;  %3127 = vmatpush.msrb.mxu2 %v1425_v11  ;;  %v634_v2 = vld [vmem:[#allocation7 + $0x788] sm:$0xff]  ;;  %v949_v11 = vld [vmem:[#allocation7 + $0x1160] sm:$0xff] }
 0x2a2   :  { %3183 = vmatpush.msrb.mxu1 %v679_v24  ;;  %3150 = vmatpush.msra.mxu3 %v1569_v18  ;;  %v445_v24 = vld [vmem:[#allocation7 + $0x1a0] sm:$0xff] }
 0x2a3   :  { %3165 = vmatpush.msra.mxu0 %v490_v29  ;;  %3128 = vmatpush.msrb.mxu2 %v1416_v19  ;;  %v625_v18 = vld [vmem:[#allocation7 + $0x740] sm:$0xff]  ;;  %v796_v29 = vld [vmem:[#allocation7 + $0xc98] sm:$0xff] }
 0x2a4   :  { %3184 = vmatpush.msrb.mxu1 %v670_v60  ;;  %3151 = vmatpush.msra.mxu3 %v1560_v43  ;;  %v940_v19 = vld [vmem:[#allocation7 + $0x1118] sm:$0xff] }
 0x2a5   :  { %3166 = vmatpush.msra.mxu0 %v481_v40  ;;  %3129 = vmatpush.msrb.mxu2 %v1407_v30  ;;  %v436_v60 = vld [vmem:[#allocation7 + $0x158] sm:$0xff]  ;;  %v787_v40 = vld [vmem:[#allocation7 + $0xc50] sm:$0xff] }
 0x2a6   :  { %3185 = vmatpush.msrb.mxu1 %v661_v42  ;;  %3152 = vmatpush.msra.mxu3 %v1551_v51  ;;  %v616_v43 = vld [vmem:[#allocation7 + $0x6f8] sm:$0xff]  ;;  %v931_v30 = vld [vmem:[#allocation7 + $0x10d0] sm:$0xff] }
 0x2a7   :  { %3167 = vmatpush.msra.mxu0 %v472_v10  ;;  %3130 = vmatmul.f32.vlgmr.msrb.gmra.mxu2 %v4333_v13  ;;  %v427_v42 = vld [vmem:[#allocation7 + $0x110] sm:$0xff]  ;;  %v778_v10 = vld [vmem:[#allocation7 + $0xc08] sm:$0xff] }
 0x2a8   :  { %3153 = vmatmul.f32.vlgmr.msra.gmra.mxu3 %v4335_v21  ;;  %3186 = vmatpush.msrb.mxu1 %v652_v53  ;;  %v607_v51 = vld [vmem:[#allocation7 + $0x6b0] sm:$0xff]  ;;  %v922_v53 = vld [vmem:[#allocation7 + $0x1088] sm:$0xff] }
 0x2a9   :  { %3206 = vmatpush.msra.mxu2 %v823_v32  ;;  %3229 = vmatpush.msrb.mxu3 %v967_v12  ;;  %v418_v32 = vld [vmem:[#allocation7 + $0xc8] sm:$0xff] }
 0x2aa   :  { %3168 = vmatpush.msra.mxu0 %v463_v15  ;;  %3110 = vmatmul.f32.gmra.mxu1 %v4325_v52  ;;  %v598_v12 = vld [vmem:[#allocation7 + $0x668] sm:$0xff]  ;;  %v769_v15 = vld [vmem:[#allocation7 + $0xbc0] sm:$0xff] }
 0x2ab   :  { %3187 = vmatpush.msrb.mxu1 %v643_v46  ;;  %3207 = vmatpush.msra.mxu2 %v814_v34  ;;  %v913_v46 = vld [vmem:[#allocation7 + $0x1040] sm:$0xff] }
 0x2ac   :  { %3230 = vmatpush.msrb.mxu3 %v958_v35  ;;  %3169 = vmatpush.msra.mxu0 %v454_v41  ;;  %v409_v34 = vld [vmem:[#allocation7 + $0x80] sm:$0xff]  ;;  %v760_v41 = vld [vmem:[#allocation7 + $0xb78] sm:$0xff] }
 0x2ad   :  { %3188 = vmatpush.msrb.mxu1 %v634_v2  ;;  %3208 = vmatpush.msra.mxu2 %v805_v4  ;;  %v589_v35 = vld [vmem:[#allocation7 + $0x620] sm:$0xff]  ;;  %v904_v2 = vld [vmem:[#allocation7 + $0xff8] sm:$0xff] }
 0x2ae   :  { %3231 = vmatpush.msrb.mxu3 %v949_v11  ;;  %3170 = vmatpush.msra.mxu0 %v445_v24  ;;  %v400_v4 = vld [vmem:[#allocation7 + $0x38] sm:$0xff]  ;;  %v751_v24 = vld [vmem:[#allocation7 + $0xb30] sm:$0xff] }
 0x2af   :  { %3189 = vmatpush.msrb.mxu1 %v625_v18  ;;  %3209 = vmatpush.msra.mxu2 %v796_v29  ;;  %v580_v11 = vld [vmem:[#allocation7 + $0x5d8] sm:$0xff]  ;;  %v895_v18 = vld [vmem:[#allocation7 + $0xfb0] sm:$0xff] }
 0x2b0   :  { %3232 = vmatpush.msrb.mxu3 %v940_v19  ;;  %3171 = vmatpush.msra.mxu0 %v436_v60  ;;  %v1111_v29 = vld [vmem:[#allocation7 + $0x1670] sm:$0xff]  ;;  %v742_v60 = vld [vmem:[#allocation7 + $0xae8] sm:$0xff] }
 0x2b1   :  { %3133 = vmatmul.f32.gmra.mxu2 %v4341_v37  ;;  %3156 = vmatmul.f32.gmra.mxu3 %v4343_v44  ;;  %v571_v19 = vld [vmem:[#allocation7 + $0x590] sm:$0xff] }
 0x2b2   :  { %3190 = vmatpush.msrb.mxu1 %v616_v43  ;;  %3210 = vmatpush.msra.mxu2 %v787_v40  ;;  %v886_v43 = vld [vmem:[#allocation7 + $0xf68] sm:$0xff] }
 0x2b3   :  { %3233 = vmatpush.msrb.mxu3 %v931_v30  ;;  %3172 = vmatpush.msra.mxu0 %v427_v42  ;;  %v1102_v40 = vld [vmem:[#allocation7 + $0x1628] sm:$0xff]  ;;  %v733_v42 = vld [vmem:[#allocation7 + $0xaa0] sm:$0xff] }
 0x2b4   :  { %3191 = vmatpush.msrb.mxu1 %v607_v51  ;;  %3211 = vmatpush.msra.mxu2 %v778_v10  ;;  %v562_v30 = vld [vmem:[#allocation7 + $0x548] sm:$0xff]  ;;  %v877_v51 = vld [vmem:[#allocation7 + $0xf20] sm:$0xff] }
 0x2b5   :  { %3234 = vmatpush.msrb.mxu3 %v922_v53  ;;  %3173 = vmatpush.msra.mxu0 %v418_v32  ;;  %v1093_v10 = vld [vmem:[#allocation7 + $0x15e0] sm:$0xff]  ;;  %v724_v32 = vld [vmem:[#allocation7 + $0xa58] sm:$0xff] }
 0x2b6   :  { %3192 = vmatpush.msrb.mxu1 %v598_v12  ;;  %3212 = vmatpush.msra.mxu2 %v769_v15  ;;  %v553_v53 = vld [vmem:[#allocation7 + $0x500] sm:$0xff]  ;;  %v868_v12 = vld [vmem:[#allocation7 + $0xed8] sm:$0xff] }
 0x2b7   :  { %3235 = vmatpush.msrb.mxu3 %v913_v46  ;;  %3174 = vmatpush.msra.mxu0 %v409_v34  ;;  %v1084_v15 = vld [vmem:[#allocation7 + $0x1598] sm:$0xff]  ;;  %v715_v34 = vld [vmem:[#allocation7 + $0xa10] sm:$0xff] }
 0x2b8   :  { %3193 = vmatpush.msrb.mxu1 %v589_v35  ;;  %3213 = vmatpush.msra.mxu2 %v760_v41  ;;  %v544_v46 = vld [vmem:[#allocation7 + $0x4b8] sm:$0xff]  ;;  %v859_v35 = vld [vmem:[#allocation7 + $0xe90] sm:$0xff] }
 0x2b9   :  { %3236 = vmatpush.msrb.mxu3 %v904_v2  ;;  %3175 = vmatpush.msra.mxu0 %v400_v4  ;;  %v1075_v41 = vld [vmem:[#allocation7 + $0x1550] sm:$0xff]  ;;  %v706_v2 = vld [vmem:[#allocation7 + $0x9c8] sm:$0xff] }
 0x2ba   :  { %3176 = vmatmul.f32.vlgmr.msra.gmra.mxu0 %v4291_v48  ;;  %3194 = vmatpush.msrb.mxu1 %v580_v11  ;;  %v1255_v4 = vld [vmem:[#allocation7 + $0x1af0] sm:$0xff]  ;;  %v850_v11 = vld [vmem:[#allocation7 + $0xe48] sm:$0xff] }
 0x2bb   :  { %3214 = vmatpush.msra.mxu2 %v751_v24  ;;  %3237 = vmatpush.msrb.mxu3 %v895_v18  ;;  %v1066_v24 = vld [vmem:[#allocation7 + $0x1508] sm:$0xff]  ;;  %v697_v18 = vld [vmem:[#allocation7 + $0x980] sm:$0xff] }
 0x2bc   :  { %3252 = vmatpush.msrb.mxu0 %v1111_v29  ;;  %3195 = vmatpush.msrb.mxu1 %v571_v19  ;;  %v1246_v29 = vld [vmem:[#allocation7 + $0x1aa8] sm:$0xff]  ;;  %v841_v19 = vld [vmem:[#allocation7 + $0xe00] sm:$0xff] }
 0x2bd   :  { %3215 = vmatpush.msra.mxu2 %v742_v60  ;;  %3238 = vmatpush.msrb.mxu3 %v886_v43  ;;  %v1057_v60 = vld [vmem:[#allocation7 + $0x14c0] sm:$0xff]  ;;  %v688_v43 = vld [vmem:[#allocation7 + $0x938] sm:$0xff] }
 0x2be   :  { %3253 = vmatpush.msrb.mxu0 %v1102_v40  ;;  %3196 = vmatpush.msrb.mxu1 %v562_v30  ;;  %v1237_v40 = vld [vmem:[#allocation7 + $0x1a60] sm:$0xff]  ;;  %v832_v30 = vld [vmem:[#allocation7 + $0xdb8] sm:$0xff] }
 0x2bf   :  { %3216 = vmatpush.msra.mxu2 %v733_v42  ;;  %3239 = vmatpush.msrb.mxu3 %v877_v51  ;;  %v1048_v42 = vld [vmem:[#allocation7 + $0x1478] sm:$0xff] }
 0x2c0   :  { %3254 = vmatpush.msrb.mxu0 %v1093_v10  ;;  %3197 = vmatpush.msrb.mxu1 %v553_v53  ;;  %v1228_v51 = vld [vmem:[#allocation7 + $0x1a18] sm:$0xff]  ;;  %v1399_v10 = vld [vmem:[#allocation7 + $0x1f70] sm:$0xff] }
 0x2c1   :  { %3217 = vmatpush.msra.mxu2 %v724_v32  ;;  %3240 = vmatpush.msrb.mxu3 %v868_v12  ;;  %v1543_v53 = vld [vmem:[#allocation7 + $0x23f0] sm:$0xff] }
 0x2c2   :  { %3255 = vmatpush.msrb.mxu0 %v1084_v15  ;;  %3198 = vmatpush.msrb.mxu1 %v544_v46  ;;  %v1039_v32 = vld [vmem:[#allocation7 + $0x1430] sm:$0xff]  ;;  %v1390_v15 = vld [vmem:[#allocation7 + $0x1f28] sm:$0xff] }
 0x2c3   :  { %3179 = vmatmul.f32.gmra.mxu0 %v4300_v1  ;;  %3218 = vmatpush.msra.mxu2 %v715_v34  ;;  %v1219_v12 = vld [vmem:[#allocation7 + $0x19d0] sm:$0xff]  ;;  %v1534_v46 = vld [vmem:[#allocation7 + $0x23a8] sm:$0xff] }
 0x2c4   :  { %3241 = vmatpush.msrb.mxu3 %v859_v35  ;;  %3256 = vmatpush.msrb.mxu0 %v1075_v41  ;;  %v1030_v34 = vld [vmem:[#allocation7 + $0x13e8] sm:$0xff]  ;;  %v1381_v41 = vld [vmem:[#allocation7 + $0x1ee0] sm:$0xff] }
 0x2c5   :  { %3199 = vmatmul.f32.vlgmr.msrb.gmra.mxu1 %v4294_v54  ;;  %3219 = vmatpush.msra.mxu2 %v706_v2  ;;  %v1210_v35 = vld [vmem:[#allocation7 + $0x1988] sm:$0xff]  ;;  %v1525_v2 = vld [vmem:[#allocation7 + $0x2360] sm:$0xff] }
 0x2c6   :  { %3275 = vmatpush.msra.mxu1 %v1255_v4  ;;  %3242 = vmatpush.msrb.mxu3 %v850_v11  ;;  %v1021_v4 = vld [vmem:[#allocation7 + $0x13a0] sm:$0xff] }
 0x2c7   :  { %3257 = vmatpush.msrb.mxu0 %v1066_v24  ;;  %3220 = vmatpush.msra.mxu2 %v697_v18  ;;  %v1201_v11 = vld [vmem:[#allocation7 + $0x1940] sm:$0xff]  ;;  %v1372_v24 = vld [vmem:[#allocation7 + $0x1e98] sm:$0xff] }
 0x2c8   :  { %3276 = vmatpush.msra.mxu1 %v1246_v29  ;;  %3243 = vmatpush.msrb.mxu3 %v841_v19  ;;  %v1516_v18 = vld [vmem:[#allocation7 + $0x2318] sm:$0xff] }
 0x2c9   :  { %3258 = vmatpush.msrb.mxu0 %v1057_v60  ;;  %3221 = vmatpush.msra.mxu2 %v688_v43  ;;  %v1012_v29 = vld [vmem:[#allocation7 + $0x1358] sm:$0xff]  ;;  %v1363_v60 = vld [vmem:[#allocation7 + $0x1e50] sm:$0xff] }
 0x2ca   :  { %3277 = vmatpush.msra.mxu1 %v1237_v40  ;;  %3244 = vmatpush.msrb.mxu3 %v832_v30  ;;  %v1192_v19 = vld [vmem:[#allocation7 + $0x18f8] sm:$0xff]  ;;  %v1507_v43 = vld [vmem:[#allocation7 + $0x22d0] sm:$0xff] }
 0x2cb   :  { %3259 = vmatpush.msrb.mxu0 %v1048_v42  ;;  %3222 = vmatmul.f32.vlgmr.msra.gmra.mxu2 %v4296_v55  ;;  %v1003_v40 = vld [vmem:[#allocation7 + $0x1310] sm:$0xff]  ;;  %v1354_v42 = vld [vmem:[#allocation7 + $0x1e08] sm:$0xff] }
 0x2cc   :  { %3245 = vmatmul.f32.vlgmr.msrb.gmra.mxu3 %v4311_v27  ;;  %3278 = vmatpush.msra.mxu1 %v1228_v51  ;;  %v1183_v30 = vld [vmem:[#allocation7 + $0x18b0] sm:$0xff]  ;;  %v1498_v51 = vld [vmem:[#allocation7 + $0x2288] sm:$0xff] }
 0x2cd   :  { %3298 = vmatpush.msrb.mxu2 %v1399_v10  ;;  %3321 = vmatpush.msra.mxu3 %v1543_v53  ;;  %v994_v10 = vld [vmem:[#allocation7 + $0x12c8] sm:$0xff] }
 0x2ce   :  { %3260 = vmatpush.msrb.mxu0 %v1039_v32  ;;  %3202 = vmatmul.f32.gmra.mxu1 %v4303_v8  ;;  %v1174_v53 = vld [vmem:[#allocation7 + $0x1868] sm:$0xff]  ;;  %v1345_v32 = vld [vmem:[#allocation7 + $0x1dc0] sm:$0xff] }
 0x2cf   :  { %3279 = vmatpush.msra.mxu1 %v1219_v12  ;;  %3299 = vmatpush.msrb.mxu2 %v1390_v15  ;;  %v1489_v12 = vld [vmem:[#allocation7 + $0x2240] sm:$0xff] }
 0x2d0   :  { %3322 = vmatpush.msra.mxu3 %v1534_v46  ;;  %3261 = vmatpush.msrb.mxu0 %v1030_v34  ;;  %v985_v15 = vld [vmem:[#allocation7 + $0x1280] sm:$0xff]  ;;  %v1336_v34 = vld [vmem:[#allocation7 + $0x1d78] sm:$0xff] }
 0x2d1   :  { %3280 = vmatpush.msra.mxu1 %v1210_v35  ;;  %3300 = vmatpush.msrb.mxu2 %v1381_v41  ;;  %v1165_v46 = vld [vmem:[#allocation7 + $0x1820] sm:$0xff]  ;;  %v1480_v35 = vld [vmem:[#allocation7 + $0x21f8] sm:$0xff] }
 0x2d2   :  { %3323 = vmatpush.msra.mxu3 %v1525_v2  ;;  %3262 = vmatpush.msrb.mxu0 %v1021_v4  ;;  %v976_v41 = vld [vmem:[#allocation7 + $0x1238] sm:$0xff]  ;;  %v1327_v4 = vld [vmem:[#allocation7 + $0x1d30] sm:$0xff] }
 0x2d3   :  { %3281 = vmatpush.msra.mxu1 %v1201_v11  ;;  %3301 = vmatpush.msrb.mxu2 %v1372_v24  ;;  %v1156_v2 = vld [vmem:[#allocation7 + $0x17d8] sm:$0xff]  ;;  %v1471_v11 = vld [vmem:[#allocation7 + $0x21b0] sm:$0xff] }
 0x2d4   :  { %3324 = vmatpush.msra.mxu3 %v1516_v18  ;;  %3263 = vmatpush.msrb.mxu0 %v1012_v29  ;;  %v1687_v24 = vld [vmem:[#allocation7 + $0x2870] sm:$0xff]  ;;  %v1318_v29 = vld [vmem:[#allocation7 + $0x1ce8] sm:$0xff] }
 0x2d5   :  { %3225 = vmatmul.f32.gmra.mxu2 %v4305_v9  ;;  %3248 = vmatmul.f32.gmra.mxu3 %v4321_v47  ;;  %v1147_v18 = vld [vmem:[#allocation7 + $0x1790] sm:$0xff] }
 0x2d6   :  { %3282 = vmatpush.msra.mxu1 %v1192_v19  ;;  %3302 = vmatpush.msrb.mxu2 %v1363_v60  ;;  %v1462_v19 = vld [vmem:[#allocation7 + $0x2168] sm:$0xff] }
 0x2d7   :  { %3325 = vmatpush.msra.mxu3 %v1507_v43  ;;  %3264 = vmatpush.msrb.mxu0 %v1003_v40  ;;  %v1678_v60 = vld [vmem:[#allocation7 + $0x2828] sm:$0xff]  ;;  %v1309_v40 = vld [vmem:[#allocation7 + $0x1ca0] sm:$0xff] }
 0x2d8   :  { %3283 = vmatpush.msra.mxu1 %v1183_v30  ;;  %3303 = vmatpush.msrb.mxu2 %v1354_v42  ;;  %v1138_v43 = vld [vmem:[#allocation7 + $0x1748] sm:$0xff]  ;;  %v1453_v30 = vld [vmem:[#allocation7 + $0x2120] sm:$0xff] }
 0x2d9   :  { %3326 = vmatpush.msra.mxu3 %v1498_v51  ;;  %3265 = vmatpush.msrb.mxu0 %v994_v10  ;;  %v1669_v42 = vld [vmem:[#allocation7 + $0x27e0] sm:$0xff]  ;;  %v1300_v10 = vld [vmem:[#allocation7 + $0x1c58] sm:$0xff] }
 0x2da   :  { %3284 = vmatpush.msra.mxu1 %v1174_v53  ;;  %3304 = vmatpush.msrb.mxu2 %v1345_v32  ;;  %v1129_v51 = vld [vmem:[#allocation7 + $0x1700] sm:$0xff]  ;;  %v1444_v53 = vld [vmem:[#allocation7 + $0x20d8] sm:$0xff] }
 0x2db   :  { %3327 = vmatpush.msra.mxu3 %v1489_v12  ;;  %3266 = vmatpush.msrb.mxu0 %v985_v15  ;;  %v1660_v32 = vld [vmem:[#allocation7 + $0x2798] sm:$0xff]  ;;  %v1291_v15 = vld [vmem:[#allocation7 + $0x1c10] sm:$0xff] }
 0x2dc   :  { %3285 = vmatpush.msra.mxu1 %v1165_v46  ;;  %3305 = vmatpush.msrb.mxu2 %v1336_v34  ;;  %v1120_v12 = vld [vmem:[#allocation7 + $0x16b8] sm:$0xff]  ;;  %v1435_v46 = vld [vmem:[#allocation7 + $0x2090] sm:$0xff] }
 0x2dd   :  { %3328 = vmatpush.msra.mxu3 %v1480_v35  ;;  %3267 = vmatpush.msrb.mxu0 %v976_v41  ;;  %v1651_v34 = vld [vmem:[#allocation7 + $0x2750] sm:$0xff]  ;;  %v1282_v35 = vld [vmem:[#allocation7 + $0x1bc8] sm:$0xff]  ;;  %v536_v41 = vld [vmem:[#allocation7 + $0x478] sm:$0xff] }
 0x2de   :  { %3268 = vmatmul.f32.vlgmr.msrb.gmra.mxu0 %v4315_v31  ;;  %3286 = vmatpush.msra.mxu1 %v1156_v2  ;;  %v1426_v2 = vld [vmem:[#allocation7 + $0x2048] sm:$0xff] }
 0x2df   :  { %3306 = vmatpush.msrb.mxu2 %v1327_v4  ;;  %3329 = vmatpush.msra.mxu3 %v1471_v11  ;;  %v1642_v4 = vld [vmem:[#allocation7 + $0x2708] sm:$0xff]  ;;  %v1273_v11 = vld [vmem:[#allocation7 + $0x1b80] sm:$0xff] }
 0x2e0   :  { %3344 = vmatpush.msra.mxu0 %v1687_v24  ;;  %3287 = vmatpush.msra.mxu1 %v1147_v18  ;;  %v527_v24 = vld [vmem:[#allocation7 + $0x430] sm:$0xff]  ;;  %v1417_v18 = vld [vmem:[#allocation7 + $0x2000] sm:$0xff] }
 0x2e1   :  { %3307 = vmatpush.msrb.mxu2 %v1318_v29  ;;  %3330 = vmatpush.msra.mxu3 %v1462_v19  ;;  %v1633_v29 = vld [vmem:[#allocation7 + $0x26c0] sm:$0xff]  ;;  %v1264_v19 = vld [vmem:[#allocation7 + $0x1b38] sm:$0xff] }
 0x2e2   :  { %3345 = vmatpush.msra.mxu0 %v1678_v60  ;;  %3288 = vmatpush.msra.mxu1 %v1138_v43  ;;  %v518_v60 = vld [vmem:[#allocation7 + $0x3e8] sm:$0xff]  ;;  %v1408_v43 = vld [vmem:[#allocation7 + $0x1fb8] sm:$0xff] }
 0x2e3   :  { %3308 = vmatpush.msrb.mxu2 %v1309_v40  ;;  %3331 = vmatpush.msra.mxu3 %v1453_v30  ;;  %v1624_v40 = vld [vmem:[#allocation7 + $0x2678] sm:$0xff]  ;;  %v509_v30 = vld [vmem:[#allocation7 + $0x3a0] sm:$0xff] }
 0x2e4   :  { %3346 = vmatpush.msra.mxu0 %v1669_v42  ;;  %3289 = vmatpush.msra.mxu1 %v1129_v51  ;;  %v680_v42 = vld [vmem:[#allocation7 + $0x8f8] sm:$0xff] }
 0x2e5   :  { %3309 = vmatpush.msrb.mxu2 %v1300_v10  ;;  %3332 = vmatpush.msra.mxu3 %v1444_v53  ;;  %v824_v51 = vld [vmem:[#allocation7 + $0xd78] sm:$0xff]  ;;  %v1615_v10 = vld [vmem:[#allocation7 + $0x2630] sm:$0xff] }
 0x2e6   :  { %3347 = vmatpush.msra.mxu0 %v1660_v32  ;;  %3290 = vmatpush.msra.mxu1 %v1120_v12  ;;  %v500_v53 = vld [vmem:[#allocation7 + $0x358] sm:$0xff]  ;;  %v671_v32 = vld [vmem:[#allocation7 + $0x8b0] sm:$0xff] }
 0x2e7   :  { %3271 = vmatmul.f32.gmra.mxu0 %v4327_v59  ;;  %3310 = vmatpush.msrb.mxu2 %v1291_v15  ;;  %v815_v12 = vld [vmem:[#allocation7 + $0xd30] sm:$0xff]  ;;  %v1606_v15 = vld [vmem:[#allocation7 + $0x25e8] sm:$0xff] }
 0x2e8   :  { %3333 = vmatpush.msra.mxu3 %v1435_v46  ;;  %3348 = vmatpush.msra.mxu0 %v1651_v34  ;;  %v491_v46 = vld [vmem:[#allocation7 + $0x310] sm:$0xff]  ;;  %v662_v34 = vld [vmem:[#allocation7 + $0x868] sm:$0xff] }
 0x2e9   :  { %3291 = vmatmul.f32.vlgmr.msra.gmra.mxu1 %v4309_v23  ;;  %3311 = vmatpush.msrb.mxu2 %v1282_v35  ;;  %v806_v35 = vld [vmem:[#allocation7 + $0xce8] sm:$0xff] }
 0x2ea   :  { %3367 = vmatpush.msrb.mxu1 %v536_v41  ;;  %3334 = vmatpush.msra.mxu3 %v1426_v2  ;;  %v1597_v41 = vld [vmem:[#allocation7 + $0x25a0] sm:$0xff]  ;;  %v482_v2 = vld [vmem:[#allocation7 + $0x2c8] sm:$0xff] }
 0x2eb   :  { %3349 = vmatpush.msra.mxu0 %v1642_v4  ;;  %3312 = vmatpush.msrb.mxu2 %v1273_v11  ;;  %v653_v4 = vld [vmem:[#allocation7 + $0x820] sm:$0xff] }
 0x2ec   :  { %3368 = vmatpush.msrb.mxu1 %v527_v24  ;;  %3335 = vmatpush.msra.mxu3 %v1417_v18  ;;  %v797_v11 = vld [vmem:[#allocation7 + $0xca0] sm:$0xff]  ;;  %v1588_v24 = vld [vmem:[#allocation7 + $0x2558] sm:$0xff] }
 0x2ed   :  { %3350 = vmatpush.msra.mxu0 %v1633_v29  ;;  %3313 = vmatpush.msrb.mxu2 %v1264_v19  ;;  %v473_v18 = vld [vmem:[#allocation7 + $0x280] sm:$0xff]  ;;  %v644_v29 = vld [vmem:[#allocation7 + $0x7d8] sm:$0xff] }
 0x2ee   :  { %3369 = vmatpush.msrb.mxu1 %v518_v60  ;;  %3336 = vmatpush.msra.mxu3 %v1408_v43  ;;  %v788_v19 = vld [vmem:[#allocation7 + $0xc58] sm:$0xff]  ;;  %v1579_v60 = vld [vmem:[#allocation7 + $0x2510] sm:$0xff] }
 0x2ef   :  { %3351 = vmatpush.msra.mxu0 %v1624_v40  ;;  %3314 = vmatmul.f32.vlgmr.msrb.gmra.mxu2 %v4313_v28  ;;  %v464_v43 = vld [vmem:[#allocation7 + $0x238] sm:$0xff]  ;;  %v635_v40 = vld [vmem:[#allocation7 + $0x790] sm:$0xff] }
 0x2f0   :  { %3337 = vmatmul.f32.vlgmr.msra.gmra.mxu3 %v4333_v13  ;;  %3370 = vmatpush.msrb.mxu1 %v509_v30  ;;  %v779_v30 = vld [vmem:[#allocation7 + $0xc10] sm:$0xff] }
 0x2f1   :  { %3390 = vmatpush.msra.mxu2 %v680_v42  ;;  %3413 = vmatpush.msrb.mxu3 %v824_v51  ;;  %v1570_v42 = vld [vmem:[#allocation7 + $0x24c8] sm:$0xff]  ;;  %v455_v51 = vld [vmem:[#allocation7 + $0x1f0] sm:$0xff] }
 0x2f2   :  { %3352 = vmatpush.msra.mxu0 %v1615_v10  ;;  %3294 = vmatmul.f32.gmra.mxu1 %v4323_v49  ;;  %v626_v10 = vld [vmem:[#allocation7 + $0x748] sm:$0xff] }
 0x2f3   :  { %3371 = vmatpush.msrb.mxu1 %v500_v53  ;;  %3391 = vmatpush.msra.mxu2 %v671_v32  ;;  %v770_v53 = vld [vmem:[#allocation7 + $0xbc8] sm:$0xff]  ;;  %v1561_v32 = vld [vmem:[#allocation7 + $0x2480] sm:$0xff] }
 0x2f4   :  { %3414 = vmatpush.msrb.mxu3 %v815_v12  ;;  %3353 = vmatpush.msra.mxu0 %v1606_v15  ;;  %v446_v12 = vld [vmem:[#allocation7 + $0x1a8] sm:$0xff]  ;;  %v617_v15 = vld [vmem:[#allocation7 + $0x700] sm:$0xff] }
 0x2f5   :  { %3372 = vmatpush.msrb.mxu1 %v491_v46  ;;  %3392 = vmatpush.msra.mxu2 %v662_v34  ;;  %v761_v46 = vld [vmem:[#allocation7 + $0xb80] sm:$0xff]  ;;  %v1552_v34 = vld [vmem:[#allocation7 + $0x2438] sm:$0xff] }
 0x2f6   :  { %3415 = vmatpush.msrb.mxu3 %v806_v35  ;;  %3354 = vmatpush.msra.mxu0 %v1597_v41  ;;  %v437_v35 = vld [vmem:[#allocation7 + $0x160] sm:$0xff]  ;;  %v608_v41 = vld [vmem:[#allocation7 + $0x6b8] sm:$0xff] }
 0x2f7   :  { %3373 = vmatpush.msrb.mxu1 %v482_v2  ;;  %3393 = vmatpush.msra.mxu2 %v653_v4  ;;  %v752_v2 = vld [vmem:[#allocation7 + $0xb38] sm:$0xff] }
 0x2f8   :  { %3416 = vmatpush.msrb.mxu3 %v797_v11  ;;  %3355 = vmatpush.msra.mxu0 %v1588_v24  ;;  %v968_v4 = vld [vmem:[#allocation7 + $0x11f8] sm:$0xff]  ;;  %v599_v24 = vld [vmem:[#allocation7 + $0x670] sm:$0xff] }
 0x2f9   :  { %3317 = vmatmul.f32.gmra.mxu2 %v4325_v52  ;;  %3340 = vmatmul.f32.gmra.mxu3 %v4341_v37  ;;  %v428_v11 = vld [vmem:[#allocation7 + $0x118] sm:$0xff] }
 0x2fa   :  { %3374 = vmatpush.msrb.mxu1 %v473_v18  ;;  %3394 = vmatpush.msra.mxu2 %v644_v29  ;;  %v743_v18 = vld [vmem:[#allocation7 + $0xaf0] sm:$0xff] }
 0x2fb   :  { %3417 = vmatpush.msrb.mxu3 %v788_v19  ;;  %3356 = vmatpush.msra.mxu0 %v1579_v60  ;;  %v959_v29 = vld [vmem:[#allocation7 + $0x11b0] sm:$0xff]  ;;  %v590_v60 = vld [vmem:[#allocation7 + $0x628] sm:$0xff] }
 0x2fc   :  { %3375 = vmatpush.msrb.mxu1 %v464_v43  ;;  %3395 = vmatpush.msra.mxu2 %v635_v40  ;;  %v419_v19 = vld [vmem:[#allocation7 + $0xd0] sm:$0xff]  ;;  %v734_v43 = vld [vmem:[#allocation7 + $0xaa8] sm:$0xff] }
 0x2fd   :  { %3418 = vmatpush.msrb.mxu3 %v779_v30  ;;  %3357 = vmatpush.msra.mxu0 %v1570_v42  ;;  %v950_v40 = vld [vmem:[#allocation7 + $0x1168] sm:$0xff]  ;;  %v581_v42 = vld [vmem:[#allocation7 + $0x5e0] sm:$0xff] }
 0x2fe   :  { %3376 = vmatpush.msrb.mxu1 %v455_v51  ;;  %3396 = vmatpush.msra.mxu2 %v626_v10  ;;  %v410_v30 = vld [vmem:[#allocation7 + $0x88] sm:$0xff]  ;;  %v725_v51 = vld [vmem:[#allocation7 + $0xa60] sm:$0xff] }
 0x2ff   :  { %3419 = vmatpush.msrb.mxu3 %v770_v53  ;;  %3358 = vmatpush.msra.mxu0 %v1561_v32  ;;  %v941_v10 = vld [vmem:[#allocation7 + $0x1120] sm:$0xff]  ;;  %v572_v32 = vld [vmem:[#allocation7 + $0x598] sm:$0xff] }
 0x300   :  { %3377 = vmatpush.msrb.mxu1 %v446_v12  ;;  %3397 = vmatpush.msra.mxu2 %v617_v15  ;;  %v401_v53 = vld [vmem:[#allocation7 + $0x40] sm:$0xff]  ;;  %v716_v12 = vld [vmem:[#allocation7 + $0xa18] sm:$0xff] }
 0x301   :  { %3420 = vmatpush.msrb.mxu3 %v761_v46  ;;  %3359 = vmatpush.msra.mxu0 %v1552_v34  ;;  %v932_v15 = vld [vmem:[#allocation7 + $0x10d8] sm:$0xff]  ;;  %v563_v46 = vld [vmem:[#allocation7 + $0x550] sm:$0xff] }
 0x302   :  { %3360 = vmatmul.f32.vlgmr.msra.gmra.mxu0 %v4335_v21  ;;  %3378 = vmatpush.msrb.mxu1 %v437_v35  ;;  %v1112_v34 = vld [vmem:[#allocation7 + $0x1678] sm:$0xff]  ;;  %v707_v35 = vld [vmem:[#allocation7 + $0x9d0] sm:$0xff] }
 0x303   :  { %3398 = vmatpush.msra.mxu2 %v608_v41  ;;  %3421 = vmatpush.msrb.mxu3 %v752_v2  ;;  %v923_v41 = vld [vmem:[#allocation7 + $0x1090] sm:$0xff]  ;;  %v554_v2 = vld [vmem:[#allocation7 + $0x508] sm:$0xff] }
 0x304   :  { %3436 = vmatpush.msrb.mxu0 %v968_v4  ;;  %3379 = vmatpush.msrb.mxu1 %v428_v11  ;;  %v1103_v4 = vld [vmem:[#allocation7 + $0x1630] sm:$0xff]  ;;  %v698_v11 = vld [vmem:[#allocation7 + $0x988] sm:$0xff] }
 0x305   :  { %3399 = vmatpush.msra.mxu2 %v599_v24  ;;  %3422 = vmatpush.msrb.mxu3 %v743_v18  ;;  %v914_v24 = vld [vmem:[#allocation7 + $0x1048] sm:$0xff]  ;;  %v545_v18 = vld [vmem:[#allocation7 + $0x4c0] sm:$0xff] }
 0x306   :  { %3437 = vmatpush.msrb.mxu0 %v959_v29  ;;  %3380 = vmatpush.msrb.mxu1 %v419_v19  ;;  %v1094_v29 = vld [vmem:[#allocation7 + $0x15e8] sm:$0xff]  ;;  %v689_v19 = vld [vmem:[#allocation7 + $0x940] sm:$0xff] }
 0x307   :  { %3400 = vmatpush.msra.mxu2 %v590_v60  ;;  %3423 = vmatpush.msrb.mxu3 %v734_v43  ;;  %v905_v60 = vld [vmem:[#allocation7 + $0x1000] sm:$0xff] }
 0x308   :  { %3438 = vmatpush.msrb.mxu0 %v950_v40  ;;  %3381 = vmatpush.msrb.mxu1 %v410_v30  ;;  %v1085_v43 = vld [vmem:[#allocation7 + $0x15a0] sm:$0xff]  ;;  %v1400_v40 = vld [vmem:[#allocation7 + $0x1f78] sm:$0xff] }
 0x309   :  { %3401 = vmatpush.msra.mxu2 %v581_v42  ;;  %3424 = vmatpush.msrb.mxu3 %v725_v51  ;;  %v896_v30 = vld [vmem:[#allocation7 + $0xfb8] sm:$0xff]  ;;  %v1247_v51 = vld [vmem:[#allocation7 + $0x1ab0] sm:$0xff] }
 0x30a   :  { %3439 = vmatpush.msrb.mxu0 %v941_v10  ;;  %3382 = vmatpush.msrb.mxu1 %v401_v53  ;;  %v1076_v42 = vld [vmem:[#allocation7 + $0x1558] sm:$0xff]  ;;  %v1391_v10 = vld [vmem:[#allocation7 + $0x1f30] sm:$0xff] }
 0x30b   :  { %3363 = vmatmul.f32.gmra.mxu0 %v4343_v44  ;;  %3402 = vmatpush.msra.mxu2 %v572_v32  ;;  %v887_v53 = vld [vmem:[#allocation7 + $0xf70] sm:$0xff] }
 0x30c   :  { %3425 = vmatpush.msrb.mxu3 %v716_v12  ;;  %3440 = vmatpush.msrb.mxu0 %v932_v15  ;;  %v1067_v32 = vld [vmem:[#allocation7 + $0x1510] sm:$0xff]  ;;  %v1238_v12 = vld [vmem:[#allocation7 + $0x1a68] sm:$0xff] }
 0x30d   :  { %3383 = vmatmul.f32.vlgmr.msrb.gmra.mxu1 %v4291_v48  ;;  %3403 = vmatpush.msra.mxu2 %v563_v46  ;;  %v1256_v48 = vld [vmem:[#allocation7 + $0x1af8] sm:$0xff]  ;;  %v1382_v15 = vld [vmem:[#allocation7 + $0x1ee8] sm:$0xff] }
 0x30e   :  { %3459 = vmatpush.msra.mxu1 %v1112_v34  ;;  %3426 = vmatpush.msrb.mxu3 %v707_v35  ;;  %v878_v46 = vld [vmem:[#allocation7 + $0xf28] sm:$0xff]  ;;  %v1373_v34 = vld [vmem:[#allocation7 + $0x1ea0] sm:$0xff] }
 0x30f   :  { %3441 = vmatpush.msrb.mxu0 %v923_v41  ;;  %3404 = vmatpush.msra.mxu2 %v554_v2  ;;  %v869_v35 = vld [vmem:[#allocation7 + $0xee0] sm:$0xff]  ;;  %v4626_v2 = vpop.f32.mrf.mxu2 }
 0x310   :  { %3460 = vmatpush.msra.mxu1 %v1103_v4  ;;  %3427 = vmatpush.msrb.mxu3 %v698_v11  ;;  %v1049_v41 = vld [vmem:[#allocation7 + $0x1480] sm:$0xff]  ;;  %v1364_v4 = vld [vmem:[#allocation7 + $0x1e58] sm:$0xff] }
 0x311   :  { %3442 = vmatpush.msrb.mxu0 %v914_v24  ;;  %3405 = vmatpush.msra.mxu2 %v545_v18  ;;  %v860_v11 = vld [vmem:[#allocation7 + $0xe98] sm:$0xff]  ;;  %v1211_v18 = vld [vmem:[#allocation7 + $0x1990] sm:$0xff] }
 0x312   :  { %3461 = vmatpush.msra.mxu1 %v1094_v29  ;;  %3428 = vmatpush.msrb.mxu3 %v689_v19  ;;  %v1040_v24 = vld [vmem:[#allocation7 + $0x1438] sm:$0xff]  ;;  %v1355_v29 = vld [vmem:[#allocation7 + $0x1e10] sm:$0xff] }
 0x313   :  { %3443 = vmatpush.msrb.mxu0 %v905_v60  ;;  %3406 = vmatmul.f32.vlgmr.msra.gmra.mxu2 %v4294_v54  ;;  %v1058_v54 = vld [vmem:[#allocation7 + $0x14c8] sm:$0xff]  ;;  %v851_v19 = vld [vmem:[#allocation7 + $0xe50] sm:$0xff] }
 0x314   :  { %3429 = vmatmul.f32.vlgmr.msrb.gmra.mxu3 %v4296_v55  ;;  %3462 = vmatpush.msra.mxu1 %v1085_v43  ;;  %v1229_v55 = vld [vmem:[#allocation7 + $0x1a20] sm:$0xff]  ;;  %v1031_v60 = vld [vmem:[#allocation7 + $0x13f0] sm:$0xff]  ;;  %v1202_v43 = vld [vmem:[#allocation7 + $0x1948] sm:$0xff] }
 0x315   :  { %3482 = vmatpush.msrb.mxu2 %v1256_v48  ;;  %3505 = vmatpush.msra.mxu3 %v1400_v40  ;;  %v1346_v48 = vld [vmem:[#allocation7 + $0x1dc8] sm:$0xff] }
 0x316   :  { %3444 = vmatpush.msrb.mxu0 %v896_v30  ;;  %3386 = vmatmul.f32.gmra.mxu1 %v4300_v1  ;;  %v1220_v1 = vld [vmem:[#allocation7 + $0x19d8] sm:$0xff]  ;;  %v842_v40 = vld [vmem:[#allocation7 + $0xe08] sm:$0xff]  ;;  %v4630_v30 = vpop.f32.mrf.mxu3 }
 0x317   :  { %3463 = vmatpush.msra.mxu1 %v1076_v42  ;;  %3483 = vmatpush.msrb.mxu2 %v1247_v51  ;;  %v4632_v42 = vpop.f32.mrf.mxu0  ;;  %v1337_v51 = vld [vmem:[#allocation7 + $0x1d80] sm:$0xff] }
 0x318   :  { %3506 = vmatpush.msra.mxu3 %v1391_v10  ;;  %3445 = vmatpush.msrb.mxu0 %v887_v53  ;;  %v833_v10 = vld [vmem:[#allocation7 + $0xdc0] sm:$0xff] }
 0x319   :  { %3464 = vmatpush.msra.mxu1 %v1067_v32  ;;  %3484 = vmatpush.msrb.mxu2 %v1238_v12  ;;  %v1013_v53 = vld [vmem:[#allocation7 + $0x1360] sm:$0xff]  ;;  %v1184_v32 = vld [vmem:[#allocation7 + $0x18b8] sm:$0xff] }
 0x31a   :  { %3507 = vmatpush.msra.mxu3 %v1382_v15  ;;  %3446 = vmatpush.msrb.mxu0 %v878_v46  ;;  %v1328_v12 = vld [vmem:[#allocation7 + $0x1d38] sm:$0xff] }
 0x31b   :  { %3465 = vmatpush.msra.mxu1 %v1058_v54  ;;  %3485 = vmatpush.msrb.mxu2 %v1229_v55  ;;  %v1544_v15 = vld [vmem:[#allocation7 + $0x23f8] sm:$0xff]  ;;  %v4634_v54 = vpop.f32.mrf.mxu2  ;;  %v1175_v55 = vld [vmem:[#allocation7 + $0x1870] sm:$0xff] }
 0x31c   :  { %3508 = vmatpush.msra.mxu3 %v1373_v34  ;;  %3447 = vmatpush.msrb.mxu0 %v869_v35  ;;  %v1004_v46 = vld [vmem:[#allocation7 + $0x1318] sm:$0xff]  ;;  %v1319_v34 = vld [vmem:[#allocation7 + $0x1cf0] sm:$0xff] }
 0x31d   :  { %3409 = vmatmul.f32.gmra.mxu2 %v4303_v8  ;;  %3432 = vmatmul.f32.gmra.mxu3 %v4305_v9  ;;  %v1022_v8 = vld [vmem:[#allocation7 + $0x13a8] sm:$0xff]  ;;  %v1193_v9 = vld [vmem:[#allocation7 + $0x1900] sm:$0xff]  ;;  %v1535_v35 = vld [vmem:[#allocation7 + $0x23b0] sm:$0xff] }
 0x31e   :  { %3466 = vmatpush.msra.mxu1 %v1049_v41  ;;  %3486 = vmatpush.msrb.mxu2 %v1220_v1  ;;  %v995_v41 = vld [vmem:[#allocation7 + $0x12d0] sm:$0xff]  ;;  %v1166_v1 = vld [vmem:[#allocation7 + $0x1828] sm:$0xff] }
 0x31f   :  { %3509 = vmatpush.msra.mxu3 %v1364_v4  ;;  %3448 = vmatpush.msrb.mxu0 %v860_v11  ;;  %v1310_v4 = vld [vmem:[#allocation7 + $0x1ca8] sm:$0xff] }
 0x320   :  { %3467 = vmatpush.msra.mxu1 %v1040_v24  ;;  %3487 = vmatpush.msrb.mxu2 %v1211_v18  ;;  %v1526_v11 = vld [vmem:[#allocation7 + $0x2368] sm:$0xff]  ;;  %v1157_v18 = vld [vmem:[#allocation7 + $0x17e0] sm:$0xff] }
 0x321   :  { %3510 = vmatpush.msra.mxu3 %v1355_v29  ;;  %3449 = vmatpush.msrb.mxu0 %v851_v19  ;;  %v986_v24 = vld [vmem:[#allocation7 + $0x1288] sm:$0xff]  ;;  %v1301_v29 = vld [vmem:[#allocation7 + $0x1c60] sm:$0xff] }
 0x322   :  { %3468 = vmatpush.msra.mxu1 %v1031_v60  ;;  %3488 = vmatpush.msrb.mxu2 %v1202_v43  ;;  %v1517_v19 = vld [vmem:[#allocation7 + $0x2320] sm:$0xff]  ;;  %v4639_v43 = vpop.f32.mrf.mxu0 }
 0x323   :  { %3511 = vmatpush.msra.mxu3 %v1346_v48  ;;  %3450 = vmatpush.msrb.mxu0 %v842_v40  ;;  %v977_v60 = vld [vmem:[#allocation7 + $0x1240] sm:$0xff]  ;;  %v4641_v48 = vpop.f32.mrf.mxu1  ;;  %v1148_v40 = vld [vmem:[#allocation7 + $0x1798] sm:$0xff] }
 0x324   :  { %3469 = vmatpush.msra.mxu1 %v1022_v8  ;;  %3489 = vmatpush.msrb.mxu2 %v1193_v9  ;;  %v1292_v8 = vld [vmem:[#allocation7 + $0x1c18] sm:$0xff] }
 0x325   :  { %3512 = vmatpush.msra.mxu3 %v1337_v51  ;;  %3451 = vmatpush.msrb.mxu0 %v833_v10  ;;  %v1508_v9 = vld [vmem:[#allocation7 + $0x22d8] sm:$0xff]  ;;  %v4643_v51 = vpop.f32.mrf.mxu2  ;;  %v1139_v10 = vld [vmem:[#allocation7 + $0x1750] sm:$0xff] }
 0x326   :  { %3452 = vmatmul.f32.vlgmr.msrb.gmra.mxu0 %v4311_v27  ;;  %3470 = vmatpush.msra.mxu1 %v1013_v53  ;;  %v4637_v27 = vpop.f32.mrf.mxu3  ;;  %v1688_v53 = vld [vmem:[#allocation7 + $0x2878] sm:$0xff] }
 0x327   :  { %3490 = vmatpush.msrb.mxu2 %v1184_v32  ;;  %3513 = vmatpush.msra.mxu3 %v1328_v12  ;;  %v1283_v32 = vld [vmem:[#allocation7 + $0x1bd0] sm:$0xff] }
 0x328   :  { %3528 = vmatpush.msra.mxu0 %v1544_v15  ;;  %3471 = vmatpush.msra.mxu1 %v1004_v46  ;;  %v1499_v12 = vld [vmem:[#allocation7 + $0x2290] sm:$0xff]  ;;  %v1130_v15 = vld [vmem:[#allocation7 + $0x1708] sm:$0xff] }
 0x329   :  { %3491 = vmatpush.msrb.mxu2 %v1175_v55  ;;  %3514 = vmatpush.msra.mxu3 %v1319_v34  ;;  %v1679_v46 = vld [vmem:[#allocation7 + $0x2830] sm:$0xff]  ;;  %v1274_v55 = vld [vmem:[#allocation7 + $0x1b88] sm:$0xff] }
 0x32a   :  { %3529 = vmatpush.msra.mxu0 %v1535_v35  ;;  %3472 = vmatpush.msra.mxu1 %v995_v41  ;;  %v1490_v34 = vld [vmem:[#allocation7 + $0x2248] sm:$0xff]  ;;  %v1121_v35 = vld [vmem:[#allocation7 + $0x16c0] sm:$0xff] }
 0x32b   :  { %3492 = vmatpush.msrb.mxu2 %v1166_v1  ;;  %3515 = vmatpush.msra.mxu3 %v1310_v4  ;;  %v1265_v1 = vld [vmem:[#allocation7 + $0x1b40] sm:$0xff]  ;;  %v4649_v4 = vpop.f32.mrf.mxu0 }
 0x32c   :  { %3530 = vmatpush.msra.mxu0 %v1526_v11  ;;  %3473 = vmatpush.msra.mxu1 %v986_v24  ;;  %v1481_v11 = vld [vmem:[#allocation7 + $0x2200] sm:$0xff]  ;;  %v4651_v24 = vpop.f32.mrf.mxu1 }
 0x32d   :  { %3493 = vmatpush.msrb.mxu2 %v1157_v18  ;;  %3516 = vmatpush.msra.mxu3 %v1301_v29  ;;  %v3607_v18 = vld [vmem:[#allocation10 + $0x78] sm:$0xff] }
 0x32e   :  { %3531 = vmatpush.msra.mxu0 %v1517_v19  ;;  %3474 = vmatpush.msra.mxu1 %v977_v60  ;;  %v4647_v41 = vpop.f32.mrf.mxu3  ;;  %v3623_v29 = vld [vmem:[#allocation10 + $0xf8] sm:$0xff]  ;;  %v1472_v19 = vld [vmem:[#allocation7 + $0x21b8] sm:$0xff]  ;;  %v4654_v60 = vpop.f32.mrf.mxu2 }
 0x32f   :  { %3455 = vmatmul.f32.gmra.mxu0 %v4321_v47  ;;  %3494 = vmatpush.msrb.mxu2 %v1148_v40  ;;  %v1670_v47 = vld [vmem:[#allocation7 + $0x27e8] sm:$0xff]  ;;  %v1652_v40 = vld [vmem:[#allocation7 + $0x2758] sm:$0xff] }
 0x330   :  { %3517 = vmatpush.msra.mxu3 %v1292_v8  ;;  %3532 = vmatpush.msra.mxu0 %v1508_v9  ;;  %v3606_v8 = vld [vmem:[#allocation10 + $0x70] sm:$0xff] }
 0x331   :  { %3475 = vmatmul.f32.vlgmr.msra.gmra.mxu1 %v4315_v31  ;;  %3495 = vmatpush.msrb.mxu2 %v1139_v10  ;;  %v1661_v31 = vld [vmem:[#allocation7 + $0x27a0] sm:$0xff] }
 0x332   :  { %3551 = vmatpush.msrb.mxu1 %v1688_v53  ;;  %3518 = vmatpush.msra.mxu3 %v1283_v32  ;;  %v4657_v9 = vld [vmem:[#allocation8] sm:$0xff]  ;;  %v1463_v32 = vld [vmem:[#allocation7 + $0x2170] sm:$0xff] }
 0x333   :  { %3533 = vmatpush.msra.mxu0 %v1499_v12  ;;  %3496 = vmatpush.msrb.mxu2 %v1130_v15  ;;  %v1693_v10 = vperm.slane %v4657_v9, 0  ;;  %v3622_v53 = vld [vmem:[#allocation10 + $0xf0] sm:$0xff]  ;;  %v3605_v12 = vld [vmem:[#allocation10 + $0x68] sm:$0xff] }
 0x334   :  { %3552 = vmatpush.msrb.mxu1 %v1679_v46  ;;  %3519 = vmatpush.msra.mxu3 %v1274_v55  ;;  %v3621_v15 = vld [vmem:[#allocation10 + $0xe8] sm:$0xff]  ;;  %v1634_v46 = vld [vmem:[#allocation7 + $0x26c8] sm:$0xff] }
 0x335   :  { %3534 = vmatpush.msra.mxu0 %v1490_v34  ;;  %3497 = vmatpush.msrb.mxu2 %v1121_v35  ;;  %v3604_v55 = vld [vmem:[#allocation10 + $0x60] sm:$0xff]  ;;  %v1729_v34 = vadd.f32 %v4398_v38, %v1693_v10  ;;  %v3603_v38 = vld [vmem:[#allocation10 + $0x58] sm:$0xff] }
 0x336   :  { %3553 = vmatpush.msrb.mxu1 %v1670_v47  ;;  %3520 = vmatpush.msra.mxu3 %v1265_v1  ;;  %v4662_v35 = vpop.f32.mrf.mxu3  ;;  %v3620_v47 = vld [vmem:[#allocation10 + $0xe0] sm:$0xff]  ;;  %v1445_v1 = vld [vmem:[#allocation7 + $0x20e0] sm:$0xff] }
 0x337   :  { %3535 = vmatpush.msra.mxu0 %v1481_v11  ;;  %3498 = vmatmul.f32.vlgmr.msrb.gmra.mxu2 %v4309_v23  ;;  %v1643_v23 = vld [vmem:[#allocation7 + $0x2710] sm:$0xff]  ;;  %v4665_v11 = vpop.f32.mrf.mxu0 }
 0x338   :  { %3521 = vmatmul.f32.vlgmr.msra.gmra.mxu3 %v4313_v28  ;;  %3554 = vmatpush.msrb.mxu1 %v1661_v31  ;;  %v1454_v28 = vld [vmem:[#allocation7 + $0x2128] sm:$0xff]  ;;  %v4667_v31 = vpop.f32.mrf.mxu1 }
 0x339   :  { %3740 = vmatpush.msra.mxu2 %v3607_v18  ;;  %3763 = vmatpush.msrb.mxu3 %v3623_v29  ;;  %v1752_v18 = vadd.f32 %v4400_v39, %v1729_v34  ;;  %v1625_v29 = vld [vmem:[#allocation7 + $0x2680] sm:$0xff]  ;;  %v3600_v34 = vld [vmem:[#allocation10 + $0x40] sm:$0xff] }
 0x33a   :  { %3536 = vmatpush.msra.mxu0 %v1472_v19  ;;  %3478 = vmatmul.f32.gmra.mxu1 %v4327_v59  ;;  %v1694_v59 = vperm.slane %v4657_v9, 1  ;;  %v4670_v19 = vpop.f32.mrf.mxu2 }
 0x33b   :  { %3555 = vmatpush.msrb.mxu1 %v1652_v40  ;;  %3741 = vmatpush.msra.mxu2 %v3606_v8  ;;  %v3619_v40 = vld [vmem:[#allocation10 + $0xd8] sm:$0xff]  ;;  %v1436_v8 = vld [vmem:[#allocation7 + $0x2098] sm:$0xff] }
 0x33c   :  { %3764 = vmatpush.msrb.mxu3 %v3622_v53  ;;  %3537 = vmatpush.msra.mxu0 %v1463_v32  ;;  %v1616_v53 = vld [vmem:[#allocation7 + $0x2638] sm:$0xff]  ;;  %v1936_v39 = vadd.f32 %v4440_v50, %v1694_v59  ;;  %v1598_v50 = vld [vmem:[#allocation7 + $0x25a8] sm:$0xff] }
 0x33d   :  { %3556 = vmatpush.msrb.mxu1 %v1643_v23  ;;  %3742 = vmatpush.msra.mxu2 %v3605_v12  ;;  %v3602_v32 = vld [vmem:[#allocation10 + $0x50] sm:$0xff]  ;;  %v1732_v23 = vadd.f32 %v4406_v63, %v1693_v10 }
 0x33e   :  { %3765 = vmatpush.msrb.mxu3 %v3621_v15  ;;  %3538 = vmatpush.msra.mxu0 %v1454_v28  ;;  %v3618_v12 = vld [vmem:[#allocation10 + $0xd0] sm:$0xff]  ;;  %v1427_v15 = vld [vmem:[#allocation7 + $0x2050] sm:$0xff]  ;;  %v1775_v28 = vadd.f32 %v4403_v57, %v1752_v18  ;;  %v4680_v10 = vpop.f32.mrf.mxu3  ;;  %v1959_v57 = vadd.f32 %v4444_v14, %v1936_v39  ;;  %v3639_v14 = vld [vmem:[#allocation10 + $0x178] sm:$0xff] }
 0x33f   :  { %3557 = vmatpush.msrb.mxu1 %v1634_v46  ;;  %3743 = vmatpush.msra.mxu2 %v3604_v55  ;;  %v1607_v46 = vld [vmem:[#allocation7 + $0x25f0] sm:$0xff]  ;;  %v1418_v55 = vld [vmem:[#allocation7 + $0x2008] sm:$0xff] }
 0x340   :  { %3766 = vmatpush.msrb.mxu3 %v3620_v47  ;;  %3539 = vmatpush.msra.mxu0 %v1445_v1  ;;  %v1798_v63 = vadd.f32 %v4408_v3, %v1775_v28  ;;  %v1755_v47 = vadd.f32 %v4410_v6, %v1732_v23  ;;  %v4684_v1 = vpop.f32.mrf.mxu0  ;;  %v3616_v18 = vld [vmem:[#allocation10 + $0xc0] sm:$0xff]  ;;  %v1982_v3 = vadd.f32 %v4448_v22, %v1959_v57  ;;  %v3598_v22 = vld [vmem:[#allocation10 + $0x30] sm:$0xff] }
 0x341   :  { %3501 = vmatmul.f32.gmra.mxu2 %v4323_v49  ;;  %3524 = vmatmul.f32.gmra.mxu3 %v4325_v52  ;;  %v3601_v49 = vld [vmem:[#allocation10 + $0x48] sm:$0xff] }
 0x342   :  { %3558 = vmatpush.msrb.mxu1 %v1625_v29  ;;  %3744 = vmatpush.msra.mxu2 %v3603_v38  ;;  %v3617_v52 = vld [vmem:[#allocation10 + $0xc8] sm:$0xff]  ;;  %v1409_v29 = vld [vmem:[#allocation7 + $0x1fc0] sm:$0xff]  ;;  %v1821_v6 = vadd.f32 %v4417_v26, %v1798_v63  ;;  %v1778_v23 = vadd.f32 %v4414_v20, %v1755_v47  ;;  %v2005_v39 = vadd.f32 %v4457_v62, %v1982_v3  ;;  %v3596_v63 = vld [vmem:[#allocation10 + $0x20] sm:$0xff] }
 0x343   :  { %3767 = vmatpush.msrb.mxu3 %v3619_v40  ;;  %3540 = vmatpush.msra.mxu0 %v1436_v8  ;;  %v1589_v38 = vld [vmem:[#allocation7 + $0x2560] sm:$0xff]  ;;  %v4687_v40 = vpop.f32.mrf.mxu1  ;;  %v1939_v26 = vadd.f32 %v4451_v25, %v1694_v59  ;;  %v3597_v62 = vld [vmem:[#allocation10 + $0x28] sm:$0xff]  ;;  %v3612_v25 = vld [vmem:[#allocation10 + $0xa0] sm:$0xff] }
 0x344   :  { %3559 = vmatpush.msrb.mxu1 %v1616_v53  ;;  %3745 = vmatpush.msra.mxu2 %v3602_v32  ;;  %v3599_v8 = vld [vmem:[#allocation10 + $0x38] sm:$0xff]  ;;  %v1580_v32 = vld [vmem:[#allocation7 + $0x2518] sm:$0xff]  ;;  %v1844_v28 = vadd.f32 %v4421_v36, %v1821_v6  ;;  %v2028_v20 = vadd.f32 %v4459_v7, %v2005_v39  ;;  %v1801_v36 = vadd.f32 %v4419_v33, %v1778_v23  ;;  %v3636_v7 = vld [vmem:[#allocation10 + $0x160] sm:$0xff] }
 0x345   :  { %3768 = vmatpush.msrb.mxu3 %v3618_v12  ;;  %3541 = vmatpush.msra.mxu0 %v1427_v15  ;;  %v3615_v53 = vld [vmem:[#allocation10 + $0xb8] sm:$0xff]  ;;  %v4692_v12 = vpop.f32.mrf.mxu2  ;;  %v3614_v15 = vld [vmem:[#allocation10 + $0xb0] sm:$0xff] }
 0x346   :  { %3560 = vmatpush.msrb.mxu1 %v1607_v46  ;;  %3746 = vmatpush.msra.mxu2 %v3601_v49  ;;  %v3638_v46 = vld [vmem:[#allocation10 + $0x170] sm:$0xff]  ;;  %v1571_v49 = vld [vmem:[#allocation7 + $0x24d0] sm:$0xff]  ;;  %v1867_v59 = vadd.f32 %v4425_v56, %v1844_v28  ;;  %v2051_v57 = vadd.f32 %v4465_v45, %v2028_v20  ;;  %v3611_v3 = vld [vmem:[#allocation10 + $0x98] sm:$0xff] }
 0x347   :  { %3769 = vmatpush.msrb.mxu3 %v3617_v52  ;;  %3542 = vmatpush.msra.mxu0 %v1418_v55  ;;  %v3613_v52 = vld [vmem:[#allocation10 + $0xa8] sm:$0xff]  ;;  %v1562_v55 = vld [vmem:[#allocation7 + $0x2488] sm:$0xff]  ;;  %v1553_v47 = vld [vmem:[#allocation7 + $0x2440] sm:$0xff] }
 0x348   :  { %3561 = vmatpush.msrb.mxu1 %v1598_v50  ;;  %3747 = vmatpush.msra.mxu2 %v3600_v34  ;;  %v1962_v50 = vadd.f32 %v4455_v61, %v1939_v26  ;;  %v4703_v34 = vpop.f32.mrf.mxu3  ;;  %v1890_v56 = vadd.f32 %v4429_v5, %v1867_v59  ;;  %v4929_v45 = vld [vmem:[#allocation25_spill] sm:$0xff]  ;;  %v4930_v23 = vld [vmem:[#allocation24_spill] sm:$0xff] }
 0x349   :  { %3770 = vmatpush.msrb.mxu3 %v3616_v18  ;;  %3543 = vmatpush.msra.mxu0 %v1409_v29  ;;  %v1695_v18 = vperm.slane %v4657_v9, 2  ;;  %v4707_v29 = vpop.f32.mrf.mxu0  ;;  %v2074_v6 = vadd.f32 %v4929_v45, %v2051_v57  ;;  %v3655_v5 = vld [vmem:[#allocation10 + $0x1f8] sm:$0xff]  ;;  %v3593_v20 = vld [vmem:[#allocation10 + $0x8] sm:$0xff]  ;;  %v3632_v45 = vld [vmem:[#allocation10 + $0x140] sm:$0xff] }
 0x34a   :  { %3544 = vmatmul.f32.vlgmr.msra.gmra.mxu0 %v4333_v13  ;;  %3562 = vmatpush.msrb.mxu1 %v1589_v38  ;;  %v3637_v13 = vld [vmem:[#allocation10 + $0x168] sm:$0xff]  ;;  %v3595_v38 = vld [vmem:[#allocation10 + $0x18] sm:$0xff]  ;;  %v1985_v61 = vadd.f32 %v4461_v16, %v1962_v50  ;;  %v3610_v16 = vld [vmem:[#allocation10 + $0x90] sm:$0xff] }
 0x34b   :  { %3748 = vmatpush.msra.mxu2 %v3599_v8  ;;  %3771 = vmatpush.msrb.mxu3 %v3615_v53  ;;  %v4709_v33 = vpop.f32.mrf.mxu1  ;;  %v3635_v8 = vld [vmem:[#allocation10 + $0x158] sm:$0xff]  ;;  %v1824_v53 = vadd.f32 %v4427_v0, %v1801_v36  ;;  %v3609_v36 = vld [vmem:[#allocation10 + $0x88] sm:$0xff] }
 0x34c   :  { %3786 = vmatpush.msrb.mxu0 %v3639_v14  ;;  %3563 = vmatpush.msrb.mxu1 %v1580_v32  ;;  %v3594_v32 = vld [vmem:[#allocation10 + $0x10] sm:$0xff]  ;;  %v2008_v39 = vadd.f32 %v4930_v23, %v1985_v61  ;;  %v4932_v28 = vld [vmem:[#allocation28_spill] sm:$0xff]  ;;  %v4937_v59 = vld [vmem:[#allocation33_spill] sm:$0xff] }
 0x34d   :  { %3749 = vmatpush.msra.mxu2 %v3598_v22  ;;  %3772 = vmatpush.msrb.mxu3 %v3614_v15  ;;  %v4715_v14 = vpop.f32.mrf.mxu2  ;;  %v4931_v22 = vld [vmem:[#allocation19_spill] sm:$0xff]  ;;  %v2097_v26 = vadd.f32 %v4932_v28, %v2074_v6  ;;  %v4938_v61 = vld [vmem:[#allocation20_spill] sm:$0xff]  ;;  %v4942_v28 = vld [vmem:[#allocation37_spill] sm:$0xff] }
 0x34e   :  { %3787 = vmatpush.msrb.mxu0 %v3638_v46  ;;  %3564 = vmatpush.msrb.mxu1 %v1571_v49  ;;  %v1847_v15 = vadd.f32 %v4931_v22, %v1824_v53  ;;  %v4933_v0 = vld [vmem:[#allocation31_spill] sm:$0xff] }
 0x34f   :  { %3750 = vmatpush.msra.mxu2 %v3597_v62  ;;  %3773 = vmatpush.msrb.mxu3 %v3613_v52  ;;  %v2143_v46 = vadd.f32 %v4933_v0, %v1695_v18  ;;  %v3634_v49 = vld [vmem:[#allocation10 + $0x150] sm:$0xff]  ;;  %v4934_v62 = vld [vmem:[#allocation21_spill] sm:$0xff] }
 0x350   :  { %3788 = vmatpush.msrb.mxu0 %v3637_v13  ;;  %3565 = vmatpush.msrb.mxu1 %v1562_v55  ;;  %v1913_v52 = vadd.f32 %v4934_v62, %v1890_v56  ;;  %v4935_v13 = vld [vmem:[#allocation26_spill] sm:$0xff]  ;;  %v4729_v57 = vpop.f32.mrf.mxu3  ;;  %v3608_v56 = vld [vmem:[#allocation10 + $0x80] sm:$0xff]  ;;  %v1696_v62 = vperm.slane %v4657_v9, 3 }
 0x351   :  { %3751 = vmatpush.msra.mxu2 %v3596_v63  ;;  %3774 = vmatpush.msrb.mxu3 %v3612_v25  ;;  %v2031_v55 = vadd.f32 %v4935_v13, %v2008_v39  ;;  %v4936_v63 = vld [vmem:[#allocation29_spill] sm:$0xff]  ;;  %v2166_v50 = vadd.f32 %v4937_v59, %v2143_v46  ;;  %v4733_v53 = vpop.f32.mrf.mxu0  ;;  %v3687_v46 = vld [vmem:[#allocation10 + $0x2f8] sm:$0xff] }
 0x352   :  { %3789 = vmatpush.msrb.mxu0 %v3636_v7  ;;  %3566 = vmatpush.msrb.mxu1 %v1553_v47  ;;  %v2120_v25 = vadd.f32 %v4936_v63, %v2097_v26  ;;  %v3633_v7 = vld [vmem:[#allocation10 + $0x148] sm:$0xff]  ;;  %v3592_v47 = vld [vmem:[#allocation10] sm:$0xff]  ;;  %v3574_v6 = vmax.f32 %v1913_v52, 0.0  ;;  %v3631_v52 = vld [vmem:[#allocation10 + $0x138] sm:$0xff] }
 0x353   :  { %3547 = vmatmul.f32.gmra.mxu0 %v4341_v37  ;;  %3752 = vmatpush.msra.mxu2 %v3595_v38  ;;  %v3654_v37 = vld [vmem:[#allocation10 + $0x1f0] sm:$0xff]  ;;  %v3653_v38 = vld [vmem:[#allocation10 + $0x1e8] sm:$0xff]  ;;  %v3652_v39 = vld [vmem:[#allocation10 + $0x1e0] sm:$0xff]  ;;  %v4738_v0 = vpop.f32.mrf.mxu1 }
 0x354   :  { %3775 = vmatpush.msrb.mxu3 %v3611_v3  ;;  %3790 = vmatpush.msrb.mxu0 %v3635_v8  ;;  %v1870_v3 = vadd.f32 %v4938_v61, %v1847_v15  ;;  %v3575_v22 = vmax.f32 %v2120_v25, 0.0  ;;  %v3671_v15 = vld [vmem:[#allocation10 + $0x278] sm:$0xff] }
 0x355   :  { %3567 = vmatmul.f32.vlgmr.msrb.gmra.mxu1 %v4335_v21  ;;  %3753 = vmatpush.msra.mxu2 %v3594_v32  ;;  %v4939_v21 = vld [vmem:[#allocation36_spill] sm:$0xff]  ;;  %v4940_v32 = vld [vmem:[#allocation27_spill] sm:$0xff]  ;;  %v4742_v13 = vpop.f32.mrf.mxu2 }
 0x356   :  { %3809 = vmatpush.msra.mxu1 %v3655_v5  ;;  %3776 = vmatpush.msrb.mxu3 %v3610_v16  ;;  %v2189_v8 = vadd.f32 %v4939_v21, %v2166_v50  ;;  %v2054_v23 = vadd.f32 %v4940_v32, %v2031_v55  ;;  %v4941_v5 = vld [vmem:[#allocation22_spill] sm:$0xff]  ;;  %v3651_v55 = vld [vmem:[#allocation10 + $0x1d8] sm:$0xff] }
 0x357   :  { %3791 = vmatpush.msrb.mxu0 %v3634_v49  ;;  %3754 = vmatpush.msra.mxu2 %v3593_v20  ;;  %v1893_v16 = vadd.f32 %v4941_v5, %v1870_v3  ;;  %v4943_v49 = vld [vmem:[#allocation30_spill] sm:$0xff]  ;;  %v4945_v25 = vld [vmem:[#allocation35_spill] sm:$0xff] }
 0x358   :  { %3810 = vmatpush.msra.mxu1 %v3654_v37  ;;  %3777 = vmatpush.msrb.mxu3 %v3609_v36  ;;  %v2212_v26 = vadd.f32 %v4942_v28, %v2189_v8  ;;  %v2077_v20 = vadd.f32 %v4943_v49, %v2054_v23  ;;  %v3670_v37 = vld [vmem:[#allocation10 + $0x270] sm:$0xff]  ;;  %v4944_v36 = vld [vmem:[#allocation32_spill] sm:$0xff]  ;;  %v2146_v59 = vadd.f32 %v4945_v25, %v1695_v18  ;;  %v3669_v21 = vld [vmem:[#allocation10 + $0x268] sm:$0xff] }
 0x359   :  { %3792 = vmatpush.msrb.mxu0 %v3633_v7  ;;  %3755 = vmatpush.msra.mxu2 %v3592_v47  ;;  %v3686_v50 = vld [vmem:[#allocation10 + $0x2f0] sm:$0xff]  ;;  %v4950_v18 = vld [vmem:[#allocation49_spill] sm:$0xff]  ;;  %v4763_v25 = vpop.f32.mrf.mxu0 }
 0x35a   :  { %3811 = vmatpush.msra.mxu1 %v3653_v38  ;;  %3778 = vmatpush.msrb.mxu3 %v3608_v56  ;;  %v2100_v63 = vadd.f32 %v4944_v36, %v2077_v20  ;;  %v3630_v7 = vld [vmem:[#allocation10 + $0x130] sm:$0xff]  ;;  %v2350_v23 = vadd.f32 %v4950_v18, %v1696_v62  ;;  %v3629_v5 = vld [vmem:[#allocation10 + $0x128] sm:$0xff]  ;;  %v4759_v20 = vpop.f32.mrf.mxu3  ;;  %v3628_v36 = vld [vmem:[#allocation10 + $0x120] sm:$0xff] }
 0x35b   :  { %3793 = vmatpush.msrb.mxu0 %v3632_v45  ;;  %3756 = vmatmul.f32.vlgmr.msra.gmra.mxu2 %v3574_v6  ;;  %v4946_v47 = vld [vmem:[#allocation23_spill] sm:$0xff]  ;;  %v4948_v8 = vld [vmem:[#allocation34_spill] sm:$0xff] }
 0x35c   :  { %3779 = vmatmul.f32.vlgmr.msrb.gmra.mxu3 %v3575_v22  ;;  %3812 = vmatpush.msra.mxu1 %v3652_v39  ;;  %v1916_v38 = vadd.f32 %v4946_v47, %v1893_v16  ;;  %v4947_v56 = vld [vmem:[#allocation39_spill] sm:$0xff]  ;;  %v2123_v45 = vadd.f32 %v4948_v8, %v2100_v63  ;;  %v4949_v6 = vld [vmem:[#allocation38_spill] sm:$0xff]  ;;  %v4951_v16 = vld [vmem:[#allocation41_spill] sm:$0xff]  ;;  %v1698_v63 = vperm.slane %v4657_v9, 5 }
 0x35d   :  { %3832 = vmatpush.msrb.mxu2 %v3671_v15  ;;  %3855 = vmatpush.msra.mxu3 %v3687_v46  ;;  %v2235_v61 = vadd.f32 %v4947_v56, %v2212_v26  ;;  %v3650_v3 = vld [vmem:[#allocation10 + $0x1d0] sm:$0xff]  ;;  %v2169_v32 = vadd.f32 %v4949_v6, %v2146_v59  ;;  %v3685_v39 = vld [vmem:[#allocation10 + $0x2e8] sm:$0xff]  ;;  %v4952_v26 = vld [vmem:[#allocation40_spill] sm:$0xff]  ;;  %v4765_v59 = vpop.f32.mrf.mxu1  ;;  %v4770_v18 = vpop.f32.mrf.mxu2 }
 0x35e   :  { %3794 = vmatpush.msrb.mxu0 %v3631_v52  ;;  %3570 = vmatmul.f32.gmra.mxu1 %v4343_v44  ;;  %v3649_v28 = vld [vmem:[#allocation10 + $0x1c8] sm:$0xff]  ;;  %v3668_v44 = vld [vmem:[#allocation10 + $0x260] sm:$0xff] }
 0x35f   :  { %3813 = vmatpush.msra.mxu1 %v3651_v55  ;;  %3833 = vmatpush.msrb.mxu2 %v3670_v37  ;;  %v2258_v22 = vadd.f32 %v4951_v16, %v2235_v61  ;;  %v2192_v15 = vadd.f32 %v4952_v26, %v2169_v32  ;;  %v4953_v46 = vld [vmem:[#allocation52_spill] sm:$0xff]  ;;  %v4955_v47 = vld [vmem:[#allocation42_spill] sm:$0xff]  ;;  %v4956_v61 = vld [vmem:[#allocation53_spill] sm:$0xff] }
 0x360   :  { %3856 = vmatpush.msra.mxu3 %v3686_v50  ;;  %3795 = vmatpush.msrb.mxu0 %v3630_v7  ;;  %v2373_v49 = vadd.f32 %v4953_v46, %v2350_v23  ;;  %v3684_v52 = vld [vmem:[#allocation10 + $0x2e0] sm:$0xff]  ;;  %v3583_v50 = vmax.f32 %v1916_v38, 0.0  ;;  %v3584_v7 = vmax.f32 %v2123_v45, 0.0  ;;  %v3683_v23 = vld [vmem:[#allocation10 + $0x2d8] sm:$0xff]  ;;  %v3666_v45 = vld [vmem:[#allocation10 + $0x250] sm:$0xff] }
 0x361   :  { %3814 = vmatpush.msra.mxu1 %v3650_v3  ;;  %3834 = vmatpush.msrb.mxu2 %v3669_v21  ;;  %v4954_v55 = vld [vmem:[#allocation44_spill] sm:$0xff]  ;;  %v2215_v56 = vadd.f32 %v4955_v47, %v2192_v15  ;;  %v4957_v6 = vld [vmem:[#allocation45_spill] sm:$0xff]  ;;  %v4959_v26 = vld [vmem:[#allocation54_spill] sm:$0xff] }
 0x362   :  { %v2281_v37 = vadd.f32 %v4954_v55, %v2258_v22  ;;  %3857 = vmatpush.msra.mxu3 %v3685_v39  ;;  %3796 = vmatpush.msrb.mxu0 %v3629_v5  ;;  %v2396_v8 = vadd.f32 %v4956_v61, %v2373_v49  ;;  %v3648_v3 = vld [vmem:[#allocation10 + $0x1c0] sm:$0xff]  ;;  %v3667_v21 = vld [vmem:[#allocation10 + $0x258] sm:$0xff]  ;;  %v2764_v39 = vadd.f32 %v4626_v2, %v1698_v63  ;;  %v3682_v5 = vld [vmem:[#allocation10 + $0x2d0] sm:$0xff] }
 0x363   :  { %3815 = vmatpush.msra.mxu1 %v3649_v28  ;;  %3835 = vmatpush.msrb.mxu2 %v3668_v44  ;;  %v3627_v16 = vld [vmem:[#allocation10 + $0x118] sm:$0xff]  ;;  %v3626_v22 = vld [vmem:[#allocation10 + $0x110] sm:$0xff]  ;;  %v2353_v15 = vadd.f32 %v4959_v26, %v1696_v62  ;;  %v3681_v2 = vld [vmem:[#allocation10 + $0x2c8] sm:$0xff] }
 0x364   :  { %v2304_v32 = vadd.f32 %v4957_v6, %v2281_v37  ;;  %3858 = vmatpush.msra.mxu3 %v3684_v52  ;;  %3797 = vmatpush.msrb.mxu0 %v3628_v36  ;;  %v3647_v38 = vld [vmem:[#allocation10 + $0x1b8] sm:$0xff]  ;;  %v3646_v52 = vld [vmem:[#allocation10 + $0x1b0] sm:$0xff]  ;;  %v3665_v36 = vld [vmem:[#allocation10 + $0x248] sm:$0xff]  ;;  %v4784_v6 = vpop.f32.mrf.mxu3 }
 0x365   :  { %3759 = vmatmul.f32.gmra.mxu2 %v3583_v50  ;;  %3782 = vmatmul.f32.gmra.mxu3 %v3584_v7  ;;  %v4958_v28 = vld [vmem:[#allocation43_spill] sm:$0xff]  ;;  %v3625_v50 = vld [vmem:[#allocation10 + $0x108] sm:$0xff]  ;;  %v4963_v61 = vld [vmem:[#allocation56_spill] sm:$0xff] }
 0x366   :  { %3816 = vmatpush.msra.mxu1 %v3648_v3  ;;  %3836 = vmatpush.msrb.mxu2 %v3667_v21  ;;  %v2238_v44 = vadd.f32 %v4958_v28, %v2215_v56  ;;  %v4960_v46 = vld [vmem:[#allocation55_spill] sm:$0xff]  ;;  %v4962_v7 = vld [vmem:[#allocation46_spill] sm:$0xff]  ;;  %v2376_v56 = vadd.f32 %v4963_v61, %v2353_v15  ;;  %v4964_v3 = vld [vmem:[#allocation57_spill] sm:$0xff] }
 0x367   :  { %v2419_v49 = vadd.f32 %v4960_v46, %v2396_v8  ;;  %3859 = vmatpush.msra.mxu3 %v3683_v23  ;;  %3798 = vmatpush.msrb.mxu0 %v3627_v16  ;;  %v4961_v55 = vld [vmem:[#allocation47_spill] sm:$0xff]  ;;  %v3645_v62 = vld [vmem:[#allocation10 + $0x1a8] sm:$0xff]  ;;  %v3664_v8 = vld [vmem:[#allocation10 + $0x240] sm:$0xff]  ;;  %v2787_v23 = vadd.f32 %v4630_v30, %v2764_v39  ;;  %v4787_v16 = vpop.f32.mrf.mxu0 }
 0x368   :  { %v2327_v37 = vadd.f32 %v4961_v55, %v2304_v32  ;;  %3817 = vmatpush.msra.mxu1 %v3647_v38  ;;  %3837 = vmatpush.msrb.mxu2 %v3666_v45  ;;  %v2261_v47 = vadd.f32 %v4962_v7, %v2238_v44  ;;  %v3680_v32 = vld [vmem:[#allocation10 + $0x2c0] sm:$0xff]  ;;  %v4966_v44 = vld [vmem:[#allocation58_spill] sm:$0xff]  ;;  %v4793_v55 = vpop.f32.mrf.mxu1  ;;  %v3663_v30 = vld [vmem:[#allocation10 + $0x238] sm:$0xff] }
 0x369   :  { %v2442_v21 = vadd.f32 %v4964_v3, %v2419_v49  ;;  %3860 = vmatpush.msra.mxu3 %v3682_v5  ;;  %3799 = vmatpush.msrb.mxu0 %v3626_v22  ;;  %v3624_v38 = vld [vmem:[#allocation10 + $0x100] sm:$0xff]  ;;  %v2399_v26 = vadd.f32 %v4966_v44, %v2376_v56  ;;  %v2810_v49 = vadd.f32 %v4632_v42, %v2787_v23  ;;  %v3679_v39 = vld [vmem:[#allocation10 + $0x2b8] sm:$0xff]  ;;  %v3678_v3 = vld [vmem:[#allocation10 + $0x2b0] sm:$0xff] }
 0x36a   :  { %3818 = vmatpush.msra.mxu1 %v3646_v52  ;;  %3838 = vmatpush.msrb.mxu2 %v3665_v36  ;;  %v4965_v45 = vld [vmem:[#allocation48_spill] sm:$0xff]  ;;  %v3576_v22 = vmax.f32 %v2327_v37, 0.0  ;;  %v4968_v52 = vld [vmem:[#allocation50_spill] sm:$0xff]  ;;  %v4969_v7 = vld [vmem:[#allocation61_spill] sm:$0xff]  ;;  %v2767_v37 = vadd.f32 %v4634_v54, %v1698_v63 }
 0x36b   :  { %v2284_v28 = vadd.f32 %v4965_v45, %v2261_v47  ;;  %v4967_v15 = vld [vmem:[#allocation60_spill] sm:$0xff]  ;;  %3861 = vmatpush.msra.mxu3 %v3681_v2  ;;  %3800 = vmatpush.msrb.mxu0 %v3625_v50  ;;  %v2833_v42 = vadd.f32 %v4641_v48, %v2810_v49  ;;  %v4801_v2 = vpop.f32.mrf.mxu2  ;;  %v3662_v50 = vld [vmem:[#allocation10 + $0x230] sm:$0xff]  ;;  %v3677_v54 = vld [vmem:[#allocation10 + $0x2a8] sm:$0xff] }
 0x36c   :  { %v2465_v46 = vadd.f32 %v4967_v15, %v2442_v21  ;;  %v3644_v5 = vld [vmem:[#allocation10 + $0x1a0] sm:$0xff]  ;;  %3819 = vmatpush.msra.mxu1 %v3645_v62  ;;  %3839 = vmatpush.msrb.mxu2 %v3664_v8  ;;  %v3703_v61 = vld [vmem:[#allocation10 + $0x378] sm:$0xff]  ;;  %v3702_v8 = vld [vmem:[#allocation10 + $0x370] sm:$0xff] }
 0x36d   :  { %v2307_v36 = vadd.f32 %v4968_v52, %v2284_v28  ;;  %3862 = vmatpush.msra.mxu3 %v3680_v32  ;;  %3801 = vmatpush.msrb.mxu0 %v3624_v38  ;;  %v3643_v56 = vld [vmem:[#allocation10 + $0x198] sm:$0xff]  ;;  %v3642_v23 = vld [vmem:[#allocation10 + $0x190] sm:$0xff]  ;;  %v2856_v32 = vadd.f32 %v4643_v51, %v2833_v42  ;;  %v3661_v38 = vld [vmem:[#allocation10 + $0x228] sm:$0xff] }
 0x36e   :  { %v2488_v47 = vadd.f32 %v4969_v7, %v2465_v46  ;;  %3802 = vmatmul.f32.vlgmr.msrb.gmra.mxu0 %v3576_v22  ;;  %3820 = vmatpush.msra.mxu1 %v3644_v5  ;;  %v4970_v21 = vld [vmem:[#allocation59_spill] sm:$0xff]  ;;  %v4972_v45 = vld [vmem:[#allocation62_spill] sm:$0xff]  ;;  %v2790_v5 = vadd.f32 %v4637_v27, %v2767_v37  ;;  %v1699_v22 = vperm.slane %v4657_v9, 6  ;;  %v3660_v51 = vld [vmem:[#allocation10 + $0x220] sm:$0xff]  ;;  %v4812_v7 = vpop.f32.mrf.mxu3 }
 0x36f   :  { %v2422_v62 = vadd.f32 %v4970_v21, %v2399_v26  ;;  %3840 = vmatpush.msrb.mxu2 %v3663_v30  ;;  %3863 = vmatpush.msra.mxu3 %v3679_v39  ;;  %v4971_v63 = vld [vmem:[#allocation51_spill] sm:$0xff]  ;;  %v3701_v46 = vld [vmem:[#allocation10 + $0x368] sm:$0xff]  ;;  %v3676_v49 = vld [vmem:[#allocation10 + $0x2a0] sm:$0xff]  ;;  %v2879_v27 = vadd.f32 %v4647_v41, %v2856_v32  ;;  %v4816_v37 = vpop.f32.mrf.mxu0 }
 0x370   :  { %3878 = vmatpush.msra.mxu0 %v3703_v61  ;;  %3821 = vmatpush.msra.mxu1 %v3643_v56  ;;  %v2330_v48 = vadd.f32 %v4971_v63, %v2307_v36  ;;  %v4973_v44 = vld [vmem:[#allocation63_spill] sm:$0xff]  ;;  %v3641_v26 = vld [vmem:[#allocation10 + $0x188] sm:$0xff]  ;;  %v4974_v30 = vld [vmem:[#allocation64_spill] sm:$0xff]  ;;  %v2813_v56 = vadd.f32 %v4639_v43, %v2790_v5  ;;  %v4818_v42 = vpop.f32.mrf.mxu1  ;;  %v2971_v41 = vadd.f32 %v4680_v10, %v1699_v22 }
 0x371   :  { %v2445_v28 = vadd.f32 %v4972_v45, %v2422_v62  ;;  %v2511_v15 = vadd.f32 %v4973_v44, %v2488_v47  ;;  %3841 = vmatpush.msrb.mxu2 %v3662_v50  ;;  %3864 = vmatpush.msra.mxu3 %v3678_v3  ;;  %v4975_v52 = vld [vmem:[#allocation65_spill] sm:$0xff]  ;;  %v3659_v50 = vld [vmem:[#allocation10 + $0x218] sm:$0xff]  ;;  %v4976_v21 = vld [vmem:[#allocation66_spill] sm:$0xff]  ;;  %v2902_v43 = vadd.f32 %v4649_v4, %v2879_v27  ;;  %v3578_v27 = vmax.f32 %v4592_v17, 0.0 }
 0x372   :  { %3879 = vmatpush.msra.mxu0 %v3702_v8  ;;  %3822 = vmatpush.msra.mxu1 %v3642_v23  ;;  %v3700_v47 = vld [vmem:[#allocation10 + $0x360] sm:$0xff]  ;;  %v3585_v3 = vmax.f32 %v2330_v48, 0.0  ;;  %v3675_v8 = vld [vmem:[#allocation10 + $0x298] sm:$0xff]  ;;  %v3674_v45 = vld [vmem:[#allocation10 + $0x290] sm:$0xff]  ;;  %v2994_v4 = vadd.f32 %v4684_v1, %v2971_v41 }
 0x373   :  { %v2468_v39 = vadd.f32 %v4974_v30, %v2445_v28  ;;  %v2534_v36 = vadd.f32 %v4975_v52, %v2511_v15  ;;  %3842 = vmatpush.msrb.mxu2 %v3661_v38  ;;  %3865 = vmatpush.msra.mxu3 %v3677_v54  ;;  %v3640_v61 = vld [vmem:[#allocation10 + $0x180] sm:$0xff]  ;;  %v3699_v23 = vld [vmem:[#allocation10 + $0x358] sm:$0xff]  ;;  %v2836_v38 = vadd.f32 %v4651_v24, %v2813_v56  ;;  %v4826_v32 = vpop.f32.mrf.mxu2  ;;  %v3658_v54 = vld [vmem:[#allocation10 + $0x210] sm:$0xff] }
 0x374   :  { %3880 = vmatpush.msra.mxu0 %v3701_v46  ;;  %3823 = vmatpush.msra.mxu1 %v3641_v26  ;;  %v3719_v48 = vld [vmem:[#allocation10 + $0x3f8] sm:$0xff]  ;;  %v2925_v24 = vadd.f32 %v4667_v31, %v2902_v43  ;;  %v3698_v44 = vld [vmem:[#allocation10 + $0x350] sm:$0xff]  ;;  %v3657_v10 = vld [vmem:[#allocation10 + $0x208] sm:$0xff] }
 0x375   :  { %v2491_v62 = vadd.f32 %v4976_v21, %v2468_v39  ;;  %3843 = vmatpush.msrb.mxu2 %v3660_v51  ;;  %3866 = vmatpush.msra.mxu3 %v3676_v49  ;;  %v3577_v63 = vmax.f32 %v2534_v36, 0.0  ;;  %v2859_v28 = vadd.f32 %v4654_v60, %v2836_v38  ;;  %v4977_v15 = vld [vmem:[#allocation67_spill] sm:$0xff]  ;;  %v3673_v5 = vld [vmem:[#allocation10 + $0x288] sm:$0xff]  ;;  %v3017_v49 = vadd.f32 %v4709_v33, %v2994_v4  ;;  %v3656_v31 = vld [vmem:[#allocation10 + $0x200] sm:$0xff] }
 0x376   :  { %3881 = vmatpush.msra.mxu0 %v3700_v47  ;;  %3824 = vmatpush.msra.mxu1 %v3640_v61  ;;  %v3718_v26 = vld [vmem:[#allocation10 + $0x3f0] sm:$0xff]  ;;  %v2948_v51 = vadd.f32 %v4670_v19, %v2925_v24  ;;  %v3697_v60 = vld [vmem:[#allocation10 + $0x348] sm:$0xff]  ;;  %v4978_v30 = vld [vmem:[#allocation68_spill] sm:$0xff]  ;;  %v1700_v39 = vperm.slane %v4657_v9, 7  ;;  %v3246_v52 = vpop.f32.mrf.mxu3 }
 0x377   :  { %3805 = vmatmul.f32.gmra.mxu0 %v3585_v3  ;;  %3844 = vmatpush.msrb.mxu2 %v3659_v50  ;;  %v2514_v46 = vadd.f32 %v4977_v15, %v2491_v62  ;;  %v3717_v36 = vld [vmem:[#allocation10 + $0x3e8] sm:$0xff]  ;;  %v3672_v47 = vld [vmem:[#allocation10 + $0x280] sm:$0xff]  ;;  %v2882_v61 = vadd.f32 %v4662_v35, %v2859_v28  ;;  %v3040_v56 = vadd.f32 %v4715_v14, %v3017_v49  ;;  %v4838_v19 = vpop.f32.mrf.mxu0  ;;  %v3695_v14 = vld [vmem:[#allocation10 + $0x338] sm:$0xff]  ;;  %v3587_v28 = vmax.f32 %v4595_v58, 0.0 }
 0x378   :  { %3867 = vmatpush.msra.mxu3 %v3675_v8  ;;  %3882 = vmatpush.msra.mxu0 %v3699_v23  ;;  %v3696_v33 = vld [vmem:[#allocation10 + $0x340] sm:$0xff]  ;;  %v3579_v21 = vmax.f32 %v2948_v51, 0.0  ;;  %v2974_v62 = vadd.f32 %v4703_v34, %v1699_v22  ;;  %v3203_v35 = vpop.f32.mrf.mxu1  ;;  %v3178_v23 = vadd.f32 %v4787_v16, %v1700_v39  ;;  %v3715_v17 = vld [vmem:[#allocation10 + $0x3d8] sm:$0xff]  ;;  %v3694_v9 = vld [vmem:[#allocation10 + $0x330] sm:$0xff] }
 0x379   :  { %3825 = vmatmul.f32.vlgmr.msra.gmra.mxu1 %v3577_v63  ;;  %3845 = vmatpush.msrb.mxu2 %v3658_v54  ;;  %v2537_v1 = vadd.f32 %v4978_v30, %v2514_v46  ;;  %v3716_v50 = vld [vmem:[#allocation10 + $0x3e0] sm:$0xff]  ;;  %v2905_v3 = vadd.f32 %v4665_v11, %v2882_v61  ;;  %v3063_v11 = vadd.f32 %v4729_v57, %v3040_v56  ;;  %v3714_v22 = vld [vmem:[#allocation10 + $0x3d0] sm:$0xff]  ;;  %v3713_v57 = vld [vmem:[#allocation10 + $0x3c8] sm:$0xff] }
 0x37a   :  { %3901 = vmatpush.msrb.mxu1 %v3719_v48  ;;  %3868 = vmatpush.msra.mxu3 %v3674_v45  ;;  %v2997_v43 = vadd.f32 %v4707_v29, %v2974_v62  ;;  %v3201_v34 = vadd.f32 %v4818_v42, %v3178_v23  ;;  %v3692_v42 = vld [vmem:[#allocation10 + $0x320] sm:$0xff]  ;;  %v3690_v58 = vld [vmem:[#allocation10 + $0x310] sm:$0xff]  ;;  %v3709_v30 = vld [vmem:[#allocation10 + $0x3a8] sm:$0xff] }
 0x37b   :  { %3883 = vmatpush.msra.mxu0 %v3698_v44  ;;  %3846 = vmatpush.msrb.mxu2 %v3657_v10  ;;  %v3586_v8 = vmax.f32 %v2537_v1, 0.0  ;;  %v2928_v38 = vadd.f32 %v4687_v40, %v2905_v3  ;;  %v3226_v41 = vpop.f32.mrf.mxu2  ;;  %v3086_v63 = vadd.f32 %v4733_v53, %v3063_v11  ;;  %v3693_v40 = vld [vmem:[#allocation10 + $0x328] sm:$0xff]  ;;  %v3181_v10 = vadd.f32 %v4816_v37, %v1700_v39  ;;  %v3688_v1 = vld [vmem:[#allocation10 + $0x300] sm:$0xff]  ;;  %v3707_v56 = vld [vmem:[#allocation10 + $0x398] sm:$0xff] }
 0x37c   :  { %3902 = vmatpush.msrb.mxu1 %v3718_v26  ;;  %3869 = vmatpush.msra.mxu3 %v3673_v5  ;;  %v3020_v54 = vadd.f32 %v4738_v0, %v2997_v43  ;;  %v3224_v29 = vadd.f32 %v4826_v32, %v3201_v34  ;;  %v3691_v32 = vld [vmem:[#allocation10 + $0x318] sm:$0xff]  ;;  %v3689_v37 = vld [vmem:[#allocation10 + $0x308] sm:$0xff]  ;;  %v3706_v3 = vld [vmem:[#allocation10 + $0x390] sm:$0xff] }
 0x37d   :  { %3884 = vmatpush.msra.mxu0 %v3697_v60  ;;  %3847 = vmatpush.msrb.mxu2 %v3656_v31  ;;  %v2951_v16 = vadd.f32 %v4692_v12, %v2928_v38  ;;  %v3109_v45 = vadd.f32 %v4765_v59, %v3086_v63  ;;  %v3712_v12 = vld [vmem:[#allocation10 + $0x3c0] sm:$0xff]  ;;  %v3204_v26 = vadd.f32 %v3203_v35, %v3181_v10  ;;  %v3729_v63 = vld [vmem:[#allocation10 + $0x448] sm:$0xff] }
 0x37e   :  { %3903 = vmatpush.msrb.mxu1 %v3717_v36  ;;  %3870 = vmatpush.msra.mxu3 %v3672_v47  ;;  %v3043_v48 = vadd.f32 %v4742_v13, %v3020_v54  ;;  %v3249_v24 = vpop.f32.mrf.mxu3  ;;  %v3247_v15 = vadd.f32 %v3246_v52, %v3224_v29  ;;  %v3711_v13 = vld [vmem:[#allocation10 + $0x3b8] sm:$0xff]  ;;  %v3708_v52 = vld [vmem:[#allocation10 + $0x3a0] sm:$0xff] }
 0x37f   :  { %3885 = vmatpush.msra.mxu0 %v3696_v33  ;;  %3848 = vmatmul.f32.vlgmr.msrb.gmra.mxu2 %v3578_v27  ;;  %v3588_v0 = vmax.f32 %v2951_v16, 0.0  ;;  %v3132_v53 = vadd.f32 %v4770_v18, %v3109_v45  ;;  %v3272_v4 = vpop.f32.mrf.mxu0  ;;  %v3710_v18 = vld [vmem:[#allocation10 + $0x3b0] sm:$0xff]  ;;  %v3227_v60 = vadd.f32 %v3226_v41, %v3204_v26  ;;  %v3704_v23 = vld [vmem:[#allocation10 + $0x380] sm:$0xff]  ;;  %v3733_v41 = vld [vmem:[#allocation10 + $0x468] sm:$0xff] }
 0x380   :  { %3871 = vmatmul.f32.vlgmr.msra.gmra.mxu3 %v3579_v21  ;;  %3904 = vmatpush.msrb.mxu1 %v3716_v50  ;;  %v3292_v44 = vpop.f32.mrf.mxu1  ;;  %v3066_v59 = vadd.f32 %v4759_v20, %v3043_v48  ;;  %v3270_v5 = vadd.f32 %v4838_v19, %v3247_v15  ;;  %v3735_v19 = vld [vmem:[#allocation10 + $0x478] sm:$0xff]  ;;  %v3734_v27 = vld [vmem:[#allocation10 + $0x470] sm:$0xff]  ;;  %v3725_v48 = vld [vmem:[#allocation10 + $0x428] sm:$0xff] }
 0x381   :  { %3886 = vmatpush.msra.mxu0 %v3695_v14  ;;  %3828 = vmatmul.f32.gmra.mxu1 %v3586_v8  ;;  %v3155_v49 = vadd.f32 %v4784_v6, %v3132_v53  ;;  %v3250_v6 = vadd.f32 %v3249_v24, %v3227_v60  ;;  %v3705_v14 = vld [vmem:[#allocation10 + $0x388] sm:$0xff]  ;;  %v3730_v16 = vld [vmem:[#allocation10 + $0x450] sm:$0xff]  ;;  %v3727_v29 = vld [vmem:[#allocation10 + $0x438] sm:$0xff] }
 0x382   :  { %3905 = vmatpush.msrb.mxu1 %v3715_v17  ;;  %v3089_v51 = vadd.f32 %v4763_v25, %v3066_v59  ;;  %v3293_v31 = vadd.f32 %v3292_v44, %v3270_v5  ;;  %3924 = vmatpush.msra.mxu2 %v3735_v19  ;;  %v3724_v45 = vld [vmem:[#allocation10 + $0x420] sm:$0xff]  ;;  %v4000_v44 = vld [vmem:[#allocation8 + $0x8] ss:$0 sm:$0xff] }
 0x383   :  { %3887 = vmatpush.msra.mxu0 %v3694_v9  ;;  %v3315_v46 = vpop.f32.mrf.mxu2  ;;  %v3580_v36 = vmax.f32 %v3155_v49, 0.0  ;;  %v3732_v9 = vld [vmem:[#allocation10 + $0x460] sm:$0xff] }
 0x384   :  { %3906 = vmatpush.msrb.mxu1 %v3714_v22  ;;  %v3112_v20 = vadd.f32 %v4793_v55, %v3089_v51  ;;  %v3316_v39 = vadd.f32 %v3315_v46, %v3293_v31  ;;  %v3273_v55 = vadd.f32 %v3272_v4, %v3250_v6  ;;  %3925 = vmatpush.msra.mxu2 %v3734_v27  ;;  %v3731_v22 = vld [vmem:[#allocation10 + $0x458] sm:$0xff]  ;;  %v3720_v53 = vld [vmem:[#allocation10 + $0x400] sm:$0xff] }
 0x385   :  { %3888 = vmatpush.msra.mxu0 %v3693_v40  ;;  %v3728_v40 = vld [vmem:[#allocation10 + $0x440] sm:$0xff] }
 0x386   :  { %3907 = vmatpush.msrb.mxu1 %v3713_v57  ;;  %v3135_v47 = vadd.f32 %v4801_v2, %v3112_v20  ;;  %v3338_v61 = vpop.f32.mrf.mxu3  ;;  %3926 = vmatpush.msra.mxu2 %v3733_v41  ;;  %v3726_v57 = vld [vmem:[#allocation10 + $0x430] sm:$0xff] }
 0x387   :  { %3889 = vmatpush.msra.mxu0 %v3692_v42  ;;  %3851 = vmatmul.f32.gmra.mxu2 %v3587_v28  ;;  %v3361_v25 = vpop.f32.mrf.mxu0  ;;  %v3339_v50 = vadd.f32 %v3338_v61, %v3316_v39  ;;  %v3723_v42 = vld [vmem:[#allocation10 + $0x418] sm:$0xff] }
 0x388   :  { %3874 = vmatmul.f32.gmra.mxu3 %v3588_v0  ;;  %3908 = vmatpush.msrb.mxu1 %v3712_v12  ;;  %v3295_v33 = vpop.f32.mrf.mxu1  ;;  %v3158_v21 = vadd.f32 %v4812_v7, %v3135_v47  ;;  %v3722_v12 = vld [vmem:[#allocation10 + $0x410] sm:$0xff]  ;;  %v3721_v0 = vld [vmem:[#allocation10 + $0x408] sm:$0xff] }
 0x389   :  { %3890 = vmatpush.msra.mxu0 %v3691_v32  ;;  %v3296_v2 = vadd.f32 %v3295_v33, %v3273_v55  ;;  %v3362_v35 = vadd.f32 %v3361_v25, %v3339_v50  ;;  %3927 = vmatpush.msra.mxu2 %v3732_v9 }
 0x38a   :  { %3909 = vmatpush.msrb.mxu1 %v3711_v13  ;;  %v3589_v17 = vmax.f32 %v3158_v21, 0.0 }
 0x38b   :  { %3891 = vmatpush.msra.mxu0 %v3690_v58  ;;  %v3318_v62 = vpop.f32.mrf.mxu2  ;;  %v3581_v38 = vmax.f32 %v3362_v35, 0.0  ;;  %3928 = vmatpush.msra.mxu2 %v3731_v22 }
 0x38c   :  { %3910 = vmatpush.msrb.mxu1 %v3710_v18  ;;  %v3319_v8 = vadd.f32 %v3318_v62, %v3296_v2 }
 0x38d   :  { %3892 = vmatpush.msra.mxu0 %v3689_v37  ;;  %3929 = vmatpush.msra.mxu2 %v3730_v16 }
 0x38e   :  { %3911 = vmatpush.msrb.mxu1 %v3709_v30  ;;  %v3341_v43 = vpop.f32.mrf.mxu3 }
 0x38f   :  { %3893 = vmatpush.msra.mxu0 %v3688_v1  ;;  %v3364_v11 = vpop.f32.mrf.mxu0  ;;  %v3342_v34 = vadd.f32 %v3341_v43, %v3319_v8  ;;  %3930 = vmatpush.msra.mxu2 %v3729_v63 }
 0x390   :  { %3894 = vmatmul.f32.vlgmr.msra.gmra.mxu0 %v3580_v36  ;;  %3912 = vmatpush.msrb.mxu1 %v3708_v52  ;;  %v3384_v28 = vpop.f32.mrf.mxu1 }
 0x391   :  { %v3365_v7 = vadd.f32 %v3364_v11, %v3342_v34  ;;  %3931 = vmatpush.msra.mxu2 %v3728_v40  ;;  %v3385_v15 = vadd.f32 %v4000_v44, %v3384_v28 }
 0x392   :  { %3913 = vmatpush.msrb.mxu1 %v3707_v56 }
 0x393   :  { %v3590_v54 = vmax.f32 %v3365_v7, 0.0  ;;  %3932 = vmatpush.msra.mxu2 %v3727_v29 }
 0x394   :  { %3914 = vmatpush.msrb.mxu1 %v3706_v3 }
 0x395   :  { %3933 = vmatpush.msra.mxu2 %v3726_v57 }
 0x396   :  { %3915 = vmatpush.msrb.mxu1 %v3705_v14  ;;  %v3407_v24 = vpop.f32.mrf.mxu2 }
 0x397   :  { %3934 = vmatpush.msra.mxu2 %v3725_v48  ;;  %v3430_v32 = vpop.f32.mrf.mxu3  ;;  %v3408_v46 = vadd.f32 %v3407_v24, %v3385_v15 }
 0x398   :  { %3897 = vmatmul.f32.gmra.mxu0 %v3589_v17  ;;  %3916 = vmatpush.msrb.mxu1 %v3704_v23  ;;  %v3387_v4 = vpop.f32.mrf.mxu1  ;;  %v4001_v17 = vld [vmem:[#allocation11] ss:$0 sm:$0xff] }
 0x399   :  { %3917 = vmatmul.f32.vlgmr.msrb.gmra.mxu1 %v3581_v38  ;;  %3935 = vmatpush.msra.mxu2 %v3724_v45  ;;  %v3431_v58 = vadd.f32 %v3430_v32, %v3408_v46  ;;  %v3388_v49 = vadd.f32 %v4000_v44, %v3387_v4 }
 0x39b   :  { %3936 = vmatpush.msra.mxu2 %v3723_v42 }
 0x39d   :  { %3937 = vmatpush.msra.mxu2 %v3722_v12 }
 0x39f   :  { %3938 = vmatpush.msra.mxu2 %v3721_v0 }
 0x3a0   :  { %v3410_v13 = vpop.f32.mrf.mxu2  ;;  %v3433_v26 = vpop.f32.mrf.mxu3 }
 0x3a1   :  { %3920 = vmatmul.f32.gmra.mxu1 %v3590_v54  ;;  %3939 = vmatpush.msra.mxu2 %v3720_v53  ;;  %v3411_v60 = vadd.f32 %v3410_v13, %v3388_v49 }
 0x3a3   :  { %v3453_v10 = vpop.f32.mrf.mxu0  ;;  %v3434_v39 = vadd.f32 %v3433_v26, %v3411_v60 }
 0x3a4   :  { %v3454_v18 = vadd.f32 %v3453_v10, %v3431_v58 }
 0x3ac   :  { %v3456_v5 = vpop.f32.mrf.mxu0 }
 0x3ad   :  { %v3457_v36 = vadd.f32 %v3456_v5, %v3434_v39 }
 0x3ae   :  { %v3476_v59 = vpop.f32.mrf.mxu1 }
 0x3af   :  { %v3477_v37 = vadd.f32 %v3476_v59, %v3454_v18 }
 0x3b7   :  { %v3479_v31 = vpop.f32.mrf.mxu1 }
 0x3b8   :  { %v3480_v25 = vadd.f32 %v3479_v31, %v3457_v36 }
 0x3ba   :  { %v3499_v51 = vpop.f32.mrf.mxu2 }
 0x3bb   :  { %v3500_v30 = vadd.f32 %v3499_v51, %v3477_v37  ;;  %v3522_v20 = vpop.f32.mrf.mxu3 }
 0x3bd   :  { %v3523_v52 = vadd.f32 %v3522_v20, %v3500_v30 }
 0x3c4   :  { %v3502_v47 = vpop.f32.mrf.mxu2  ;;  %v3525_v27 = vpop.f32.mrf.mxu3 }
 0x3c5   :  { %v3503_v19 = vadd.f32 %v3502_v47, %v3480_v25 }
 0x3c7   :  { %v3545_v1 = vpop.f32.mrf.mxu0  ;;  %v3526_v50 = vadd.f32 %v3525_v27, %v3503_v19 }
 0x3c8   :  { %v3546_v61 = vadd.f32 %v3545_v1, %v3523_v52 }
 0x3d0   :  { %v3548_v55 = vpop.f32.mrf.mxu0 }
 0x3d1   :  { %v3549_v3 = vadd.f32 %v3548_v55, %v3526_v50 }
 0x3d2   :  { %v3568_v6 = vpop.f32.mrf.mxu1 }
 0x3d3   :  { %v3569_v56 = vadd.f32 %v3568_v6, %v3546_v61 }
 0x3d5   :  { %v3582_v33 = vmax.f32 %v3569_v56, 0.0 }
 0x3d7   :  { %3940 = vmatmul.f32.vlgmr.msra.gmra.mxu2 %v3582_v33 }
 0x3db   :  { %v3571_v21 = vpop.f32.mrf.mxu1 }
 0x3dc   :  { %v3572_v62 = vadd.f32 %v3571_v21, %v3549_v3 }
 0x3de   :  { %v3591_v2 = vmax.f32 %v3572_v62, 0.0  ;;  %v3757_v35 = vpop.f32.mrf.mxu2 }
 0x3df   :  { %v3780_v8 = vpop.f32.mrf.mxu3  ;;  %v3758_v43 = vadd.f32 %v4001_v17, %v3757_v35 }
 0x3e0   :  { %3943 = vmatmul.f32.gmra.mxu2 %v3591_v2 }
 0x3e1   :  { %v3781_v41 = vadd.f32 %v3780_v8, %v3758_v43 }
 0x3e8   :  { %v3760_v14 = vpop.f32.mrf.mxu2  ;;  %v3783_v9 = vpop.f32.mrf.mxu3 }
 0x3e9   :  { %v3761_v54 = vadd.f32 %v4001_v17, %v3760_v14 }
 0x3eb   :  { %v3803_v23 = vpop.f32.mrf.mxu0  ;;  %v3784_v48 = vadd.f32 %v3783_v9, %v3761_v54 }
 0x3ec   :  { %v3804_v7 = vadd.f32 %v3803_v23, %v3781_v41 }
 0x3f4   :  { %v3806_v34 = vpop.f32.mrf.mxu0 }
 0x3f5   :  { %v3807_v28 = vadd.f32 %v3806_v34, %v3784_v48 }
 0x3f6   :  { %v3826_v38 = vpop.f32.mrf.mxu1 }
 0x3f7   :  { %v3827_v16 = vadd.f32 %v3826_v38, %v3804_v7 }
 0x3fe   :  { %v3829_v22 = vpop.f32.mrf.mxu1 }
 0x3ff   :  { %v3830_v12 = vadd.f32 %v3829_v22, %v3807_v28 }
 0x402   :  { %v3849_v11 = vpop.f32.mrf.mxu2 }
 0x403   :  { %v3850_v63 = vadd.f32 %v3849_v11, %v3827_v16  ;;  %v3872_v29 = vpop.f32.mrf.mxu3 }
 0x405   :  { %v3873_v45 = vadd.f32 %v3872_v29, %v3850_v63 }
 0x40a   :  { %v3852_v40 = vpop.f32.mrf.mxu2 }
 0x40b   :  { %v3853_v53 = vadd.f32 %v3852_v40, %v3830_v12  ;;  %v3875_v32 = vpop.f32.mrf.mxu3 }
 0x40d   :  { %v3895_v57 = vpop.f32.mrf.mxu0  ;;  %v3876_v15 = vadd.f32 %v3875_v32, %v3853_v53 }
 0x40e   :  { %v3896_v24 = vadd.f32 %v3895_v57, %v3873_v45 }
 0x415   :  { %v3898_v10 = vpop.f32.mrf.mxu0 }
 0x416   :  { %v3918_v42 = vpop.f32.mrf.mxu1  ;;  %v3899_v59 = vadd.f32 %v3898_v10, %v3876_v15 }
 0x417   :  { %v3919_v0 = vadd.f32 %v3918_v42, %v3896_v24 }
 0x41e   :  { %v3921_v13 = vpop.f32.mrf.mxu1 }
 0x41f   :  { %v3922_v46 = vadd.f32 %v3921_v13, %v3899_v59 }
 0x45a   :  { %v3941_v4 = vpop.f32.mrf.mxu2 }
 0x45b   :  { %v3942_v44 = vadd.f32 %v3941_v4, %v3919_v0 }
 0x45d   :  { %3947 = vst [vmem:[#allocation13] sm:$0xff] %v3942_v44 }
 0x463   :  { %v3944_v58 = vpop.f32.mrf.mxu2 }
 0x464   :  { %v3945_v26 = vadd.f32 %v3944_v58, %v3922_v46 }
 0x466   :  { %3948 = vst [vmem:[#allocation13 + $0x8] sm:$0xff] %v3945_v26 }
 0x467   :  { %3961 = dma.vmem_to_hbm [thread:$0]  %s3954_s5, 256, %s3956_s29, [#allocation4], %s4186_s15, %s4186_s15, %s4187_s16  }
 0x468   :  { %4179 = dma.done.wait [#allocation4], 256  }
 0x469   :  { %4180 = vsyncadd [#allocation4], 4294967040 }
 0x46a   :  { %3966 = vsyncpa [#allocation3], 1 }
 0x46b   :  { %3967 = vsyncpa [#allocation6], 1 }
 0x46c   :  { %3968 = vsyncpa [#allocation9], 1 }
 0x46d   :  { %3969 = vsyncpa [#allocation12], 1 }
 0x46e   :  { %3970 = vsyncpa [#allocation4], 1 }

</bundles_post_ra>
